<compile_context>
chip_gen: v7x
topology: tpu7x:2x2x1
jax: 0.10.0
libtpu: 0.0.40
codegen_flags: <defaults>
</compile_context>

<pallas_src>
import jax
import jax.numpy as jnp
from jax.experimental import pallas as pl
from jax.experimental.pallas import tpu as pltpu


# ---------------------------------------------------------------------------
# Fused kernel: one batch element per grid step, everything stays in VMEM.
# ---------------------------------------------------------------------------

def _ffm_fused_kernel(hi_ref, lo_ref, ah_ref, aw_ref,
                      dw_w_ref, dw_shift_ref,
                      w_low_ref, b_low_ref, w_high_ref, b_high_ref,
                      o_ref, pad_ref):
    """
    hi_ref:       (1, H, W, Ch)    higher-res feature (NHWC tile)
    lo_ref:       (1, h, w, Cl)    lower-res feature  (NHWC tile)
    ah_ref:       (H, h)           bilinear row-upsample weights (align_corners)
    aw_ref:       (W, w)           bilinear col-upsample weights
    dw_w_ref:     (3, 3, Cl)       depthwise weights with BN scale folded in (f32)
    dw_shift_ref: (1, Cl)          folded BN shift for the depthwise stage
    w_low_ref:    (Cl, Cout) bf16  1x1 lower branch, BN scale folded in
    b_low_ref:    (1, Cout)  f32   folded bias (conv bias * bn_scale + bn_shift)
    w_high_ref:   (Ch, Cout) bf16  1x1 higher branch, BN scale folded in
    b_high_ref:   (1, Cout)  f32
    o_ref:        (1, H, W, Cout)
    pad_ref:      VMEM scratch (H+2, W+2, Cl) f32 — halo buffer for the 3x3 dwconv
    """
    H, W, Cout = o_ref.shape[1], o_ref.shape[2], o_ref.shape[3]
    h_in, w_in, Cl = lo_ref.shape[1], lo_ref.shape[2], lo_ref.shape[3]
    Ch = hi_ref.shape[3]

    # ---- 1) bilinear x-scale upsample, separable (align_corners=True) --------
    x = lo_ref[0].astype(jnp.float32)            # (h, w, Cl)
    ah = ah_ref[...]                             # (H, h)
    aw = aw_ref[...]                             # (W, w)

    t = jnp.zeros((H, w_in, Cl), jnp.float32)
    for hs in range(h_in):                       # h_in is tiny (spatial/scale)
        t = t + ah[:, hs:hs + 1][:, :, None] * x[hs:hs + 1, :, :]

    up = jnp.zeros((H, W, Cl), jnp.float32)
    for ws in range(w_in):
        up = up + aw[:, ws:ws + 1][None] * t[:, ws:ws + 1, :]

    # ---- 2) depthwise 3x3 (pad=1) + folded BN + ReLU, halo built in VMEM -----
    pad_ref[...] = jnp.zeros_like(pad_ref)
    pad_ref[1:H + 1, 1:W + 1, :] = up

    wdw = dw_w_ref[...].astype(jnp.float32)      # (3, 3, Cl)
    acc = jnp.zeros((H, W, Cl), jnp.float32)
    for kh in range(3):
        for kw in range(3):
            acc = acc + pad_ref[kh:kh + H, kw:kw + W, :] * wdw[kh:kh + 1, kw:kw + 1, :]
    dw_out = jnp.maximum(acc + dw_shift_ref[...][None], 0.0)   # (H, W, Cl)

    # ---- 3) 1x1 lower branch (conv + BN folded), bf16 MXU / f32 accumulate ---
    dw_flat = dw_out.reshape(H * W, Cl).astype(jnp.bfloat16)
    low_pw = jnp.dot(dw_flat, w_low_ref[...],
                     preferred_element_type=jnp.float32) + b_low_ref[...]

    # ---- 4) 1x1 higher branch (conv + BN folded) ------------------------------
    hi_flat = hi_ref[0].reshape(H * W, Ch).astype(jnp.bfloat16)
    high_pw = jnp.dot(hi_flat, w_high_ref[...],
                      preferred_element_type=jnp.float32) + b_high_ref[...]

    # ---- 5) add + ReLU, lane-dense store --------------------------------------
    fused = jnp.maximum(low_pw + high_pw, 0.0)
    o_ref[...] = fused.reshape(1, H, W, Cout).astype(o_ref.dtype)


# ---------------------------------------------------------------------------
# Host-side helpers
# ---------------------------------------------------------------------------

def _bilinear_matrix(in_size, out_size):
    """Weights A (out, in) s.t. out = A @ in reproduces F.interpolate(bilinear,
    align_corners=True) along one axis."""
    if in_size == 1:
        return jnp.ones((out_size, 1), jnp.float32)
    src = jnp.arange(out_size, dtype=jnp.float32) * (in_size - 1) / (out_size - 1)
    lo = jnp.clip(jnp.floor(src), 0, in_size - 2).astype(jnp.int32)
    frac = src - lo.astype(jnp.float32)
    a_lo = jax.nn.one_hot(lo, in_size, dtype=jnp.float32)
    a_hi = jax.nn.one_hot(lo + 1, in_size, dtype=jnp.float32)
    return (1.0 - frac)[:, None] * a_lo + frac[:, None] * a_hi


def _fold_bn(gamma, beta, mean, var, eps=1e-5):
    scale = gamma / jnp.sqrt(var + eps)
    shift = beta - mean * scale
    return scale, shift


def init_ffm_params(key, higher_in, lower_in, out_channels):
    """Synthetic parameters with BN pre-folded (inference semantics)."""
    assert lower_in == out_channels, "_DWConv with groups == in_channels"
    ks = iter(jax.random.split(key, 32))  # generous: 17 keys actually consumed

    def nrm(shape, s=0.1):
        return s * jax.random.normal(next(ks), shape, jnp.float32)

    C = out_channels
    # _DWConv: depthwise 3x3 (no bias) -> BN -> ReLU
    dw_w = nrm((3, 3, C))
    g1, b1 = 1.0 + nrm((C,), 0.05), nrm((C,), 0.05)
    m1, v1 = nrm((C,), 0.05), 1.0 + jnp.abs(nrm((C,), 0.1))
    s1, t1 = _fold_bn(g1, b1, m1, v1)
    dw_w_folded = dw_w * s1[None, None, :]
    dw_shift = t1.reshape(1, C)

    # conv_lower_res: 1x1 conv (bias) -> BN
    w_lo, bias_lo = nrm((C, C)), nrm((C,), 0.05)
    g2, b2 = 1.0 + nrm((C,), 0.05), nrm((C,), 0.05)
    m2, v2 = nrm((C,), 0.05), 1.0 + jnp.abs(nrm((C,), 0.1))
    s2, t2 = _fold_bn(g2, b2, m2, v2)
    w_lo_folded = (w_lo * s2[None, :]).astype(jnp.bfloat16)
    b_lo_folded = (bias_lo * s2 + t2).reshape(1, C)

    # conv_higher_res: 1x1 conv (bias) -> BN
    w_hi, bias_hi = nrm((higher_in, C)), nrm((C,), 0.05)
    g3, b3 = 1.0 + nrm((C,), 0.05), nrm((C,), 0.05)
    m3, v3 = nrm((C,), 0.05), 1.0 + jnp.abs(nrm((C,), 0.1))
    s3, t3 = _fold_bn(g3, b3, m3, v3)
    w_hi_folded = (w_hi * s3[None, :]).astype(jnp.bfloat16)
    b_hi_folded = (bias_hi * s3 + t3).reshape(1, C)

    return dict(dw_w=dw_w_folded, dw_shift=dw_shift,
                w_lo=w_lo_folded, b_lo=b_lo_folded,
                w_hi=w_hi_folded, b_hi=b_hi_folded)


# ---------------------------------------------------------------------------
# Public forward (NCHW in/out like the PyTorch module; NHWC inside)
# ---------------------------------------------------------------------------

def feature_fusion_forward(higher_nchw, lower_nchw, params, scale_factor=4):
    hi = jnp.transpose(higher_nchw, (0, 2, 3, 1))  # NCHW -> NHWC (boundary glue)
    lo = jnp.transpose(lower_nchw, (0, 2, 3, 1))
    N, H, W, Ch = hi.shape
    _, h, w, Cl = lo.shape
    assert H == h * scale_factor and W == w * scale_factor
    Cout = params["w_lo"].shape[1]
    assert Cl == Cout, "_DWConv assumes lower_in_channels == out_channels"

    ah = _bilinear_matrix(h, H)
    aw = _bilinear_matrix(w, W)

    out = pl.pallas_call(
        _ffm_fused_kernel,
        out_shape=jax.ShapeDtypeStruct((N, H, W, Cout), jnp.float32),
        grid=(N,),
        in_specs=[
            pl.BlockSpec((1, H, W, Ch), lambda n: (n, 0, 0, 0)),
            pl.BlockSpec((1, h, w, Cl), lambda n: (n, 0, 0, 0)),
            pl.BlockSpec((H, h), lambda n: (0, 0)),
            pl.BlockSpec((W, w), lambda n: (0, 0)),
            pl.BlockSpec((3, 3, Cl), lambda n: (0, 0, 0)),
            pl.BlockSpec((1, Cl), lambda n: (0, 0)),
            pl.BlockSpec((Cl, Cout), lambda n: (0, 0)),
            pl.BlockSpec((1, Cout), lambda n: (0, 0)),
            pl.BlockSpec((Ch, Cout), lambda n: (0, 0)),
            pl.BlockSpec((1, Cout), lambda n: (0, 0)),
        ],
        out_specs=pl.BlockSpec((1, H, W, Cout), lambda n: (n, 0, 0, 0)),
        scratch_shapes=[pltpu.VMEM((H + 2, W + 2, Cl), jnp.float32)],
        compiler_params=pltpu.CompilerParams(dimension_semantics=("parallel",)),
    )(hi, lo, ah, aw,
      params["dw_w"], params["dw_shift"],
      params["w_lo"], params["b_lo"],
      params["w_hi"], params["b_hi"])

    return jnp.transpose(out, (0, 3, 1, 2))  # NHWC -> NCHW
    # TODO(synk): for N==1 on v7x, add an H-strip "parallel" grid axis so both
    # TensorCores get work; with N>=2 the batch axis already feeds the megacore.


# ---------------------------------------------------------------------------
# Pure-JAX reference (same folded params / same bf16 rounding of matmul inputs)
# ---------------------------------------------------------------------------

def _ffm_reference(higher_nchw, lower_nchw, params, scale_factor=4):
    hi = jnp.transpose(higher_nchw, (0, 2, 3, 1)).astype(jnp.float32)
    lo = jnp.transpose(lower_nchw, (0, 2, 3, 1)).astype(jnp.float32)
    N, H, W, Ch = hi.shape
    _, h, w, Cl = lo.shape
    ah = _bilinear_matrix(h, H)
    aw = _bilinear_matrix(w, W)
    up = jnp.einsum("Hh,nhwc->nHwc", ah, lo)
    up = jnp.einsum("Ww,nHwc->nHWc", aw, up)
    pad = jnp.pad(up, ((0, 0), (1, 1), (1, 1), (0, 0)))
    acc = jnp.zeros_like(up)
    for kh in range(3):
        for kw in range(3):
            acc = acc + pad[:, kh:kh + H, kw:kw + W, :] * params["dw_w"][kh, kw, :]
    dw = jnp.maximum(acc + params["dw_shift"].reshape(1, 1, 1, -1), 0.0)
    low = jnp.einsum("nhwc,cd->nhwd",
                     dw.astype(jnp.bfloat16).astype(jnp.float32),
                     params["w_lo"].astype(jnp.float32)) + params["b_lo"].reshape(1, 1, 1, -1)
    high = jnp.einsum("nhwc,cd->nhwd",
                      hi.astype(jnp.bfloat16).astype(jnp.float32),
                      params["w_hi"].astype(jnp.float32)) + params["b_hi"].reshape(1, 1, 1, -1)
    out = jnp.maximum(low + high, 0.0)
    return jnp.transpose(out, (0, 3, 1, 2))


# ---------------------------------------------------------------------------
# Demo
# ---------------------------------------------------------------------------

if __name__ == "__main__":
    N = 2
    higher_in, lower_in, out_channels = 64, 128, 128   # standard Fast-SCNN FFM sizes
    scale = 4
    Hh, Wh = 16, 16                                    # higher-res spatial
    hl, wl = Hh // scale, Wh // scale                  # lower-res spatial (4, 4)

    key = jax.random.PRNGKey(0)
    k_hi, k_lo, k_p = jax.random.split(key, 3)
    higher = jax.random.normal(k_hi, (N, higher_in, Hh, Wh), jnp.float32)   # NCHW
    lower = jax.random.normal(k_lo, (N, lower_in, hl, wl), jnp.float32)     # NCHW
    params = init_ffm_params(k_p, higher_in, lower_in, out_channels)

    out = feature_fusion_forward(higher, lower, params, scale_factor=scale)
    out = jax.block_until_ready(out)
    assert out.shape == (N, out_channels, Hh, Wh), out.shape

    ref = jax.block_until_ready(_ffm_reference(higher, lower, params, scale_factor=scale))
    err = float(jnp.max(jnp.abs(out - ref)))
    assert err < 5e-2, f"max abs error vs reference: {err}"

    print("KERNEL_OK")
</pallas_src>

<mosaic_0001>
module attributes {stable_mosaic.version = 11 : i64} {
  func.func @_ffm_fused_kernel(%arg0: i32, %arg1: memref<1x16x16x64xf32, #tpu.memory_space<vmem>>, %arg2: memref<1x4x4x128xf32, #tpu.memory_space<vmem>>, %arg3: memref<16x4xf32, #tpu.memory_space<vmem>>, %arg4: memref<16x4xf32, #tpu.memory_space<vmem>>, %arg5: memref<3x3x128xf32, #tpu.memory_space<vmem>>, %arg6: memref<1x128xf32, #tpu.memory_space<vmem>>, %arg7: memref<128x128xbf16, #tpu.memory_space<vmem>>, %arg8: memref<1x128xf32, #tpu.memory_space<vmem>>, %arg9: memref<64x128xbf16, #tpu.memory_space<vmem>>, %arg10: memref<1x128xf32, #tpu.memory_space<vmem>>, %arg11: memref<1x16x16x128xf32, #tpu.memory_space<vmem>>, %arg12: memref<18x18x128xf32, #tpu.memory_space<vmem>>) attributes {dimension_semantics = [#tpu.dimension_semantics<parallel>], iteration_bounds = array<i64: 2>, scalar_prefetch = 0 : i64, scratch_operands = 1 : i64, tpu.core_type = #tpu.core_type<tc>, window_params = [{transform_indices = @transform_0, window_bounds = array<i64: 1, 16, 16, 64>}, {transform_indices = @transform_1, window_bounds = array<i64: 1, 4, 4, 128>}, {pipeline_mode = #tpu.pipeline_mode<synchronous>, transform_indices = @transform_2, window_bounds = array<i64: 16, 4>}, {pipeline_mode = #tpu.pipeline_mode<synchronous>, transform_indices = @transform_3, window_bounds = array<i64: 16, 4>}, {pipeline_mode = #tpu.pipeline_mode<synchronous>, transform_indices = @transform_4, window_bounds = array<i64: 3, 3, 128>}, {pipeline_mode = #tpu.pipeline_mode<synchronous>, transform_indices = @transform_5, window_bounds = array<i64: 1, 128>}, {pipeline_mode = #tpu.pipeline_mode<synchronous>, transform_indices = @transform_6, window_bounds = array<i64: 128, 128>}, {pipeline_mode = #tpu.pipeline_mode<synchronous>, transform_indices = @transform_7, window_bounds = array<i64: 1, 128>}, {pipeline_mode = #tpu.pipeline_mode<synchronous>, transform_indices = @transform_8, window_bounds = array<i64: 64, 128>}, {pipeline_mode = #tpu.pipeline_mode<synchronous>, transform_indices = @transform_9, window_bounds = array<i64: 1, 128>}, {transform_indices = @transform_10, window_bounds = array<i64: 1, 16, 16, 128>}]} {
    %c0 = arith.constant 0 : index
    %c0_0 = arith.constant 0 : index
    %c0_1 = arith.constant 0 : index
    %c0_2 = arith.constant 0 : index
    %0 = vector.load %arg2[%c0, %c0_0, %c0_1, %c0_2] : memref<1x4x4x128xf32, #tpu.memory_space<vmem>>, vector<1x4x4x128xf32>
    %1 = vector.shape_cast %0 : vector<1x4x4x128xf32> to vector<4x4x128xf32>
    %c0_3 = arith.constant 0 : index
    %c0_4 = arith.constant 0 : index
    %2 = vector.load %arg3[%c0_3, %c0_4] : memref<16x4xf32, #tpu.memory_space<vmem>>, vector<16x4xf32>
    %c0_5 = arith.constant 0 : index
    %c0_6 = arith.constant 0 : index
    %3 = vector.load %arg4[%c0_5, %c0_6] : memref<16x4xf32, #tpu.memory_space<vmem>>, vector<16x4xf32>
    %cst = arith.constant 0.000000e+00 : f32
    %4 = vector.broadcast %cst : f32 to vector<16x4x128xf32>
    %5 = vector.extract_strided_slice %2 {offsets = [0, 0], sizes = [16, 1], strides = [1, 1]} : vector<16x4xf32> to vector<16x1xf32>
    %6 = vector.shape_cast %5 : vector<16x1xf32> to vector<16x1x1xf32>
    %7 = vector.extract_strided_slice %1 {offsets = [0, 0, 0], sizes = [1, 4, 128], strides = [1, 1, 1]} : vector<4x4x128xf32> to vector<1x4x128xf32>
    %8 = vector.broadcast %6 : vector<16x1x1xf32> to vector<16x4x128xf32>
    %9 = vector.broadcast %7 : vector<1x4x128xf32> to vector<16x4x128xf32>
    %10 = arith.mulf %8, %9 : vector<16x4x128xf32>
    %11 = arith.addf %4, %10 : vector<16x4x128xf32>
    %12 = vector.extract_strided_slice %2 {offsets = [0, 1], sizes = [16, 1], strides = [1, 1]} : vector<16x4xf32> to vector<16x1xf32>
    %13 = vector.shape_cast %12 : vector<16x1xf32> to vector<16x1x1xf32>
    %14 = vector.extract_strided_slice %1 {offsets = [1, 0, 0], sizes = [1, 4, 128], strides = [1, 1, 1]} : vector<4x4x128xf32> to vector<1x4x128xf32>
    %15 = vector.broadcast %13 : vector<16x1x1xf32> to vector<16x4x128xf32>
    %16 = vector.broadcast %14 : vector<1x4x128xf32> to vector<16x4x128xf32>
    %17 = arith.mulf %15, %16 : vector<16x4x128xf32>
    %18 = arith.addf %11, %17 : vector<16x4x128xf32>
    %19 = vector.extract_strided_slice %2 {offsets = [0, 2], sizes = [16, 1], strides = [1, 1]} : vector<16x4xf32> to vector<16x1xf32>
    %20 = vector.shape_cast %19 : vector<16x1xf32> to vector<16x1x1xf32>
    %21 = vector.extract_strided_slice %1 {offsets = [2, 0, 0], sizes = [1, 4, 128], strides = [1, 1, 1]} : vector<4x4x128xf32> to vector<1x4x128xf32>
    %22 = vector.broadcast %20 : vector<16x1x1xf32> to vector<16x4x128xf32>
    %23 = vector.broadcast %21 : vector<1x4x128xf32> to vector<16x4x128xf32>
    %24 = arith.mulf %22, %23 : vector<16x4x128xf32>
    %25 = arith.addf %18, %24 : vector<16x4x128xf32>
    %26 = vector.extract_strided_slice %2 {offsets = [0, 3], sizes = [16, 1], strides = [1, 1]} : vector<16x4xf32> to vector<16x1xf32>
    %27 = vector.shape_cast %26 : vector<16x1xf32> to vector<16x1x1xf32>
    %28 = vector.extract_strided_slice %1 {offsets = [3, 0, 0], sizes = [1, 4, 128], strides = [1, 1, 1]} : vector<4x4x128xf32> to vector<1x4x128xf32>
    %29 = vector.broadcast %27 : vector<16x1x1xf32> to vector<16x4x128xf32>
    %30 = vector.broadcast %28 : vector<1x4x128xf32> to vector<16x4x128xf32>
    %31 = arith.mulf %29, %30 : vector<16x4x128xf32>
    %32 = arith.addf %25, %31 : vector<16x4x128xf32>
    %cst_7 = arith.constant 0.000000e+00 : f32
    %33 = vector.broadcast %cst_7 : f32 to vector<16x16x128xf32>
    %34 = vector.extract_strided_slice %3 {offsets = [0, 0], sizes = [16, 1], strides = [1, 1]} : vector<16x4xf32> to vector<16x1xf32>
    %35 = vector.shape_cast %34 : vector<16x1xf32> to vector<1x16x1xf32>
    %36 = vector.extract_strided_slice %32 {offsets = [0, 0, 0], sizes = [16, 1, 128], strides = [1, 1, 1]} : vector<16x4x128xf32> to vector<16x1x128xf32>
    %37 = vector.broadcast %35 : vector<1x16x1xf32> to vector<16x16x128xf32>
    %38 = vector.broadcast %36 : vector<16x1x128xf32> to vector<16x16x128xf32>
    %39 = arith.mulf %37, %38 : vector<16x16x128xf32>
    %40 = arith.addf %33, %39 : vector<16x16x128xf32>
    %41 = vector.extract_strided_slice %3 {offsets = [0, 1], sizes = [16, 1], strides = [1, 1]} : vector<16x4xf32> to vector<16x1xf32>
    %42 = vector.shape_cast %41 : vector<16x1xf32> to vector<1x16x1xf32>
    %43 = vector.extract_strided_slice %32 {offsets = [0, 1, 0], sizes = [16, 1, 128], strides = [1, 1, 1]} : vector<16x4x128xf32> to vector<16x1x128xf32>
    %44 = vector.broadcast %42 : vector<1x16x1xf32> to vector<16x16x128xf32>
    %45 = vector.broadcast %43 : vector<16x1x128xf32> to vector<16x16x128xf32>
    %46 = arith.mulf %44, %45 : vector<16x16x128xf32>
    %47 = arith.addf %40, %46 : vector<16x16x128xf32>
    %48 = vector.extract_strided_slice %3 {offsets = [0, 2], sizes = [16, 1], strides = [1, 1]} : vector<16x4xf32> to vector<16x1xf32>
    %49 = vector.shape_cast %48 : vector<16x1xf32> to vector<1x16x1xf32>
    %50 = vector.extract_strided_slice %32 {offsets = [0, 2, 0], sizes = [16, 1, 128], strides = [1, 1, 1]} : vector<16x4x128xf32> to vector<16x1x128xf32>
    %51 = vector.broadcast %49 : vector<1x16x1xf32> to vector<16x16x128xf32>
    %52 = vector.broadcast %50 : vector<16x1x128xf32> to vector<16x16x128xf32>
    %53 = arith.mulf %51, %52 : vector<16x16x128xf32>
    %54 = arith.addf %47, %53 : vector<16x16x128xf32>
    %55 = vector.extract_strided_slice %3 {offsets = [0, 3], sizes = [16, 1], strides = [1, 1]} : vector<16x4xf32> to vector<16x1xf32>
    %56 = vector.shape_cast %55 : vector<16x1xf32> to vector<1x16x1xf32>
    %57 = vector.extract_strided_slice %32 {offsets = [0, 3, 0], sizes = [16, 1, 128], strides = [1, 1, 1]} : vector<16x4x128xf32> to vector<16x1x128xf32>
    %58 = vector.broadcast %56 : vector<1x16x1xf32> to vector<16x16x128xf32>
    %59 = vector.broadcast %57 : vector<16x1x128xf32> to vector<16x16x128xf32>
    %60 = arith.mulf %58, %59 : vector<16x16x128xf32>
    %61 = arith.addf %54, %60 : vector<16x16x128xf32>
    %cst_8 = arith.constant 0.000000e+00 : f32
    %62 = vector.broadcast %cst_8 : f32 to vector<18x18x128xf32>
    %c0_9 = arith.constant 0 : index
    %c0_10 = arith.constant 0 : index
    %c0_11 = arith.constant 0 : index
    %63 = vector.load %arg12[%c0_9, %c0_10, %c0_11] : memref<18x18x128xf32, #tpu.memory_space<vmem>>, vector<18x18x128xf32>
    tpu.vector_store %arg12[%c0_9, %c0_10, %c0_11], %62 {strides = array<i32>} : memref<18x18x128xf32, #tpu.memory_space<vmem>>, vector<18x18x128xf32>,
    %c1 = arith.constant 1 : index
    %c1_12 = arith.constant 1 : index
    %c0_13 = arith.constant 0 : index
    %64 = vector.load %arg12[%c1, %c1_12, %c0_13] : memref<18x18x128xf32, #tpu.memory_space<vmem>>, vector<16x16x128xf32>
    tpu.vector_store %arg12[%c1, %c1_12, %c0_13], %61 {strides = array<i32>} : memref<18x18x128xf32, #tpu.memory_space<vmem>>, vector<16x16x128xf32>,
    %c0_14 = arith.constant 0 : index
    %c0_15 = arith.constant 0 : index
    %c0_16 = arith.constant 0 : index
    %65 = vector.load %arg5[%c0_14, %c0_15, %c0_16] : memref<3x3x128xf32, #tpu.memory_space<vmem>>, vector<3x3x128xf32>
    %cst_17 = arith.constant 0.000000e+00 : f32
    %66 = vector.broadcast %cst_17 : f32 to vector<16x16x128xf32>
    %c0_18 = arith.constant 0 : index
    %c0_19 = arith.constant 0 : index
    %c0_20 = arith.constant 0 : index
    %67 = vector.load %arg12[%c0_18, %c0_19, %c0_20] : memref<18x18x128xf32, #tpu.memory_space<vmem>>, vector<16x16x128xf32>
    %68 = vector.extract_strided_slice %65 {offsets = [0, 0, 0], sizes = [1, 1, 128], strides = [1, 1, 1]} : vector<3x3x128xf32> to vector<1x1x128xf32>
    %69 = vector.broadcast %68 : vector<1x1x128xf32> to vector<16x16x128xf32>
    %70 = arith.mulf %67, %69 : vector<16x16x128xf32>
    %71 = arith.addf %66, %70 : vector<16x16x128xf32>
    %c0_21 = arith.constant 0 : index
    %c1_22 = arith.constant 1 : index
    %c0_23 = arith.constant 0 : index
    %72 = vector.load %arg12[%c0_21, %c1_22, %c0_23] : memref<18x18x128xf32, #tpu.memory_space<vmem>>, vector<16x16x128xf32>
    %73 = vector.extract_strided_slice %65 {offsets = [0, 1, 0], sizes = [1, 1, 128], strides = [1, 1, 1]} : vector<3x3x128xf32> to vector<1x1x128xf32>
    %74 = vector.broadcast %73 : vector<1x1x128xf32> to vector<16x16x128xf32>
    %75 = arith.mulf %72, %74 : vector<16x16x128xf32>
    %76 = arith.addf %71, %75 : vector<16x16x128xf32>
    %c0_24 = arith.constant 0 : index
    %c2 = arith.constant 2 : index
    %c0_25 = arith.constant 0 : index
    %77 = vector.load %arg12[%c0_24, %c2, %c0_25] : memref<18x18x128xf32, #tpu.memory_space<vmem>>, vector<16x16x128xf32>
    %78 = vector.extract_strided_slice %65 {offsets = [0, 2, 0], sizes = [1, 1, 128], strides = [1, 1, 1]} : vector<3x3x128xf32> to vector<1x1x128xf32>
    %79 = vector.broadcast %78 : vector<1x1x128xf32> to vector<16x16x128xf32>
    %80 = arith.mulf %77, %79 : vector<16x16x128xf32>
    %81 = arith.addf %76, %80 : vector<16x16x128xf32>
    %c1_26 = arith.constant 1 : index
    %c0_27 = arith.constant 0 : index
    %c0_28 = arith.constant 0 : index
    %82 = vector.load %arg12[%c1_26, %c0_27, %c0_28] : memref<18x18x128xf32, #tpu.memory_space<vmem>>, vector<16x16x128xf32>
    %83 = vector.extract_strided_slice %65 {offsets = [1, 0, 0], sizes = [1, 1, 128], strides = [1, 1, 1]} : vector<3x3x128xf32> to vector<1x1x128xf32>
    %84 = vector.broadcast %83 : vector<1x1x128xf32> to vector<16x16x128xf32>
    %85 = arith.mulf %82, %84 : vector<16x16x128xf32>
    %86 = arith.addf %81, %85 : vector<16x16x128xf32>
    %c1_29 = arith.constant 1 : index
    %c1_30 = arith.constant 1 : index
    %c0_31 = arith.constant 0 : index
    %87 = vector.load %arg12[%c1_29, %c1_30, %c0_31] : memref<18x18x128xf32, #tpu.memory_space<vmem>>, vector<16x16x128xf32>
    %88 = vector.extract_strided_slice %65 {offsets = [1, 1, 0], sizes = [1, 1, 128], strides = [1, 1, 1]} : vector<3x3x128xf32> to vector<1x1x128xf32>
    %89 = vector.broadcast %88 : vector<1x1x128xf32> to vector<16x16x128xf32>
    %90 = arith.mulf %87, %89 : vector<16x16x128xf32>
    %91 = arith.addf %86, %90 : vector<16x16x128xf32>
    %c1_32 = arith.constant 1 : index
    %c2_33 = arith.constant 2 : index
    %c0_34 = arith.constant 0 : index
    %92 = vector.load %arg12[%c1_32, %c2_33, %c0_34] : memref<18x18x128xf32, #tpu.memory_space<vmem>>, vector<16x16x128xf32>
    %93 = vector.extract_strided_slice %65 {offsets = [1, 2, 0], sizes = [1, 1, 128], strides = [1, 1, 1]} : vector<3x3x128xf32> to vector<1x1x128xf32>
    %94 = vector.broadcast %93 : vector<1x1x128xf32> to vector<16x16x128xf32>
    %95 = arith.mulf %92, %94 : vector<16x16x128xf32>
    %96 = arith.addf %91, %95 : vector<16x16x128xf32>
    %c2_35 = arith.constant 2 : index
    %c0_36 = arith.constant 0 : index
    %c0_37 = arith.constant 0 : index
    %97 = vector.load %arg12[%c2_35, %c0_36, %c0_37] : memref<18x18x128xf32, #tpu.memory_space<vmem>>, vector<16x16x128xf32>
    %98 = vector.extract_strided_slice %65 {offsets = [2, 0, 0], sizes = [1, 1, 128], strides = [1, 1, 1]} : vector<3x3x128xf32> to vector<1x1x128xf32>
    %99 = vector.broadcast %98 : vector<1x1x128xf32> to vector<16x16x128xf32>
    %100 = arith.mulf %97, %99 : vector<16x16x128xf32>
    %101 = arith.addf %96, %100 : vector<16x16x128xf32>
    %c2_38 = arith.constant 2 : index
    %c1_39 = arith.constant 1 : index
    %c0_40 = arith.constant 0 : index
    %102 = vector.load %arg12[%c2_38, %c1_39, %c0_40] : memref<18x18x128xf32, #tpu.memory_space<vmem>>, vector<16x16x128xf32>
    %103 = vector.extract_strided_slice %65 {offsets = [2, 1, 0], sizes = [1, 1, 128], strides = [1, 1, 1]} : vector<3x3x128xf32> to vector<1x1x128xf32>
    %104 = vector.broadcast %103 : vector<1x1x128xf32> to vector<16x16x128xf32>
    %105 = arith.mulf %102, %104 : vector<16x16x128xf32>
    %106 = arith.addf %101, %105 : vector<16x16x128xf32>
    %c2_41 = arith.constant 2 : index
    %c2_42 = arith.constant 2 : index
    %c0_43 = arith.constant 0 : index
    %107 = vector.load %arg12[%c2_41, %c2_42, %c0_43] : memref<18x18x128xf32, #tpu.memory_space<vmem>>, vector<16x16x128xf32>
    %108 = vector.extract_strided_slice %65 {offsets = [2, 2, 0], sizes = [1, 1, 128], strides = [1, 1, 1]} : vector<3x3x128xf32> to vector<1x1x128xf32>
    %109 = vector.broadcast %108 : vector<1x1x128xf32> to vector<16x16x128xf32>
    %110 = arith.mulf %107, %109 : vector<16x16x128xf32>
    %111 = arith.addf %106, %110 : vector<16x16x128xf32>
    %c0_44 = arith.constant 0 : index
    %c0_45 = arith.constant 0 : index
    %112 = vector.load %arg6[%c0_44, %c0_45] : memref<1x128xf32, #tpu.memory_space<vmem>>, vector<1x128xf32>
    %113 = vector.shape_cast %112 : vector<1x128xf32> to vector<1x1x128xf32>
    %114 = vector.broadcast %113 : vector<1x1x128xf32> to vector<16x16x128xf32>
    %115 = arith.addf %111, %114 : vector<16x16x128xf32>
    %cst_46 = arith.constant 0.000000e+00 : f32
    %116 = vector.broadcast %cst_46 : f32 to vector<16x16x128xf32>
    %117 = arith.maximumf %115, %116 : vector<16x16x128xf32>
    %118 = vector.shape_cast %117 : vector<16x16x128xf32> to vector<256x128xf32>
    %119 = arith.truncf %118 : vector<256x128xf32> to vector<256x128xbf16>
    %c0_47 = arith.constant 0 : index
    %c0_48 = arith.constant 0 : index
    %120 = vector.load %arg7[%c0_47, %c0_48] : memref<128x128xbf16, #tpu.memory_space<vmem>>, vector<128x128xbf16>
    %cst_49 = arith.constant dense<0.000000e+00> : vector<256x128xf32>
    %121 = tpu.matmul %119, %120, %cst_49 {dimension_numbers = #tpu.dot_dimension_numbers<[1], [0], [0], [1], [0, 0, 1, 1], [], []>} : vector<256x128xbf16>, vector<128x128xbf16>, vector<256x128xf32> -> vector<256x128xf32>
    %c0_50 = arith.constant 0 : index
    %c0_51 = arith.constant 0 : index
    %122 = vector.load %arg8[%c0_50, %c0_51] : memref<1x128xf32, #tpu.memory_space<vmem>>, vector<1x128xf32>
    %123 = vector.broadcast %122 : vector<1x128xf32> to vector<256x128xf32>
    %124 = arith.addf %121, %123 : vector<256x128xf32>
    %c0_52 = arith.constant 0 : index
    %c0_53 = arith.constant 0 : index
    %c0_54 = arith.constant 0 : index
    %c0_55 = arith.constant 0 : index
    %125 = vector.load %arg1[%c0_52, %c0_53, %c0_54, %c0_55] : memref<1x16x16x64xf32, #tpu.memory_space<vmem>>, vector<1x16x16x64xf32>
    %126 = vector.shape_cast %125 : vector<1x16x16x64xf32> to vector<16x16x64xf32>
    %127 = vector.shape_cast %126 : vector<16x16x64xf32> to vector<256x64xf32>
    %128 = arith.truncf %127 : vector<256x64xf32> to vector<256x64xbf16>
    %c0_56 = arith.constant 0 : index
    %c0_57 = arith.constant 0 : index
    %129 = vector.load %arg9[%c0_56, %c0_57] : memref<64x128xbf16, #tpu.memory_space<vmem>>, vector<64x128xbf16>
    %cst_58 = arith.constant dense<0.000000e+00> : vector<256x128xf32>
    %130 = tpu.matmul %128, %129, %cst_58 {dimension_numbers = #tpu.dot_dimension_numbers<[1], [0], [0], [1], [0, 0, 1, 1], [], []>} : vector<256x64xbf16>, vector<64x128xbf16>, vector<256x128xf32> -> vector<256x128xf32>
    %c0_59 = arith.constant 0 : index
    %c0_60 = arith.constant 0 : index
    %131 = vector.load %arg10[%c0_59, %c0_60] : memref<1x128xf32, #tpu.memory_space<vmem>>, vector<1x128xf32>
    %132 = vector.broadcast %131 : vector<1x128xf32> to vector<256x128xf32>
    %133 = arith.addf %130, %132 : vector<256x128xf32>
    %134 = arith.addf %124, %133 : vector<256x128xf32>
    %cst_61 = arith.constant 0.000000e+00 : f32
    %135 = vector.broadcast %cst_61 : f32 to vector<256x128xf32>
    %136 = arith.maximumf %134, %135 : vector<256x128xf32>
    %137 = vector.shape_cast %136 : vector<256x128xf32> to vector<1x16x16x128xf32>
    %c0_62 = arith.constant 0 : index
    %c0_63 = arith.constant 0 : index
    %c0_64 = arith.constant 0 : index
    %c0_65 = arith.constant 0 : index
    %138 = vector.load %arg11[%c0_62, %c0_63, %c0_64, %c0_65] : memref<1x16x16x128xf32, #tpu.memory_space<vmem>>, vector<1x16x16x128xf32>
    tpu.vector_store %arg11[%c0_62, %c0_63, %c0_64, %c0_65], %137 {strides = array<i32>} : memref<1x16x16x128xf32, #tpu.memory_space<vmem>>, vector<1x16x16x128xf32>,
    return
  }
  func.func @transform_0(%arg0: i32) -> (i32, i32, i32, i32) {
    %c0_i32 = arith.constant 0 : i32
    %c0_i32_0 = arith.constant 0 : i32
    %c0_i32_1 = arith.constant 0 : i32
    %c0_i32_2 = arith.constant 0 : i32
    return %arg0, %c0_i32, %c0_i32_0, %c0_i32_1 : i32, i32, i32, i32
  }
  func.func @transform_1(%arg0: i32) -> (i32, i32, i32, i32) {
    %c0_i32 = arith.constant 0 : i32
    %c0_i32_0 = arith.constant 0 : i32
    %c0_i32_1 = arith.constant 0 : i32
    %c0_i32_2 = arith.constant 0 : i32
    return %arg0, %c0_i32, %c0_i32_0, %c0_i32_1 : i32, i32, i32, i32
  }
  func.func @transform_2(%arg0: i32) -> (i32, i32) {
    %c0_i32 = arith.constant 0 : i32
    %c0_i32_0 = arith.constant 0 : i32
    %c0_i32_1 = arith.constant 0 : i32
    return %c0_i32, %c0_i32_0 : i32, i32
  }
  func.func @transform_3(%arg0: i32) -> (i32, i32) {
    %c0_i32 = arith.constant 0 : i32
    %c0_i32_0 = arith.constant 0 : i32
    %c0_i32_1 = arith.constant 0 : i32
    return %c0_i32, %c0_i32_0 : i32, i32
  }
  func.func @transform_4(%arg0: i32) -> (i32, i32, i32) {
    %c0_i32 = arith.constant 0 : i32
    %c0_i32_0 = arith.constant 0 : i32
    %c0_i32_1 = arith.constant 0 : i32
    %c0_i32_2 = arith.constant 0 : i32
    return %c0_i32, %c0_i32_0, %c0_i32_1 : i32, i32, i32
  }
  func.func @transform_5(%arg0: i32) -> (i32, i32) {
    %c0_i32 = arith.constant 0 : i32
    %c0_i32_0 = arith.constant 0 : i32
    %c0_i32_1 = arith.constant 0 : i32
    return %c0_i32, %c0_i32_0 : i32, i32
  }
  func.func @transform_6(%arg0: i32) -> (i32, i32) {
    %c0_i32 = arith.constant 0 : i32
    %c0_i32_0 = arith.constant 0 : i32
    %c0_i32_1 = arith.constant 0 : i32
    return %c0_i32, %c0_i32_0 : i32, i32
  }
  func.func @transform_7(%arg0: i32) -> (i32, i32) {
    %c0_i32 = arith.constant 0 : i32
    %c0_i32_0 = arith.constant 0 : i32
    %c0_i32_1 = arith.constant 0 : i32
    return %c0_i32, %c0_i32_0 : i32, i32
  }
  func.func @transform_8(%arg0: i32) -> (i32, i32) {
    %c0_i32 = arith.constant 0 : i32
    %c0_i32_0 = arith.constant 0 : i32
    %c0_i32_1 = arith.constant 0 : i32
    return %c0_i32, %c0_i32_0 : i32, i32
  }
  func.func @transform_9(%arg0: i32) -> (i32, i32) {
    %c0_i32 = arith.constant 0 : i32
    %c0_i32_0 = arith.constant 0 : i32
    %c0_i32_1 = arith.constant 0 : i32
    return %c0_i32, %c0_i32_0 : i32, i32
  }
  func.func @transform_10(%arg0: i32) -> (i32, i32, i32, i32) {
    %c0_i32 = arith.constant 0 : i32
    %c0_i32_0 = arith.constant 0 : i32
    %c0_i32_1 = arith.constant 0 : i32
    %c0_i32_2 = arith.constant 0 : i32
    return %arg0, %c0_i32, %c0_i32_0, %c0_i32_1 : i32, i32, i32, i32
  }
}

</mosaic_0001>

<bundles_post_ra>
// kernel: tpu_custom_call.1
= control target key start
LH: loop header
LB: loop body
LE: loop exit
PB: predicated region body
PF: predicated region fallthrough
CT: control target
= control target key end

     0   :  { %15 = vsyncpa [#allocation4], 0  ;;  %s5930_s0 = inlined_call_operand.hbm [shape: f32[2,16,16,64], index: 0, kind: input, shape index: {}]   ;;  %s5931_s1 = inlined_call_operand.vmem [shape: f32[2,4,4,128], index: 1, kind: input, shape index: {}]   ;;  %s5932_s2 = inlined_call_operand.vmem [shape: f32[16,4], index: 2, kind: input, shape index: {}]   ;;  %s5933_s3 = inlined_call_operand.vmem [shape: f32[16,4], index: 3, kind: input, shape index: {}]   ;;  %s5934_s4 = inlined_call_operand.hbm [shape: f32[3,3,128], index: 4, kind: input, shape index: {}]   ;;  %s5935_s5 = inlined_call_operand.vmem [shape: f32[1,128], index: 5, kind: input, shape index: {}]   ;;  %s5936_s6 = inlined_call_operand.hbm [shape: bf16[128,128], index: 6, kind: input, shape index: {}]   ;;  %s5937_s7 = inlined_call_operand.vmem [shape: f32[1,128], index: 7, kind: input, shape index: {}]   ;;  %s5938_s8 = inlined_call_operand.vmem [shape: bf16[64,128], index: 8, kind: input, shape index: {}]   ;;  %s5939_s9 = inlined_call_operand.vmem [shape: f32[1,128], index: 9, kind: input, shape index: {}]   ;;  %s5940_s10 = inlined_call_operand.hbm [shape: f32[2,16,16,128], index: 10, kind: output, shape index: {}]  }
   0x1   :  { %17 = vsyncpa [#allocation4 + $0x1], 0 }
   0x2   :  { %18 = vsyncpa [#allocation7], 0 }
   0x3   :  { %19 = vsyncpa [#allocation5], 0 }
   0x4   :  { %21 = vsyncpa [#allocation5 + $0x1], 0  ;;  %s4014_s13 = smov 0   ;;  %s4016_s14 = smov 0  }
   0x5   :  { %s4018_s15 = smov 0   ;;  %s4020_s16 = smov 0  }
   0x6 LB: > { %6027 = sst [smem:[#allocation13_spill]] %s3929_s13  ;;  %s4035_s17 = sadd.s32 4294967295, %s3941_s16   ;;  %s3941_s16 = sphi %s4020_s16, %s6169_s16   ;;  %s3937_s15 = sphi %s4018_s15, %s6168_s15   ;;  %s3933_s14 = sphi %s4016_s14, %s6167_s14   ;;  %s3929_s13 = sphi %s4014_s13, %s6166_s13  }
   0x7   : > { %s3351_s18 = sadd.s32 4294967294, %s3941_s16   ;;  %p47_p0 = scmp.ne.s32.totalorder %s3933_s14, %s3929_s13 }
   0x8   : > { %p5941_p1 = scmp.eq.s32.totalorder %s4035_s17, 0  ;;  %p271_p3 = scmp.eq.s32.totalorder %s3351_s18, 1 }
   0x9   : > { %p3352_p5 = scmp.ge.s32.totalorder %s3941_s16, 1  ;;  %p278_p7 = scmp.lt.s32.totalorder %s3941_s16, 3 }
   0xa   : > { %p4044_p4 = por %p5941_p1, %p47_p0  ;;  %p4049_p6 = por %p271_p3, %p47_p0 }
   0xb   : > { %p4054_p8 = pnand %p3352_p5, %p278_p7  ;;  %s3943_s22 = smov [#allocation6]  }
   0xc   : > { %s6028_s19 = scalar_select %p4044_p4, 1, 0 }
   0xd   : > { %s6029_s20 = scalar_select %p4049_p6, 1, 0 }
   0xe   : > { %s296_s23 = sshll.u32 %s3943_s22, 4  ;;  %p3645_p9 = pneg %p4054_p8  ;;  %s4058_s23 = int_to_ptr.vmem [resolvable:$true] %s296_s23 }
   0xf   : > { %6030 = sst [smem:[#allocation14_spill]] %s6029_s20  ;;  %s3944_s25 = smov [#allocation8]  }
  0x10   : > { %p4065_p11 = pnand %p3645_p9, %p5941_p1  ;;  %s312_s26 = sshll.u32 %s3944_s25, 4  ;;  %s4069_s26 = int_to_ptr.vmem [resolvable:$true] %s312_s26 }
  0x11   : > { %s3785_s29 = scalar_lea.hbm %s5934_s4, 192 }
  0x12   : > { %p3786_p12 = scmp.ne.s32.totalorder %s5934_s4, %s3785_s29  ;;  %p3787_p13 = pneg %p4065_p11 }
  0x13   : > { %p3792_p5 = scmp.lt.u32.totalorder %s3785_s29, %s5934_s4 }
  0x14   : > { %p3788_p0 = pnand %p3787_p13, %p3786_p12 }
  0x16   : > { %p3789_p3 = pneg %p3788_p0 }
  0x18   : > { %p3794_p7 = pnand %p3792_p5, %p3789_p3 }
  0x1a   : > { %3797 = shalt.err (!%p3794_p7)
}
  0x1b   : > { %s3798_s22 = scalar_lea.vmem %s4058_s23, 192  ;;  %p3806_p2 = scmp.lt.s32.totalorder %s4058_s23, %s4058_s23 }
  0x1c   : > { %p3799_p9 = scmp.ne.s32.totalorder %s4058_s23, %s3798_s22  ;;  %p3807_p12 = scmp.lt.s32.totalorder %s3798_s22, %s3798_s22 }
  0x1e   : > { %p3801_p10 = pnand %p3799_p9, %p3787_p13  ;;  %p3808_p0 = por %p3807_p12, %p3806_p2 }
  0x20   : > { %p3802_p1 = pneg %p3801_p10 }
  0x22   : > { %p3809_p6 = pnand %p3808_p0, %p3802_p1 }
  0x24   : > { %3812 = shalt.err (!%p3809_p6)
}
  0x25   : > { %s3945_s25 = smov 64   ;;  %s3946_s27 = smov 4  }
  0x26   : > { %3648 = dma.hbm_to_vmem [thread:$0]  (!%p4065_p11), %s5934_s4, 192, %s4058_s23, [#allocation7], %s3945_s25, %s3945_s25, %s3946_s27  }
  0x27   : > { %s3813_s12 = scalar_lea.hbm %s5936_s6, 1024 }
  0x28   : > { %p3814_p2 = scmp.ne.s32.totalorder %s5936_s6, %s3813_s12  ;;  %p3820_p10 = scmp.lt.u32.totalorder %s3813_s12, %s5936_s6 }
  0x2a   : > { %p3816_p1 = pnand %p3814_p2, %p3787_p13 }
  0x2c   : > { %p3817_p6 = pneg %p3816_p1 }
  0x2e   : > { %p3822_p3 = pnand %p3820_p10, %p3817_p6 }
  0x30   : > { %3825 = shalt.err (!%p3822_p3)
}
  0x31   : > { %s3826_s23 = scalar_lea.vmem %s4069_s26, 1024  ;;  %p3834_p12 = scmp.lt.s32.totalorder %s4069_s26, %s4069_s26 }
  0x32   : > { %p3827_p5 = scmp.ne.s32.totalorder %s4069_s26, %s3826_s23  ;;  %p3835_p0 = scmp.lt.s32.totalorder %s3826_s23, %s3826_s23 }
  0x34   : > { %p3829_p7 = pnand %p3827_p5, %p3787_p13  ;;  %p3836_p2 = por %p3835_p0, %p3834_p12 }
  0x36   : > { %p3830_p9 = pneg %p3829_p7 }
  0x38   : > { %p3837_p1 = pnand %p3836_p2, %p3830_p9 }
  0x3a   : > { %3840 = shalt.err (!%p3837_p1)
}
  0x3b   : > { %3651 = dma.hbm_to_vmem [thread:$0]  (!%p4065_p11), %s5936_s6, 1024, %s4069_s26, [#allocation7], %s3945_s25, %s3945_s25, %s3946_s27  }
  0x3c   : > { %s4124_s28 = sadd.s32 1, %s3941_s16   ;;  %s34_s24 = sadd.s32 1, %s3937_s15 }
  0x3d   : > { %s31_s29 = ssub.s32 %s3941_s16, %s4124_s28  ;;  %p41_p13 = scmp.ne.s32.totalorder %s3937_s15, %s3933_s14 }
  0x3e   : > { %p32_p6 = scmp.eq.s32.totalorder %s31_s29, 0  ;;  %p42_p10 = scmp.eq.s32.totalorder %s3941_s16, 0 }
  0x3f   : > { %p6033_p3 = scmp.eq.s32.totalorder %s4035_s17, 1  ;;  %p3662_p7 = scmp.lt.s32.totalorder %s3941_s16, 2 }
  0x40   : > { %s4140_s11 = scalar_select %p32_p6, %s3937_s15, %s34_s24  }
  0x41   : > { %p4134_p5 = por %p6033_p3, %p41_p13  ;;  %p43_p9 = por %p42_p10, %p41_p13 }
  0x42   : > { %s335_s12 = sand.u32 1, %s3937_s15   ;;  %s3402_s26 = sshll.u32 %s3941_s16, 12 }
  0x43   : > { %s6034_s30 = scalar_select %p4134_p5, 1, 0 }
  0x44   : > { %s3356_s18 = sshll.u32 %s335_s12, 8  ;;  %s4147_s22 = scalar_lea.hbm %s5930_s0, %s3402_s26 }
  0x45   : > { %s339_s23 = scalar_lea.vmem [#allocation3], %s3356_s18  ;;  %p4151_p11 = pnand %p3662_p7, %p43_p9 }
  0x46   : > { %s346_s13 = sshll.u32 %s339_s23, 4  ;;  %s4155_s24 = scalar_lea.sflag [#allocation4], %s335_s12  ;;  %s4149_s13 = int_to_ptr.vmem [resolvable:$true] %s346_s13 }
  0x47   : > { %s3841_s29 = scalar_lea.hbm %s4147_s22, 4096  ;;  %p3843_p0 = pneg %p4151_p11 }
  0x48   : > { %p3842_p12 = scmp.ne.s32.totalorder %s4147_s22, %s3841_s29  ;;  %s3846_s25 = scalar_lea.hbm %s5930_s0, 8192 }
  0x49   : > { %p3847_p13 = scmp.lt.u32.totalorder %s4147_s22, %s5930_s0  ;;  %p3848_p6 = scmp.lt.u32.totalorder %s3846_s25, %s3841_s29 }
  0x4a   : > { %p3844_p2 = pnand %p3843_p0, %p3842_p12  ;;  %p3850_p3 = scmp.lt.u32.totalorder %s3841_s29, %s4147_s22 }
  0x4b   : > { %p3849_p10 = por %p3848_p6, %p3847_p13 }
  0x4c   : > { %p3845_p1 = pneg %p3844_p2 }
  0x4d   : > { %p3851_p7 = por %p3850_p3, %p3849_p10 }
  0x4f   : > { %p3852_p9 = pnand %p3851_p7, %p3845_p1 }
  0x51   : > { %3855 = shalt.err (!%p3852_p9)
}
  0x52   : > { %s3856_s12 = scalar_lea.vmem %s4149_s13, 4096  ;;  %s3947_s18 = smov [#allocation3]  }
  0x53   : > { %p3857_p12 = scmp.ne.s32.totalorder %s4149_s13, %s3856_s12  ;;  %s3861_s26 = sshll.u32 %s3947_s18, 4  ;;  %s3862_s26 = int_to_ptr.vmem [resolvable:$false] %s3861_s26 }
  0x54   : > { %s3863_s27 = scalar_lea.vmem %s3862_s26, 8192  ;;  %p3864_p4 = scmp.lt.s32.totalorder %s4149_s13, %s3862_s26 }
  0x55   : > { %p3859_p2 = pnand %p3857_p12, %p3843_p0  ;;  %p3865_p13 = scmp.lt.s32.totalorder %s3863_s27, %s3856_s12 }
  0x57   : > { %p3860_p5 = pneg %p3859_p2  ;;  %p3866_p6 = por %p3865_p13, %p3864_p4 }
  0x59   : > { %p3867_p10 = pnand %p3866_p6, %p3860_p5 }
  0x5b   : > { %3870 = shalt.err (!%p3867_p10)
}
  0x5c   : > { %s3948_s29 = smov 128   ;;  %s3949_s25 = smov 8  }
  0x5d   : > { %3655 = dma.hbm_to_vmem [thread:$0]  (!%p4151_p11), %s4147_s22, 4096, %s4149_s13, %s4155_s24, %s3948_s29, %s3948_s29, %s3949_s25  }
  0x5e   : > { %366 = sbr.rel (%p4054_p8) target bundleno = 810 (0x32a), region = 60 }
  0x65   : > { %s4186_s23 = sand.u32 1, %s3933_s14   ;;  %p6036_p4 = scmp.ne.s32.totalorder %s6028_s19, 0 }
  0x66   : > { %s3360_s12 = sshll.u32 %s4186_s23, 8  ;;  %s369_s18 = scalar_lea.sflag [#allocation4], %s4186_s23 }
  0x67   : > { %s4192_s26 = scalar_lea.vmem [#allocation3], %s3360_s12 }
  0x68   : > { %3916 = dma.done.wait (%p6036_p4), %s369_s18, 4096  }
  0x69   : > { %3918 = vsyncadd (%p6036_p4), %s369_s18, 4294963200  ;;  %p6037_p5 = scmp.eq.s32.totalorder %s4035_s17, 0 }
  0x6b   : > { %3920 = dma.done.wait (%p6037_p5), [#allocation7], 1216   ;;  %p6038_p8 = pmov %p6037_p5 }
  0x6c   : > { %v442_v0 = vlaneseq  ;;  %v5946_v1 = vmov 2   ;;  %v3951_v2 = vmov 1966171168   ;;  %v432_v7 = vld [vmem:[%s5932_s2] sm:$0xff]  ;;  %v5948_v20 = vmov 0   ;;  %v433_v30 = vld [vmem:[%s5932_s2 + $0x8] sm:$0xff] }
  0x6d   : > { %3922 = vsyncadd (%p6038_p8), [#allocation7], 4294966080  ;;  %3712 = vset.pattern.permute.xlu1 %v5946_v1  ;;  %v440_v3 = vunpack.c.l.s4 %v3951_v2  ;;  %3726 = vset.pattern.permute.xlu0 %v5946_v1  ;;  %v438_v10 = vcombine.high %v432_v7, %v432_v7  ;;  %v5952_v22 = vmov 1   ;;  %v5950_v25 = vmov 3   ;;  %v4261_v32 = vld [vmem:[%s5933_s3 + $0x8] sm:$0xff]  ;;  %v434_v36 = vld [vmem:[%s5933_s3] sm:$0xff] }
  0x6e   : > { %v4204_v4 = vshrl.u32 %v442_v0, 7  ;;  %v487_v35 = vcombine.high %v433_v30, %v433_v30  ;;  %v3955_v48 = vmov 0.0   ;;  %v3767_v50 = vld [vmem:[#allocation8] sm:$0xff]   ;;  %v3768_v51 = vld [vmem:[#allocation8 + $0x8] sm:$0xff]   ;;  %v3769_v53 = vld [vmem:[#allocation8 + $0x10] sm:$0xff]   ;;  %vm2927_vm0 = vcmask 523264  }
  0x6f   : > { %v441_v5 = vunpack.c.0.s8 %v440_v3  ;;  %1545 = vst [vmem:[#allocation2 + $0x78] sm:$0xff] %v3955_v48  ;;  %1546 = vst [vmem:[#allocation2 + $0x80] sm:$0xff] %v3955_v48  ;;  %3449 = vmatprep.subr.bf16.mxu1 %v3767_v50  ;;  %v3770_v54 = vld [vmem:[#allocation8 + $0x18] sm:$0xff]   ;;  %v3771_v55 = vld [vmem:[#allocation8 + $0x20] sm:$0xff]   ;;  %p422_p11 = scmp.lt.s32.totalorder %s4035_s17, 1  ;;  %s5781_s25 = scalar_lea.vmem [#allocation9], %s3360_s12 }
  0x70   : > { %v4214_v9 = vsub.s32 0, %v4204_v4  ;;  %1547 = vst [vmem:[#allocation2 + $0x88] sm:$0x3] %v3955_v48  ;;  %1530 = vst [vmem:[#allocation2] sm:$0xff] %v3955_v48  ;;  %3450 = vmatpush3.bf16.msra.mxu1 %v3767_v50  ;;  %v3772_v57 = vld [vmem:[%s5938_s8] sm:$0xff]   ;;  %v3774_v59 = vld [vmem:[%s5938_s8 + $0x8] sm:$0xff]  }
  0x71   : > { %v4207_v6 = vsub.s32 %v441_v5, %v4204_v4  ;;  %1531 = vst [vmem:[#allocation2 + $0x8] sm:$0xff] %v3955_v48  ;;  %1532 = vst [vmem:[#allocation2 + $0x10] sm:$0x3] %v3955_v48  ;;  %3451 = vmatprep.subr.bf16.mxu1 %v3768_v51  ;;  %v3773_v58 = vld [vmem:[#allocation8 + $0x28] sm:$0xff]   ;;  %3497 = vmatprep.subr.bf16.mxu0 %v3772_v57  ;;  %v3775_v60 = vld [vmem:[#allocation8 + $0x30] sm:$0xff]   ;;  %s423_s27 = scalar_select %p422_p11, %s4035_s17, 1 }
  0x72   : > { %6039 = vst [vmem:[#allocation15_spill] sm:$0xff] %v4214_v9  ;;  %1533 = vst [vmem:[#allocation2 + $0x18] sm:$0xff] %v3955_v48  ;;  %3498 = vmatpush3.bf16.msra.mxu0 %v3772_v57  ;;  %v3776_v62 = vld [vmem:[%s5938_s8 + $0x10] sm:$0xff]   ;;  %v3778_v0 = vld [vmem:[%s5938_s8 + $0x18] sm:$0xff]   ;;  %s3404_s12 = sshll.u32 %s4035_s17, 12  ;;  %s3247_s18 = sshll.u32 %s5781_s25, 4  ;;  %s5883_s18 = int_to_ptr.vmem [resolvable:$true] %s3247_s18 }
  0x73   : > { %v445_v8 = vrot.slane %v432_v7, %v4207_v6  ;;  %v452_v13 = vrot.slane %v438_v10, %v4207_v6  ;;  %v494_v31 = vrot.slane %v433_v30, %v4207_v6  ;;  %v501_v39 = vrot.slane %v487_v35, %v4207_v6  ;;  %1534 = vst [vmem:[#allocation2 + $0x20] sm:$0xff] %v3955_v48  ;;  %v3777_v63 = vld [vmem:[#allocation8 + $0x38] sm:$0xff]   ;;  %v2842_v5 = vld [vmem:[%s4192_s26 + $0x10] sm:$0xff]  ;;  %v2843_v7 = vld [vmem:[%s4192_s26 + $0x18] sm:$0xff]  ;;  %s3403_s29 = sshll.u32 %s423_s27, 4  ;;  %s5881_s22 = scalar_lea.hbm %s5940_s10, %s3404_s12 }
  0x74   : > { %1535 = vst [vmem:[#allocation2 + $0x28] sm:$0x3] %v3955_v48  ;;  %1536 = vst [vmem:[#allocation2 + $0x30] sm:$0xff] %v3955_v48  ;;  %3452 = vmatpush3.bf16.msra.mxu1 %v3768_v51  ;;  %3499 = vmatprep.subr.bf16.mxu0 %v3774_v59  ;;  %v2840_v2 = vld [vmem:[%s4192_s26] sm:$0xff]  ;;  %v2841_v3 = vld [vmem:[%s4192_s26 + $0x8] sm:$0xff]  ;;  %v2873_v10 = vpack.c.bf16 %v2843_v7, %v2842_v5  ;;  %s4422_s19 = scalar_lea.vmem %s5931_s1, %s3403_s29  ;;  %s3234_s17 = scalar_lea.sflag [#allocation5], %s4186_s23 }
  0x75   : > { %v461_v11 = vrot.slane %v445_v8, %v4207_v6  ;;  %v453_v12 = vcombine.high %v445_v8, %v445_v8  ;;  %v468_v17 = vrot.slane %v452_v13, %v4207_v6  ;;  %v454_v24 = vcombine.high %v452_v13, %v452_v13  ;;  %1537 = vst [vmem:[#allocation2 + $0x38] sm:$0xff] %v3955_v48  ;;  %v4445_v50 = vld [vmem:[%s4422_s19 + $0x8] sm:$0xf]  ;;  %v4448_v51 = vld [vmem:[%s4422_s19 + $0xc] sm:$0xf]  ;;  %s3871_s13 = scalar_lea.vmem %s5883_s18, 4096 }
  0x76   : > { %v502_v34 = vcombine.high %v494_v31, %v494_v31  ;;  %v4283_v41 = vrot.slane %v501_v39, %v4207_v6  ;;  %v4300_v43 = vrot.slane %v494_v31, %v4207_v6  ;;  %v503_v45 = vcombine.high %v501_v39, %v501_v39  ;;  %1538 = vst [vmem:[#allocation2 + $0x40] sm:$0x3] %v3955_v48  ;;  %p3872_p0 = scmp.ne.s32.totalorder %s5883_s18, %s3871_s13  ;;  %p6161_p1 = scmp.ne.s32.totalorder %s6034_s30, 0 }
  0x77   : > { %v4219_v14 = vrot.slane %v461_v11, %v4214_v9  ;;  %v475_v15 = vrot.slane %v453_v12, %v4207_v6  ;;  %v4231_v21 = vrot.slane %v468_v17, %v4214_v9  ;;  %v483_v23 = vcombine.high %v461_v11, %v461_v11  ;;  %1539 = vst [vmem:[#allocation2 + $0x48] sm:$0xff] %v3955_v48  ;;  %s3956_s20 = smov [#allocation9]  }
  0x78   : > { %v4239_v27 = vrot.slane %v454_v24, %v4207_v6  ;;  %v484_v33 = vcombine.high %v468_v17, %v468_v17  ;;  %v4273_v38 = vrot.slane %v502_v34, %v4207_v6  ;;  %v4290_v42 = vrot.slane %v4283_v41, %v4214_v9  ;;  %1540 = vst [vmem:[#allocation2 + $0x50] sm:$0xff] %v3955_v48  ;;  %v2845_v24 = vld [vmem:[%s4192_s26 + $0x28] sm:$0xff]  ;;  %v1721_v57 = vld [vmem:[#allocation2 + $0x9] sm:$0xff]  ;;  %p3873_p3 = pnand %p3872_p0, %p6161_p1 }
  0x79   : > { %793 = vperm.xlu1 %3712, %v4219_v14   ;;  %v485_v16 = vcombine.high %v475_v15, %v475_v15  ;;  %v543_v18 = vrot.slane %v475_v15, %v4214_v9  ;;  %v547_v26 = vrot.slane %v483_v23, %v4214_v9  ;;  %v532_v44 = vcombine.high %v4300_v43, %v4300_v43  ;;  %v2844_v23 = vld [vmem:[%s4192_s26 + $0x20] sm:$0xff] }
  0x7a   : > { %v486_v28 = vcombine.high %v4239_v27, %v4239_v27  ;;  %v4270_v37 = vrot.slane %v484_v33, %v4214_v9  ;;  %v4280_v40 = vrot.slane %v4273_v38, %v4214_v9  ;;  %v4311_v47 = vrot.slane %v503_v45, %v4207_v6  ;;  %1541 = vst [vmem:[#allocation2 + $0x58] sm:$0x3] %v3955_v48  ;;  %v1617_v45 = vld [vmem:[#allocation6] sm:$0x7]  ;;  %p3874_p7 = pneg %p3873_p3 }
  0x7b   : > { %v4226_v19 = vrot.slane %v485_v16, %v4214_v9  ;;  %v4308_v46 = vrot.slane %v532_v44, %v4214_v9  ;;  %1542 = vst [vmem:[#allocation2 + $0x60] sm:$0xff] %v3955_v48  ;;  %1543 = vst [vmem:[#allocation2 + $0x68] sm:$0xff] %v3955_v48  ;;  %v559_v52 = vrot.slane %v4239_v27, %v4214_v9  ;;  %3453 = vmatprep.subr.bf16.mxu1 %v3769_v53 }
  0x7c   : > { %v4247_v29 = vrot.slane %v486_v28, %v4214_v9  ;;  %1544 = vst [vmem:[#allocation2 + $0x70] sm:$0x3] %v3955_v48  ;;  %1548 = vst [vmem:[#allocation2 + $0x90] sm:$0xff] %v3955_v48  ;;  %v4317_v49 = vrot.slane %v4311_v47, %v4214_v9  ;;  %3454 = vmatpush3.bf16.msra.mxu1 %v3769_v53  ;;  %v535_v56 = vcombine.high %v4311_v47, %v4311_v47  ;;  %v2847_v28 = vld [vmem:[%s4192_s26 + $0x38] sm:$0xff] }
  0x7d   : > { %3713 = vset.pattern.permute.xlu1 %v5948_v20  ;;  %805 = vperm.xlu0 %3726, %v4226_v19   ;;  %1549 = vst [vmem:[#allocation2 + $0x98] sm:$0xff] %v3955_v48  ;;  %1550 = vst [vmem:[#allocation2 + $0xa0] sm:$0x3] %v3955_v48  ;;  %v2872_v6 = vpack.c.bf16 %v2841_v3, %v2840_v2  ;;  %v571_v8 = vrot.slane %v4300_v43, %v4214_v9 }
  0x7e   : > { %605 = vperm.xlu1 %3713, %v543_v18   ;;  %1551 = vst [vmem:[#allocation2 + $0xa8] sm:$0xff] %v3955_v48  ;;  %1552 = vst [vmem:[#allocation2 + $0xb0] sm:$0xff] %v3955_v48  ;;  %3455 = vmatprep.subr.bf16.mxu1 %v3770_v54  ;;  %v4347_v61 = vrot.slane %v535_v56, %v4214_v9  ;;  %v2874_v27 = vpack.c.bf16 %v2845_v24, %v2844_v23  ;;  %v1720_v56 = vld [vmem:[#allocation2 + $0x1] sm:$0xff] }
  0x7f   : > { %1553 = vst [vmem:[#allocation2 + $0xb8] sm:$0x3] %v3955_v48  ;;  %1554 = vst [vmem:[#allocation2 + $0xc0] sm:$0xff] %v3955_v48  ;;  %3500 = vmatpush3.bf16.msra.mxu0 %v3774_v59  ;;  %3505 = vmatprep.mubr.msk.bf16.mxu0 %vm2927_vm0, %v2872_v6  ;;  %v4439_v47 = vrot.slane %v1617_v45, %v4214_v9  ;;  %v533_v23 = vcombine.high %v4283_v41, %v4283_v41  ;;  %v2848_v41 = vld [vmem:[%s4192_s26 + $0x40] sm:$0xff] }
  0x80   : > { %1555 = vst [vmem:[#allocation2 + $0xc8] sm:$0xff] %v3955_v48  ;;  %1556 = vst [vmem:[#allocation2 + $0xd0] sm:$0x3] %v3955_v48  ;;  %3456 = vmatpush3.bf16.msra.mxu1 %v3770_v54  ;;  %3501 = vmatprep.subr.bf16.mxu0 %v3776_v62 }
  0x81   : > { %809 = vperm.xlu0 %3726, %v4231_v21   ;;  %1557 = vst [vmem:[#allocation2 + $0xd8] sm:$0xff] %v3955_v48  ;;  %1558 = vst [vmem:[#allocation2 + $0xe0] sm:$0xff] %v3955_v48  ;;  %3457 = vmatprep.subr.bf16.mxu1 %v3771_v55  ;;  %v1656_v2 = vmul.f32 0.0, %v4439_v47 }
  0x82   : > { %3714 = vset.pattern.permute.xlu1 %v5952_v22  ;;  %1559 = vst [vmem:[#allocation2 + $0xe8] sm:$0x3] %v3955_v48  ;;  %1560 = vst [vmem:[#allocation2 + $0xf0] sm:$0xff] %v3955_v48 }
  0x83   : > { %701 = vperm.xlu1 %3714, %v543_v18   ;;  %1561 = vst [vmem:[#allocation2 + $0xf8] sm:$0xff] %v3955_v48  ;;  %1562 = vst [vmem:[#allocation2 + $0x100] sm:$0x3] %v3955_v48  ;;  %3502 = vmatpush3.bf16.msra.mxu0 %v3776_v62 }
  0x84   : > { %1563 = vst [vmem:[#allocation2 + $0x108] sm:$0xff] %v3955_v48  ;;  %1564 = vst [vmem:[#allocation2 + $0x110] sm:$0xff] %v3955_v48  ;;  %3458 = vmatpush3.bf16.msra.mxu1 %v3771_v55  ;;  %3503 = vmatprep.subr.bf16.mxu0 %v3778_v0 }
  0x85   : > { %3728 = vset.pattern.permute.xlu0 %v5950_v25  ;;  %1565 = vst [vmem:[#allocation2 + $0x118] sm:$0x3] %v3955_v48  ;;  %1566 = vst [vmem:[#allocation2 + $0x120] sm:$0xff] %v3955_v48  ;;  %3459 = vmatprep.subr.bf16.mxu1 %v3773_v58 }
  0x86   : > { %889 = vperm.xlu0 %3728, %v4219_v14   ;;  %1567 = vst [vmem:[#allocation2 + $0x128] sm:$0xff] %v3955_v48  ;;  %1568 = vst [vmem:[#allocation2 + $0x130] sm:$0x3] %v3955_v48 }
  0x87   : > { %3715 = vset.pattern.permute.xlu1 %v5946_v1  ;;  %1569 = vst [vmem:[#allocation2 + $0x138] sm:$0xff] %v3955_v48  ;;  %1570 = vst [vmem:[#allocation2 + $0x140] sm:$0xff] %v3955_v48  ;;  %3504 = vmatpush3.bf16.msra.mxu0 %v3778_v0 }
  0x88   : > { %797 = vperm.xlu1 %3715, %v543_v18   ;;  %1571 = vst [vmem:[#allocation2 + $0x148] sm:$0x3] %v3955_v48  ;;  %1572 = vst [vmem:[#allocation2 + $0x150] sm:$0xff] %v3955_v48  ;;  %3460 = vmatpush3.bf16.msra.mxu1 %v3773_v58  ;;  %v4456_v58 = vsub.s32 2, %v4204_v4 }
  0x89   : > { %1573 = vst [vmem:[#allocation2 + $0x158] sm:$0xff] %v3955_v48  ;;  %1574 = vst [vmem:[#allocation2 + $0x160] sm:$0x3] %v3955_v48  ;;  %3461 = vmatprep.subr.bf16.mxu1 %v3775_v60 }
  0x8a   : > { %897 = vperm.xlu0 %3728, %v547_v26   ;;  %1575 = vst [vmem:[#allocation2 + $0x168] sm:$0xff] %v3955_v48  ;;  %1576 = vst [vmem:[#allocation2 + $0x170] sm:$0xff] %v3955_v48  ;;  %3506 = vmatmul.mubr.msk.bf16.vlgmr.msra.gmra.mrb[0].mxu0 %vm2927_vm0, %v2873_v10 }
  0x8b   : > { %1577 = vst [vmem:[#allocation2 + $0x178] sm:$0x3] %v3955_v48  ;;  %1578 = vst [vmem:[#allocation2 + $0x180] sm:$0xff] %v3955_v48  ;;  %3509 = vmatprep.mubr.msk.bf16.mxu0 %vm2927_vm0, %v2874_v27 }
  0x8c   : > { %3716 = vset.pattern.permute.xlu1 %v5948_v20  ;;  %1579 = vst [vmem:[#allocation2 + $0x188] sm:$0xff] %v3955_v48  ;;  %1580 = vst [vmem:[#allocation2 + $0x190] sm:$0x3] %v3955_v48  ;;  %3462 = vmatpush3.bf16.msra.mxu1 %v3775_v60 }
  0x8d   : > { %609 = vperm.xlu1 %3716, %v547_v26   ;;  %1581 = vst [vmem:[#allocation2 + $0x198] sm:$0xff] %v3955_v48  ;;  %1582 = vst [vmem:[#allocation2 + $0x1a0] sm:$0xff] %v3955_v48  ;;  %3463 = vmatprep.subr.bf16.mxu1 %v3777_v63 }
  0x8e   : > { %905 = vperm.xlu0 %3728, %v4231_v21   ;;  %1583 = vst [vmem:[#allocation2 + $0x1a8] sm:$0x3] %v3955_v48  ;;  %v4442_v48 = vsub.s32 1, %v4204_v4  ;;  %6044 = vst [vmem:[#allocation20_spill] sm:$0xff] %v4445_v50 }
  0x8f   : > { %6045 = vst [vmem:[#allocation21_spill] sm:$0xff] %v4448_v51  ;;  %6046 = vst [vmem:[#allocation22_spill] sm:$0xff] %v4456_v58 }
  0x90   : > { %3464 = vmatpush3.bf16.msra.mxu1 %v3777_v63  ;;  %6043 = vst [vmem:[#allocation19_spill] sm:$0xff] %v4442_v48  ;;  %v4459_v60 = vrot.slane %v1617_v45, %v4442_v48 }
  0x91   : > { %3717 = vset.pattern.permute.xlu1 %v5950_v25 }
  0x92   : > { %893 = vperm.xlu1 %3717, %v543_v18   ;;  %917 = vperm.xlu0 %3728, %v4247_v29   ;;  %6047 = vst [vmem:[#allocation23_spill] sm:$0xff] %v4459_v60  ;;  %v1756_v6 = vmul.f32 %v4459_v60, %v1720_v56  ;;  %v1757_v7 = vmul.f32 %v4459_v60, %v1721_v57 }
  0x96   : > { %3718 = vset.pattern.permute.xlu1 %v5946_v1  ;;  %3739 = vset.pattern.permute.xlu0 %v5952_v22 }
  0x97   : > { %801 = vperm.xlu1 %3718, %v547_v26   ;;  %697 = vperm.xlu0 %3739, %v4219_v14  }
  0x9b   : > { %3719 = vset.pattern.permute.xlu1 %v5948_v20  ;;  %705 = vperm.xlu0 %3739, %v547_v26   ;;  %v2846_v26 = vld [vmem:[%s4192_s26 + $0x30] sm:$0xff] }
  0x9c   : > { %991 = vperm.xlu1 %3719, %v4261_v32  }
  0x9f   : > { %1127 = vperm.xlu0 %3739, %v4261_v32  }
  0xa0   : > { %3720 = vset.pattern.permute.xlu1 %v5952_v22 }
  0xa1   : > { %1123 = vperm.xlu1 %3720, %v434_v36  }
  0xa3   : > { %721 = vperm.xlu0 %3739, %v4270_v37  }
  0xa5   : > { %3721 = vset.pattern.permute.xlu1 %v5948_v20 }
  0xa6   : > { %613 = vperm.xlu1 %3721, %v4226_v19  }
  0xa7   : > { %733 = vperm.xlu0 %3739, %v4280_v40  }
  0xaa   : > { %3722 = vset.pattern.permute.xlu1 %v5952_v22 }
  0xab   : > { %709 = vperm.xlu1 %3722, %v4226_v19   ;;  %745 = vperm.xlu0 %3739, %v4290_v42  }
  0xaf   : > { %3723 = vset.pattern.permute.xlu1 %v5946_v1  ;;  %3750 = vset.pattern.permute.xlu0 %v5948_v20 }
  0xb0   : > { %1259 = vperm.xlu1 %3723, %v434_v36   ;;  %601 = vperm.xlu0 %3750, %v4219_v14  }
  0xb4   : > { %1263 = vperm.xlu1 %3723, %v4261_v32   ;;  %986 = vperm.xlu0 %3750, %v434_v36  }
  0xb8   : > { %3724 = vset.pattern.permute.xlu1 %v5950_v25  ;;  %617 = vperm.xlu0 %3750, %v4231_v21  }
  0xb9   : > { %1395 = vperm.xlu1 %3724, %v434_v36  }
  0xbc   : > { %629 = vperm.xlu0 %3750, %v4247_v29  }
  0xbd   : > { %1399 = vperm.xlu1 %3724, %v4261_v32   ;;  %v534_v32 = vcombine.high %v4273_v38, %v4273_v38  ;;  %v4425_v38 = vld [vmem:[%s4422_s19 + $0x4] sm:$0xf] }
  0xbf   : > { %v4413_v35 = vrot.slane %v534_v32, %v4214_v9  ;;  %v1789_v32 = vadd.f32 %v1757_v7, %v1656_v2 }
  0xc0   : > { %641 = vperm.xlu0 %3750, %v4308_v46  }
  0xc1   : > { %3725 = vset.pattern.permute.xlu1 %v5952_v22 }
  0xc2   : > { %713 = vperm.xlu1 %3725, %v4231_v21  }
  0xc4   : > { %653 = vperm.xlu0 %3750, %v4317_v49  }
  0xc6   : > { %3727 = vset.pattern.permute.xlu1 %v5950_v25 }
  0xc7   : > { %901 = vperm.xlu1 %3727, %v4226_v19  }
  0xc8   : > { %3753 = vset.pattern.permute.xlu0 %v5946_v1 }
  0xc9   : > { %821 = vperm.xlu0 %3753, %v4247_v29  }
  0xcb   : > { %3729 = vset.pattern.permute.xlu1 %v5948_v20 }
  0xcc   : > { %621 = vperm.xlu1 %3729, %v559_v52  }
  0xcd   : > { %833 = vperm.xlu0 %3753, %v4308_v46  }
  0xd0   : > { %3730 = vset.pattern.permute.xlu1 %v5952_v22 }
  0xd1   : > { %717 = vperm.xlu1 %3730, %v559_v52   ;;  %845 = vperm.xlu0 %3753, %v4317_v49  }
  0xd5   : > { %3731 = vset.pattern.permute.xlu1 %v5946_v1  ;;  %3756 = vset.pattern.permute.xlu0 %v5950_v25 }
  0xd6   : > { %813 = vperm.xlu1 %3731, %v559_v52   ;;  %929 = vperm.xlu0 %3756, %v4308_v46  }
  0xda   : > { %3732 = vset.pattern.permute.xlu1 %v5948_v20  ;;  %941 = vperm.xlu0 %3756, %v4317_v49  }
  0xdb   : > { %625 = vperm.xlu1 %3732, %v4270_v37  }
  0xde   : > { %3761 = vset.pattern.permute.xlu0 %v5952_v22 }
  0xdf   : > { %3733 = vset.pattern.permute.xlu1 %v5950_v25  ;;  %757 = vperm.xlu0 %3761, %v4347_v61  }
  0xe0   : > { %909 = vperm.xlu1 %3733, %v559_v52  }
  0xe3   : > { %3764 = vset.pattern.permute.xlu0 %v5950_v25 }
  0xe4   : > { %3734 = vset.pattern.permute.xlu1 %v5946_v1  ;;  %949 = vperm.xlu0 %3764, %v4347_v61  }
  0xe5   : > { %817 = vperm.xlu1 %3734, %v4270_v37  }
  0xe9   : > { %3735 = vset.pattern.permute.xlu1 %v5952_v22 }
  0xea   : > { %725 = vperm.xlu1 %3735, %v4247_v29   ;;  %v2875_v29 = vpack.c.bf16 %v2847_v28, %v2846_v26  ;;  %v1618_v26 = vld [vmem:[#allocation6 + $0x4] sm:$0x7] }
  0xeb   : > { %v4500_v56 = vrot.slane %v1618_v26, %v4214_v9 }
  0xec   : > { %3510 = vmatmul.mubr.msk.bf16.gmra.mrb[4].mxu0 %vm2927_vm0, %v2875_v29  ;;  %v1619_v29 = vld [vmem:[#allocation6 + $0x8] sm:$0x7] }
  0xed   : > { %v4506_v57 = vrot.slane %v1619_v29, %v4442_v48 }
  0xee   : > { %3736 = vset.pattern.permute.xlu1 %v5950_v25 }
  0xef   : > { %913 = vperm.xlu1 %3736, %v4270_v37   ;;  %6052 = vst [vmem:[#allocation28_spill] sm:$0xff] %v4506_v57 }
  0xf3   : > { %3737 = vset.pattern.permute.xlu1 %v5948_v20 }
  0xf4   : > { %633 = vperm.xlu1 %3737, %v571_v8  }
  0xf8   : > { %v4375_v11 = vpop.permute.xlu1 %793  ;;  %3738 = vset.pattern.permute.xlu1 %v5952_v22 }
  0xf9   : > { %729 = vperm.xlu1 %3738, %v571_v8  }
  0xfc   : > { %v4378_v12 = vpop.permute.xlu0 %805 }
  0xfd   : > { %v606_v13 = vpop.permute.xlu1 %605  ;;  %3740 = vset.pattern.permute.xlu1 %v5946_v1 }
  0xfe   : > { %825 = vperm.xlu1 %3740, %v571_v8  }
 0x100   : > { %v4381_v14 = vpop.permute.xlu0 %809 }
 0x102   : > { %v702_v15 = vpop.permute.xlu1 %701  ;;  %3741 = vset.pattern.permute.xlu1 %v5948_v20 }
 0x103   : > { %637 = vperm.xlu1 %3741, %v4280_v40  }
 0x105   : > { %v4385_v16 = vpop.permute.xlu0 %889 }
 0x107   : > { %v798_v17 = vpop.permute.xlu1 %797  ;;  %3742 = vset.pattern.permute.xlu1 %v5950_v25 }
 0x108   : > { %921 = vperm.xlu1 %3742, %v571_v8   ;;  %v857_v55 = vmul.f32 %v798_v17, %v4445_v50  ;;  %v4473_v8 = vrot.slane %v1617_v45, %v4456_v58 }
 0x109   : > { %v4388_v18 = vpop.permute.xlu0 %897 }
 0x10a   : > { %6048 = vst [vmem:[#allocation24_spill] sm:$0xff] %v4473_v8  ;;  %v954_v17 = vmul.f32 %v4388_v18, %v4448_v51 }
 0x10c   : > { %v610_v19 = vpop.permute.xlu1 %609  ;;  %3743 = vset.pattern.permute.xlu1 %v5946_v1 }
 0x10d   : > { %829 = vperm.xlu1 %3743, %v4280_v40   ;;  %v4392_v21 = vpop.permute.xlu0 %905 }
 0x111   : > { %v894_v30 = vpop.permute.xlu1 %893  ;;  %3744 = vset.pattern.permute.xlu1 %v5952_v22  ;;  %v4399_v31 = vpop.permute.xlu0 %917 }
 0x112   : > { %737 = vperm.xlu1 %3744, %v4308_v46   ;;  %v761_v46 = vmul.f32 %v702_v15, %v4425_v38  ;;  %v953_v63 = vmul.f32 %v894_v30, %v4448_v51  ;;  %v1821_v15 = vld [vmem:[#allocation2 + $0xa] sm:$0xff]  ;;  %v1788_v30 = vadd.f32 %v1756_v6, %v1656_v2  ;;  %v4515_v2 = vrot.slane %v1618_v26, %v4456_v58 }
 0x113   : > { %v1857_v18 = vmul.f32 %v4473_v8, %v1821_v15  ;;  %v2850_v15 = vld [vmem:[%s4192_s26 + $0x50] sm:$0xff] }
 0x116   : > { %v802_v33 = vpop.permute.xlu1 %801  ;;  %v4408_v34 = vpop.permute.xlu0 %697  ;;  %3745 = vset.pattern.permute.xlu1 %v5950_v25 }
 0x117   : > { %925 = vperm.xlu1 %3745, %v4280_v40   ;;  %v4430_v40 = vld [vmem:[%s4422_s19] sm:$0xf]  ;;  %v858_v3 = vmul.f32 %v802_v33, %v4445_v50 }
 0x118   : > { %v666_v52 = vmul.f32 %v610_v19, %v4430_v40  ;;  %v665_v54 = vmul.f32 %v606_v13, %v4430_v40  ;;  %v1820_v13 = vld [vmem:[#allocation2 + $0x2] sm:$0xff] }
 0x119   : > { %v1856_v33 = vmul.f32 %v4473_v8, %v1820_v13  ;;  %v4526_v13 = vrot.slane %v1619_v29, %v4456_v58 }
 0x11a   : > { %v706_v36 = vpop.permute.xlu0 %705  ;;  %v777_v62 = vadd.f32 %v761_v46, %v665_v54  ;;  %v4493_v46 = vrot.slane %v533_v23, %v4214_v9 }
 0x11b   : > { %v4415_v37 = vpop.permute.xlu1 %991  ;;  %3746 = vset.pattern.permute.xlu1 %v5948_v20  ;;  %v762_v43 = vmul.f32 %v706_v36, %v4425_v38  ;;  %v4487_v36 = vsub.s32 3, %v4204_v4  ;;  %v4503_v4 = vrot.slane %v1619_v29, %v4214_v9  ;;  %v952_v29 = vmul.f32 %v4385_v16, %v4448_v51 }
 0x11c   : > { %6040 = vst [vmem:[#allocation16_spill] sm:$0xff] %v4415_v37  ;;  %645 = vperm.xlu1 %3746, %v4413_v35   ;;  %v873_v10 = vadd.f32 %v857_v55, %v777_v62  ;;  %v4510_v62 = vadd.f32 %v1856_v33, %v1788_v30  ;;  %v4539_v30 = vmul.f32 %v4381_v14, %v4445_v50 }
 0x11d   : > { %v778_v59 = vadd.f32 %v762_v43, %v666_v52  ;;  %6049 = vst [vmem:[#allocation25_spill] sm:$0xff] %v4487_v36  ;;  %v2849_v43 = vld [vmem:[%s4192_s26 + $0x48] sm:$0xff]  ;;  %v4496_v52 = vrot.slane %v1618_v26, %v4442_v48  ;;  %6051 = vst [vmem:[#allocation27_spill] sm:$0xff] %v4503_v4 }
 0x11e   : > { %v4427_v39 = vpop.permute.xlu0 %1127  ;;  %v969_v24 = vadd.f32 %v953_v63, %v873_v10  ;;  %v2876_v54 = vpack.c.bf16 %v2849_v43, %v2848_v41  ;;  %v4512_v63 = vadd.f32 %v1857_v18, %v1789_v32 }
 0x11f   : > { %6041 = vst [vmem:[#allocation17_spill] sm:$0xff] %v4427_v39  ;;  %v874_v19 = vadd.f32 %v858_v3, %v778_v59  ;;  %6050 = vst [vmem:[#allocation26_spill] sm:$0xff] %v4496_v52  ;;  %v760_v59 = vmul.f32 %v4408_v34, %v4425_v38  ;;  %v856_v3 = vmul.f32 %v4375_v11, %v4445_v50 }
 0x120   : > { %v4433_v44 = vpop.permute.xlu1 %1123  ;;  %3747 = vset.pattern.permute.xlu1 %v5952_v22  ;;  %v1137_v55 = vrot.slane %v969_v24, %v4442_v48  ;;  %3513 = vmatprep.mubr.msk.bf16.mxu0 %vm2927_vm0, %v2876_v54  ;;  %v1001_v6 = vrot.slane %v969_v24, %v4214_v9  ;;  %v1273_v18 = vrot.slane %v969_v24, %v4456_v58 }
 0x121   : > { %6042 = vst [vmem:[#allocation18_spill] sm:$0xff] %v4433_v44  ;;  %741 = vperm.xlu1 %3747, %v4413_v35   ;;  %v970_v45 = vadd.f32 %v954_v17, %v874_v19  ;;  %v2851_v17 = vld [vmem:[%s4192_s26 + $0x58] sm:$0xff]  ;;  %v4532_v19 = vmul.f32 %v4378_v12, %v4445_v50  ;;  %v4547_v12 = vmul.f32 %v4392_v21, %v4448_v51 }
 0x122   : > { %v4451_v53 = vpop.permute.xlu0 %721  ;;  %v1197_v34 = vmul.f32 %v1137_v55, %v4427_v39  ;;  %v2877_v26 = vpack.c.bf16 %v2851_v17, %v2850_v15  ;;  %v1061_v33 = vmul.f32 %v1001_v6, %v4415_v37  ;;  %v1409_v14 = vrot.slane %v969_v24, %v4487_v36 }
 0x123   : > { %v1141_v11 = vrot.slane %v970_v45, %v4442_v48  ;;  %v1005_v32 = vrot.slane %v970_v45, %v4214_v9  ;;  %v1277_v16 = vrot.slane %v970_v45, %v4456_v58  ;;  %v1196_v21 = vmul.f32 %v1137_v55, %v4433_v44 }
 0x124   : > { %3514 = vmatmul.mubr.msk.bf16.gmra.mrb[8].mxu0 %vm2927_vm0, %v2877_v26  ;;  %v1413_v24 = vrot.slane %v970_v45, %v4487_v36 }
 0x125   : > { %v4462_v0 = vpop.permute.xlu1 %613  ;;  %3748 = vset.pattern.permute.xlu1 %v5946_v1  ;;  %v1198_v17 = vmul.f32 %v1141_v11, %v4433_v44  ;;  %v1063_v55 = vmul.f32 %v1005_v32, %v4415_v37 }
 0x126   : > { %837 = vperm.xlu1 %3748, %v4413_v35   ;;  %v4468_v5 = vpop.permute.xlu0 %733 }
 0x12a   : > { %v4479_v27 = vpop.permute.xlu1 %709  ;;  %3749 = vset.pattern.permute.xlu1 %v5948_v20  ;;  %v4482_v28 = vpop.permute.xlu0 %745 }
 0x12b   : > { %649 = vperm.xlu1 %3749, %v4290_v42  }
 0x12f   : > { %v4521_v7 = vpop.permute.xlu1 %1259  ;;  %v602_v10 = vpop.permute.xlu0 %601  ;;  %3751 = vset.pattern.permute.xlu1 %v5950_v25 }
 0x130   : > { %6053 = vst [vmem:[#allocation29_spill] sm:$0xff] %v4521_v7  ;;  %v664_v23 = vmul.f32 %v602_v10, %v4430_v40  ;;  %933 = vperm.xlu1 %3751, %v4413_v35   ;;  %v4552_v35 = vmul.f32 %v4399_v31, %v4448_v51  ;;  %v1229_v10 = vadd.f32 %v1197_v34, %v1061_v33 }
 0x131   : > { %v667_v34 = vmul.f32 %v4462_v0, %v4430_v40 }
 0x132   : > { %6054 = vst [vmem:[#allocation30_spill] sm:$0xff] %v4552_v35  ;;  %v776_v41 = vadd.f32 %v760_v59, %v664_v23  ;;  %v4569_v23 = vmul.f32 %v4451_v53, %v4425_v38  ;;  %v763_v53 = vmul.f32 %v4479_v27, %v4425_v38 }
 0x133   : > { %v4557_v43 = vpop.permute.xlu1 %1263  ;;  %v4559_v54 = vpop.permute.xlu0 %986 }
 0x134   : > { %6055 = vst [vmem:[#allocation31_spill] sm:$0xff] %v4557_v43  ;;  %6056 = vst [vmem:[#allocation32_spill] sm:$0xff] %v4559_v54  ;;  %v872_v15 = vadd.f32 %v856_v3, %v776_v41  ;;  %3752 = vset.pattern.permute.xlu1 %v5946_v1  ;;  %v1060_v31 = vmul.f32 %v1001_v6, %v4559_v54  ;;  %v1062_v59 = vmul.f32 %v1005_v32, %v4559_v54 }
 0x135   : > { %6057 = vst [vmem:[#allocation33_spill] sm:$0xff] %v4569_v23  ;;  %841 = vperm.xlu1 %3752, %v4290_v42   ;;  %v1199_v3 = vmul.f32 %v1141_v11, %v4427_v39  ;;  %v4578_v41 = vmul.f32 %v4468_v5, %v4425_v38  ;;  %v1332_v1 = vmul.f32 %v1273_v18, %v4521_v7 }
 0x136   : > { %v968_v6 = vadd.f32 %v952_v29, %v872_v15  ;;  %v1228_v26 = vadd.f32 %v1196_v21, %v1060_v31  ;;  %v1230_v33 = vadd.f32 %v1198_v17, %v1062_v59  ;;  %v1334_v32 = vmul.f32 %v1277_v16, %v4521_v7 }
 0x137   : > { %6058 = vst [vmem:[#allocation34_spill] sm:$0xff] %v4578_v41  ;;  %v618_v45 = vpop.permute.xlu0 %617  ;;  %v1333_v21 = vmul.f32 %v1273_v18, %v4557_v43  ;;  %v1231_v15 = vadd.f32 %v1199_v3, %v1063_v55  ;;  %v1335_v31 = vmul.f32 %v1277_v16, %v4557_v43  ;;  %v779_v35 = vadd.f32 %v763_v53, %v667_v34 }
 0x138   : > { %v997_v11 = vrot.slane %v968_v6, %v4214_v9  ;;  %v1133_v20 = vrot.slane %v968_v6, %v4442_v48  ;;  %v1269_v0 = vrot.slane %v968_v6, %v4456_v58  ;;  %v4587_v29 = vpop.permute.xlu1 %1395  ;;  %v1364_v5 = vadd.f32 %v1332_v1, %v1228_v26 }
 0x139   : > { %6059 = vst [vmem:[#allocation35_spill] sm:$0xff] %v4587_v29  ;;  %3754 = vset.pattern.permute.xlu1 %v5952_v22  ;;  %v1468_v27 = vmul.f32 %v1409_v14, %v4587_v29  ;;  %v1366_v41 = vadd.f32 %v1334_v32, %v1230_v33  ;;  %v1405_v18 = vrot.slane %v968_v6, %v4487_v36  ;;  %v6061_v6 = vmov 3  }
 0x13a   : > { %v1059_v59 = vmul.f32 %v997_v11, %v4415_v37  ;;  %v1194_v17 = vmul.f32 %v1133_v20, %v4433_v44  ;;  %v1195_v25 = vmul.f32 %v1133_v20, %v4427_v39  ;;  %749 = vperm.xlu1 %3754, %v4317_v49   ;;  %v1058_v22 = vmul.f32 %v997_v11, %v4559_v54 }
 0x13b   : > { %v1500_v1 = vadd.f32 %v1468_v27, %v1364_v5  ;;  %v630_v26 = vpop.permute.xlu0 %629  ;;  %v1331_v16 = vmul.f32 %v1269_v0, %v4557_v43  ;;  %v1365_v3 = vadd.f32 %v1333_v21, %v1229_v10  ;;  %v1470_v50 = vmul.f32 %v1413_v24, %v4587_v29 }
 0x13c   : > { %v1227_v23 = vadd.f32 %v1195_v25, %v1059_v59  ;;  %v4599_v55 = vpop.permute.xlu1 %1399  ;;  %v1330_v20 = vmul.f32 %v1269_v0, %v4521_v7  ;;  %v1226_v8 = vadd.f32 %v1194_v17, %v1058_v22  ;;  %v1367_v53 = vadd.f32 %v1335_v31, %v1231_v15 }
 0x13d   : > { %6060 = vst [vmem:[#allocation36_spill] sm:$0xff] %v4599_v55  ;;  %v1467_v49 = vmul.f32 %v1405_v18, %v4599_v55  ;;  %v1469_v34 = vmul.f32 %v1409_v14, %v4599_v55  ;;  %1587 = vst [vmem:[#allocation2 + $0x31] sm:$0xff] %v1500_v1  ;;  %v1471_v25 = vmul.f32 %v1413_v24, %v4599_v55  ;;  %v6066_v15 = vmov 0  }
 0x13e   : > { %3755 = vset.pattern.permute.xlu1 %v6061_v6  ;;  %v1363_v33 = vadd.f32 %v1331_v16, %v1227_v23  ;;  %v1502_v32 = vadd.f32 %v1470_v50, %v1366_v41  ;;  %v4610_v10 = vmul.f32 %v4482_v28, %v4425_v38  ;;  %v1362_v11 = vadd.f32 %v1330_v20, %v1226_v8 }
 0x13f   : > { %937 = vperm.xlu1 %3755, %v4290_v42   ;;  %v1466_v22 = vmul.f32 %v1405_v18, %v4587_v29  ;;  %v1501_v0 = vadd.f32 %v1469_v34, %v1365_v3  ;;  %v642_v21 = vpop.permute.xlu0 %641  ;;  %v668_v14 = vmul.f32 %v618_v45, %v4430_v40  ;;  %v875_v5 = vadd.f32 %v4532_v19, %v779_v35 }
 0x140   : > { %6062 = vst [vmem:[#allocation37_spill] sm:$0xff] %v4610_v10  ;;  %v1499_v23 = vadd.f32 %v1467_v49, %v1363_v33  ;;  %v1503_v27 = vadd.f32 %v1471_v25, %v1367_v53  ;;  %1589 = vst [vmem:[#allocation2 + $0x49] sm:$0xff] %v1502_v32  ;;  %v4617_v28 = vmul.f32 %v4506_v57, %v1500_v1 }
 0x141   : > { %v714_v24 = vpop.permute.xlu1 %713  ;;  %v1498_v50 = vadd.f32 %v1466_v22, %v1362_v11  ;;  %1588 = vst [vmem:[#allocation2 + $0x39] sm:$0xff] %v1501_v0  ;;  %v4620_v42 = vmul.f32 %v630_v26, %v4430_v40  ;;  %v4623_v8 = vmul.f32 %v4496_v52, %v1500_v1  ;;  %v4627_v19 = vmul.f32 %v4506_v57, %v1502_v32 }
 0x142   : > { %v764_v41 = vmul.f32 %v714_v24, %v4425_v38  ;;  %1586 = vst [vmem:[#allocation2 + $0x21] sm:$0xff] %v1499_v23  ;;  %1590 = vst [vmem:[#allocation2 + $0x51] sm:$0xff] %v1503_v27  ;;  %v4630_v35 = vmul.f32 %v642_v21, %v4430_v40  ;;  %v1760_v45 = vmul.f32 %v4459_v60, %v1500_v1 }
 0x143   : > { %6063 = vst [vmem:[#allocation38_spill] sm:$0xff] %v4620_v42  ;;  %6064 = vst [vmem:[#allocation39_spill] sm:$0xff] %v4627_v19  ;;  %3757 = vset.pattern.permute.xlu1 %v6066_v15  ;;  %v4635_v31 = vmul.f32 %v4496_v52, %v1499_v23  ;;  %v4638_v59 = vmul.f32 %v4506_v57, %v1501_v0  ;;  %v4641_v17 = vmul.f32 %v4496_v52, %v1501_v0  ;;  %v654_v34 = vpop.permute.xlu0 %653 }
 0x144   : > { %6065 = vst [vmem:[#allocation40_spill] sm:$0xff] %v4630_v35  ;;  %1585 = vst [vmem:[#allocation2 + $0x19] sm:$0xff] %v1498_v50  ;;  %v4644_v18 = vmul.f32 %v4459_v60, %v1501_v0  ;;  %v780_v26 = vadd.f32 %v764_v41, %v668_v14  ;;  %657 = vperm.xlu1 %3757, %v4493_v46   ;;  %v4648_v1 = vmul.f32 %v4496_v52, %v1498_v50  ;;  %v2221_v16 = vld [vmem:[#allocation2 + $0x30] sm:$0xff] }
 0x145   : > { %v4651_v3 = vmul.f32 %v4459_v60, %v1499_v23  ;;  %v4654_v20 = vmul.f32 %v4506_v57, %v1503_v27  ;;  %v4657_v49 = vmul.f32 %v4459_v60, %v1498_v50  ;;  %v1660_v33 = vmul.f32 %v2221_v16, %v4439_v47 }
 0x146   : > { %v4661_v53 = vmul.f32 %v4496_v52, %v1502_v32  ;;  %v4664_v25 = vmul.f32 %v4496_v52, %v1503_v27  ;;  %v876_v11 = vadd.f32 %v4539_v30, %v780_v26  ;;  %v902_v22 = vpop.permute.xlu1 %901  ;;  %v4668_v0 = vmul.f32 %v654_v34, %v4430_v40 }
 0x147   : > { %6067 = vst [vmem:[#allocation41_spill] sm:$0xff] %v4654_v20  ;;  %v4671_v21 = vmul.f32 %v4459_v60, %v1502_v32  ;;  %v4674_v14 = vmul.f32 %v4459_v60, %v1503_v27  ;;  %v955_v23 = vmul.f32 %v902_v22, %v4448_v51  ;;  %v4678_v24 = vmul.f32 %v4503_v4, %v2221_v16  ;;  %v2223_v41 = vld [vmem:[#allocation2 + $0x48] sm:$0xff] }
 0x148   : > { %6068 = vst [vmem:[#allocation42_spill] sm:$0xff] %v4661_v53  ;;  %6069 = vst [vmem:[#allocation43_spill] sm:$0xff] %v4664_v25  ;;  %v4681_v50 = vmul.f32 %v2221_v16, %v4500_v56  ;;  %v4683_v30 = vadd.f32 %v1760_v45, %v1660_v33  ;;  %v972_v26 = vadd.f32 %v4547_v12, %v876_v11  ;;  %v6074_v34 = vmov 1   ;;  %v4687_v32 = vld [vmem:[#allocation2 + $0x38] sm:$0xff] }
 0x149   : > { %6070 = vst [vmem:[#allocation44_spill] sm:$0xff] %v4668_v0  ;;  %6071 = vst [vmem:[#allocation45_spill] sm:$0xff] %v4671_v21  ;;  %3758 = vset.pattern.permute.xlu1 %v6074_v34  ;;  %v4689_v0 = vld [vmem:[#allocation2 + $0x32] sm:$0xff]  ;;  %v4691_v27 = vld [vmem:[#allocation2 + $0x3a] sm:$0xff]  ;;  %v4694_v22 = vmul.f32 %v4503_v4, %v2223_v41  ;;  %v4697_v10 = vmul.f32 %v2223_v41, %v4500_v56  ;;  %v4700_v16 = vmul.f32 %v2223_v41, %v4439_v47 }
 0x14a   : > { %6072 = vst [vmem:[#allocation46_spill] sm:$0xff] %v4674_v14  ;;  %6073 = vst [vmem:[#allocation47_spill] sm:$0xff] %v4683_v30  ;;  %v971_v45 = vadd.f32 %v955_v23, %v875_v5  ;;  %753 = vperm.xlu1 %3758, %v4493_v46   ;;  %v4705_v12 = vmul.f32 %v4503_v4, %v4687_v32  ;;  %v4709_v33 = vmul.f32 %v4526_v13, %v4689_v0 }
 0x14b   : > { %6075 = vst [vmem:[#allocation48_spill] sm:$0xff] %v4694_v22  ;;  %6076 = vst [vmem:[#allocation49_spill] sm:$0xff] %v4697_v10  ;;  %v4713_v11 = vmul.f32 %v4526_v13, %v4691_v27  ;;  %v1013_v34 = vrot.slane %v972_v26, %v4214_v9  ;;  %v1149_v41 = vrot.slane %v972_v26, %v4442_v48  ;;  %v622_v21 = vpop.permute.xlu1 %621  ;;  %v1920_v22 = vld [vmem:[#allocation2 + $0x18] sm:$0xff] }
 0x14c   : > { %6077 = vst [vmem:[#allocation50_spill] sm:$0xff] %v4700_v16  ;;  %v1285_v5 = vrot.slane %v972_v26, %v4456_v58  ;;  %v1421_v23 = vrot.slane %v972_v26, %v4487_v36  ;;  %v1009_v35 = vrot.slane %v971_v45, %v4214_v9  ;;  %v1145_v60 = vrot.slane %v971_v45, %v4442_v48 }
 0x14d   : > { %v1281_v52 = vrot.slane %v971_v45, %v4456_v58  ;;  %v1417_v14 = vrot.slane %v971_v45, %v4487_v36  ;;  %v1066_v16 = vmul.f32 %v1013_v34, %v4559_v54  ;;  %v1067_v42 = vmul.f32 %v1013_v34, %v4415_v37 }
 0x14e   : > { %v1202_v57 = vmul.f32 %v1149_v41, %v4433_v44  ;;  %v1203_v25 = vmul.f32 %v1149_v41, %v4427_v39  ;;  %v1338_v53 = vmul.f32 %v1285_v5, %v4521_v7  ;;  %v1339_v26 = vmul.f32 %v1285_v5, %v4557_v43 }
 0x14f   : > { %v1474_v9 = vmul.f32 %v1421_v23, %v4587_v29  ;;  %v1475_v48 = vmul.f32 %v1421_v23, %v4599_v55  ;;  %v6078_v58 = vmov 2   ;;  %v1064_v20 = vmul.f32 %v1009_v35, %v4559_v54  ;;  %v1921_v23 = vld [vmem:[#allocation2 + $0x20] sm:$0xff] }
 0x150   : > { %3759 = vset.pattern.permute.xlu1 %v6078_v58  ;;  %v1234_v45 = vadd.f32 %v1202_v57, %v1066_v16  ;;  %v1235_v36 = vadd.f32 %v1203_v25, %v1067_v42  ;;  %v1065_v34 = vmul.f32 %v1009_v35, %v4415_v37  ;;  %v1200_v41 = vmul.f32 %v1145_v60, %v4433_v44  ;;  %v718_v25 = vpop.permute.xlu1 %717  ;;  %v2120_v35 = vld [vmem:[#allocation2 + $0x1a] sm:$0xff] }
 0x151   : > { %849 = vperm.xlu1 %3759, %v4493_v46   ;;  %v1201_v19 = vmul.f32 %v1145_v60, %v4427_v39  ;;  %v1336_v5 = vmul.f32 %v1281_v52, %v4521_v7  ;;  %v1337_v10 = vmul.f32 %v1281_v52, %v4557_v43  ;;  %v1472_v57 = vmul.f32 %v1417_v14, %v4587_v29  ;;  %v2121_v39 = vld [vmem:[#allocation2 + $0x22] sm:$0xff] }
 0x152   : > { %v1370_v51 = vadd.f32 %v1338_v53, %v1234_v45  ;;  %v1371_v30 = vadd.f32 %v1339_v26, %v1235_v36  ;;  %v1473_v42 = vmul.f32 %v1417_v14, %v4599_v55  ;;  %v1232_v16 = vadd.f32 %v1200_v41, %v1064_v20  ;;  %v6080_v45 = vld [vmem:[#allocation20_spill] sm:$0xff] }
 0x153   : > { %v1233_v37 = vadd.f32 %v1201_v19, %v1065_v34  ;;  %v669_v44 = vmul.f32 %v622_v21, %v4430_v40  ;;  %v765_v60 = vmul.f32 %v718_v25, %v4425_v38  ;;  %v1956_v52 = vmul.f32 %v4500_v56, %v1920_v22  ;;  %v4762_v34 = vld [vmem:[#allocation2 + $0x50] sm:$0xff] }
 0x154   : > { %v1506_v7 = vadd.f32 %v1474_v9, %v1370_v51  ;;  %v1507_v54 = vadd.f32 %v1475_v48, %v1371_v30  ;;  %v1957_v36 = vmul.f32 %v4500_v56, %v1921_v23  ;;  %v1368_v53 = vadd.f32 %v1336_v5, %v1232_v16 }
 0x155   : > { %3760 = vset.pattern.permute.xlu1 %v6066_v15  ;;  %v1369_v26 = vadd.f32 %v1337_v10, %v1233_v37  ;;  %v781_v14 = vadd.f32 %v765_v60, %v669_v44  ;;  %v2156_v19 = vmul.f32 %v4515_v2, %v2120_v35  ;;  %v1988_v20 = vadd.f32 %v1956_v52, %v4510_v62  ;;  %v814_v37 = vpop.permute.xlu1 %813  ;;  %v6079_v10 = vld [vmem:[#allocation24_spill] sm:$0xff] }
 0x156   : > { %661 = vperm.xlu1 %3760, %v4347_v61   ;;  %1593 = vst [vmem:[#allocation2 + $0x79] sm:$0xff] %v1506_v7  ;;  %1594 = vst [vmem:[#allocation2 + $0x81] sm:$0xff] %v1507_v54  ;;  %v1989_v9 = vadd.f32 %v1957_v36, %v4512_v63  ;;  %v2157_v48 = vmul.f32 %v4515_v2, %v2121_v39  ;;  %v1658_v51 = vmul.f32 %v1920_v22, %v4439_v47  ;;  %v4764_v22 = vld [vmem:[#allocation2 + $0x4a] sm:$0xff] }
 0x157   : > { %v4752_v15 = vadd.f32 %v1472_v57, %v1368_v53  ;;  %v4754_v21 = vadd.f32 %v1473_v42, %v1369_v26  ;;  %v1659_v44 = vmul.f32 %v1921_v23, %v4439_v47  ;;  %v1858_v30 = vmul.f32 %v2120_v35, %v6079_v10  ;;  %v822_v35 = vpop.permute.xlu0 %821 }
 0x158   : > { %v861_v7 = vmul.f32 %v814_v37, %v6080_v45  ;;  %v2088_v54 = vadd.f32 %v4648_v1, %v1988_v20  ;;  %v2089_v62 = vadd.f32 %v4635_v31, %v1989_v9  ;;  %v1790_v63 = vadd.f32 %v4657_v49, %v1658_v51  ;;  %v4775_v49 = vld [vmem:[#allocation2 + $0x52] sm:$0xff]  ;;  %v4806_v37 = vld [vmem:[%s5935_s5] ss:$0 sm:$0xff] }
 0x159   : > { %1591 = vst [vmem:[#allocation2 + $0x61] sm:$0xff] %v4752_v15  ;;  %1592 = vst [vmem:[#allocation2 + $0x69] sm:$0xff] %v4754_v21  ;;  %v1791_v41 = vadd.f32 %v4651_v3, %v1659_v44  ;;  %v1859_v5 = vmul.f32 %v2121_v39, %v6079_v10  ;;  %v1959_v1 = vmul.f32 %v4687_v32, %v4500_v56  ;;  %v6082_v44 = vld [vmem:[#allocation47_spill] sm:$0xff] }
 0x15a   : > { %3762 = vset.pattern.permute.xlu1 %v6061_v6  ;;  %v2158_v31 = vmul.f32 %v4689_v0, %v4515_v2  ;;  %v877_v23 = vadd.f32 %v861_v7, %v781_v14  ;;  %v2188_v57 = vadd.f32 %v2156_v19, %v2088_v54  ;;  %v2189_v42 = vadd.f32 %v2157_v48, %v2089_v62  ;;  %v626_v60 = vpop.permute.xlu1 %625  ;;  %v6081_v48 = vld [vmem:[#allocation33_spill] sm:$0xff] }
 0x15b   : > { %945 = vperm.xlu1 %3762, %v4493_v46   ;;  %v1890_v25 = vadd.f32 %v1858_v30, %v1790_v63  ;;  %v1891_v6 = vadd.f32 %v1859_v5, %v1791_v41  ;;  %v2159_v3 = vmul.f32 %v4691_v27, %v4515_v2  ;;  %v2260_v39 = vmul.f32 %v4503_v4, %v4762_v34  ;;  %v6083_v63 = vld [vmem:[#allocation21_spill] sm:$0xff]  ;;  %v6084_v41 = vld [vmem:[#allocation48_spill] sm:$0xff] }
 0x15c   : > { %v2459_v16 = vmul.f32 %v4526_v13, %v4764_v22  ;;  %v2289_v52 = vadd.f32 %v4678_v24, %v2188_v57  ;;  %v2290_v36 = vadd.f32 %v4705_v12, %v2189_v42  ;;  %v2460_v53 = vmul.f32 %v4526_v13, %v4775_v49 }
 0x15d   : > { %v1990_v46 = vadd.f32 %v4681_v50, %v1890_v25  ;;  %v670_v26 = vmul.f32 %v626_v60, %v4430_v40  ;;  %v1991_v14 = vadd.f32 %v1959_v1, %v1891_v6  ;;  %v4791_v19 = vmul.f32 %v822_v35, %v6080_v45  ;;  %v6086_v60 = vld [vmem:[#allocation39_spill] sm:$0xff] }
 0x15e   : > { %v1661_v20 = vmul.f32 %v4687_v32, %v4439_v47  ;;  %v2389_v24 = vadd.f32 %v4617_v28, %v2289_v52  ;;  %v2390_v12 = vadd.f32 %v4638_v59, %v2290_v36  ;;  %v1860_v9 = vmul.f32 %v4689_v0, %v6079_v10  ;;  %v6087_v36 = vld [vmem:[#allocation41_spill] sm:$0xff] }
 0x15f   : > { %3763 = vset.pattern.permute.xlu1 %v6078_v58  ;;  %v2090_v50 = vadd.f32 %v4623_v8, %v1990_v46  ;;  %v782_v51 = vadd.f32 %v6081_v48, %v670_v26  ;;  %v2091_v58 = vadd.f32 %v4641_v17, %v1991_v14  ;;  %v1861_v59 = vmul.f32 %v4691_v27, %v6079_v10  ;;  %v6088_v26 = vld [vmem:[#allocation42_spill] sm:$0xff]  ;;  %v6091_v48 = vld [vmem:[#allocation19_spill] sm:$0xff] }
 0x160   : > { %853 = vperm.xlu1 %3763, %v4347_v61   ;;  %v1793_v28 = vadd.f32 %v4644_v18, %v1661_v20  ;;  %v2489_v8 = vadd.f32 %v4709_v33, %v2389_v24  ;;  %v2490_v0 = vadd.f32 %v4713_v11, %v2390_v12  ;;  %v1892_v30 = vadd.f32 %v1860_v9, %v6082_v44  ;;  %v910_v61 = vpop.permute.xlu1 %909  ;;  %v4823_v5 = vld [vmem:[#allocation2 + $0x60] sm:$0xff] }
 0x161   : > { %v2190_v32 = vadd.f32 %v2158_v31, %v2090_v50  ;;  %v2191_v7 = vadd.f32 %v2159_v3, %v2091_v58  ;;  %v1961_v62 = vmul.f32 %v4762_v34, %v4500_v56  ;;  %v2160_v17 = vmul.f32 %v4764_v22, %v4515_v2  ;;  %v6085_v31 = vld [vmem:[#allocation49_spill] sm:$0xff]  ;;  %v6089_v20 = vld [vmem:[#allocation43_spill] sm:$0xff] }
 0x162   : > { %v1893_v54 = vadd.f32 %v1861_v59, %v1793_v28  ;;  %v2528_v18 = vadd.f32 %v4806_v37, %v2489_v8  ;;  %v2529_v27 = vadd.f32 %v4806_v37, %v2490_v0  ;;  %v957_v33 = vmul.f32 %v910_v61, %v6083_v63  ;;  %v6090_v50 = vld [vmem:[#allocation15_spill] sm:$0xff]  ;;  %v6092_v28 = vld [vmem:[#allocation22_spill] sm:$0xff]  ;;  %v6094_v61 = vld [vmem:[#allocation32_spill] sm:$0xff] }
 0x163   : > { %v2291_v11 = vadd.f32 %v6084_v41, %v2190_v32  ;;  %v2292_v1 = vadd.f32 %v2260_v39, %v2191_v7  ;;  %v1992_v57 = vadd.f32 %v6085_v31, %v1892_v30  ;;  %v2161_v25 = vmul.f32 %v4775_v49, %v4515_v2 }
 0x164   : > { %v1993_v42 = vadd.f32 %v1961_v62, %v1893_v54  ;;  %v2560_v35 = vmax.f32 %v2528_v18, 0.0  ;;  %v2561_v6 = vmax.f32 %v2529_v27, 0.0  ;;  %v973_v3 = vadd.f32 %v957_v33, %v877_v23  ;;  %v818_v8 = vpop.permute.xlu1 %817  ;;  %v6093_v23 = vld [vmem:[#allocation25_spill] sm:$0xff]  ;;  %v6095_v54 = vld [vmem:[#allocation16_spill] sm:$0xff]  ;;  %v6096_v18 = vld [vmem:[#allocation18_spill] sm:$0xff] }
 0x165   : > { %v2391_v52 = vadd.f32 %v6086_v60, %v2291_v11  ;;  %v2392_v46 = vadd.f32 %v6087_v36, %v2292_v1  ;;  %v2092_v14 = vadd.f32 %v6088_v26, %v1992_v57  ;;  %v2261_v39 = vmul.f32 %v4503_v4, %v4823_v5  ;;  %v6097_v33 = vld [vmem:[#allocation17_spill] sm:$0xff] }
 0x166   : > { %v2093_v24 = vadd.f32 %v6089_v20, %v1993_v42  ;;  %v2592_v12 = vpack.c.bf16 %v2561_v6, %v2560_v35  ;;  %v1017_v9 = vrot.slane %v973_v3, %v6090_v50  ;;  %v1153_v58 = vrot.slane %v973_v3, %v6091_v48  ;;  %v4843_v11 = vld [vmem:[#allocation2 + $0x68] sm:$0xff] }
 0x167   : > { %v1289_v59 = vrot.slane %v973_v3, %v6092_v28  ;;  %v1425_v0 = vrot.slane %v973_v3, %v6093_v23  ;;  %v2491_v32 = vadd.f32 %v2459_v16, %v2391_v52  ;;  %v2492_v44 = vadd.f32 %v2460_v53, %v2392_v46  ;;  %v6098_v1 = vld [vmem:[#allocation29_spill] sm:$0xff] }
 0x168   : > { %v862_v30 = vmul.f32 %v818_v8, %v6080_v45  ;;  %3465 = vmatprep.mubr.bf16.mxu1 %v2592_v12  ;;  %v1068_v7 = vmul.f32 %v1017_v9, %v6094_v61  ;;  %v1069_v62 = vmul.f32 %v1017_v9, %v6095_v54  ;;  %v1204_v27 = vmul.f32 %v1153_v58, %v6096_v18  ;;  %v4855_v8 = vld [vmem:[#allocation2 + $0x6a] sm:$0xff] }
 0x169   : > { %v1205_v41 = vmul.f32 %v1153_v58, %v6097_v33  ;;  %v1340_v31 = vmul.f32 %v1289_v59, %v6098_v1  ;;  %v1341_v57 = vmul.f32 %v1289_v59, %v4557_v43  ;;  %v1476_v16 = vmul.f32 %v1425_v0, %v4587_v29  ;;  %v726_v52 = vpop.permute.xlu1 %725  ;;  %v4853_v59 = vld [vmem:[#allocation2 + $0x62] sm:$0xff] }
 0x16a   : > { %v1477_v53 = vmul.f32 %v1425_v0, %v4599_v55  ;;  %v1236_v42 = vadd.f32 %v1204_v27, %v1068_v7  ;;  %v2530_v6 = vadd.f32 %v4806_v37, %v2491_v32  ;;  %v2531_v3 = vadd.f32 %v4806_v37, %v2492_v44 }
 0x16b   : > { %v1237_v35 = vadd.f32 %v1205_v41, %v1069_v62  ;;  %v878_v60 = vadd.f32 %v862_v30, %v782_v51  ;;  %v2192_v36 = vadd.f32 %v2160_v17, %v2092_v14  ;;  %v2193_v46 = vadd.f32 %v2161_v25, %v2093_v24  ;;  %v6099_v51 = vld [vmem:[#allocation28_spill] sm:$0xff]  ;;  %v6100_v30 = vld [vmem:[#allocation38_spill] sm:$0xff] }
 0x16c   : > { %v2262_v26 = vmul.f32 %v4503_v4, %v4843_v11  ;;  %v1372_v20 = vadd.f32 %v1340_v31, %v1236_v42  ;;  %v2562_v9 = vmax.f32 %v2530_v6, 0.0  ;;  %v2563_v58 = vmax.f32 %v2531_v3, 0.0  ;;  %v6102_v42 = vld [vmem:[#allocation45_spill] sm:$0xff] }
 0x16d   : > { %v1373_v12 = vadd.f32 %v1341_v57, %v1237_v35  ;;  %v767_v0 = vmul.f32 %v726_v52, %v4425_v38  ;;  %v2293_v32 = vadd.f32 %v2261_v39, %v2192_v36  ;;  %v2361_v44 = vmul.f32 %v6099_v51, %v4752_v15 }
 0x16e   : > { %v2294_v7 = vadd.f32 %v2262_v26, %v2193_v46  ;;  %v4860_v17 = vadd.f32 %v1476_v16, %v1372_v20  ;;  %v2593_v14 = vpack.c.bf16 %v2563_v58, %v2562_v9  ;;  %v2362_v24 = vmul.f32 %v6099_v51, %v4754_v21  ;;  %v914_v57 = vpop.permute.xlu1 %913  ;;  %v6103_v20 = vld [vmem:[#allocation46_spill] sm:$0xff] }
 0x16f   : > { %v4862_v25 = vadd.f32 %v1477_v53, %v1373_v12  ;;  %v783_v62 = vadd.f32 %v767_v0, %v6100_v30  ;;  %v2393_v27 = vadd.f32 %v2361_v44, %v2293_v32  ;;  %v2461_v41 = vmul.f32 %v4526_v13, %v4853_v59  ;;  %v6101_v53 = vld [vmem:[#allocation50_spill] sm:$0xff] }
 0x170   : > { %v2462_v39 = vmul.f32 %v4526_v13, %v4855_v8  ;;  %1595 = vst [vmem:[#allocation2 + $0x91] sm:$0xff] %v4860_v17  ;;  %3466 = vmatmul.mubr.bf16.vlgmr.msra.gmra.mrb[0].mxu1 %v2593_v14  ;;  %v2394_v31 = vadd.f32 %v2362_v24, %v2294_v7  ;;  %v1663_v16 = vmul.f32 %v4762_v34, %v4439_v47  ;;  %v6104_v58 = vld [vmem:[#allocation30_spill] sm:$0xff] }
 0x171   : > { %1596 = vst [vmem:[#allocation2 + $0x99] sm:$0xff] %v4862_v25  ;;  %v1794_v35 = vadd.f32 %v6102_v42, %v6101_v53  ;;  %v1862_v6 = vmul.f32 %v4764_v22, %v6079_v10  ;;  %v879_v3 = vadd.f32 %v4791_v19, %v783_v62  ;;  %v2493_v52 = vadd.f32 %v2461_v41, %v2393_v27 }
 0x172   : > { %v958_v36 = vmul.f32 %v914_v57, %v6083_v63  ;;  %v1863_v46 = vmul.f32 %v4775_v49, %v6079_v10  ;;  %v2494_v26 = vadd.f32 %v2462_v39, %v2394_v31  ;;  %v1795_v12 = vadd.f32 %v6103_v20, %v1663_v16  ;;  %v6105_v49 = vld [vmem:[#allocation26_spill] sm:$0xff] }
 0x173   : > { %v1894_v9 = vadd.f32 %v1862_v6, %v1794_v35  ;;  %v1962_v34 = vmul.f32 %v4823_v5, %v4500_v56  ;;  %v975_v0 = vadd.f32 %v6104_v58, %v879_v3  ;;  %v2532_v32 = vadd.f32 %v4806_v37, %v2493_v52  ;;  %v4897_v41 = vpop.permute.xlu1 %633 }
 0x174   : > { %v974_v22 = vadd.f32 %v958_v36, %v878_v60  ;;  %v1963_v19 = vmul.f32 %v4843_v11, %v4500_v56  ;;  %v2533_v63 = vadd.f32 %v4806_v37, %v2494_v26  ;;  %v1895_v7 = vadd.f32 %v1863_v46, %v1795_v12 }
 0x175   : > { %v1994_v44 = vadd.f32 %v1962_v34, %v1894_v9  ;;  %v2062_v14 = vmul.f32 %v6105_v49, %v4752_v15  ;;  %v1025_v24 = vrot.slane %v975_v0, %v6090_v50  ;;  %v1161_v30 = vrot.slane %v975_v0, %v6091_v48 }
 0x176   : > { %v1297_v62 = vrot.slane %v975_v0, %v6092_v28  ;;  %v1433_v27 = vrot.slane %v975_v0, %v6093_v23  ;;  %v2564_v60 = vmax.f32 %v2532_v32, 0.0  ;;  %v2565_v39 = vmax.f32 %v2533_v63, 0.0 }
 0x177   : > { %v1021_v31 = vrot.slane %v974_v22, %v6090_v50  ;;  %v1157_v57 = vrot.slane %v974_v22, %v6091_v48  ;;  %v1072_v16 = vmul.f32 %v1025_v24, %v6094_v61  ;;  %v1073_v53 = vmul.f32 %v1025_v24, %v6095_v54 }
 0x178   : > { %v1208_v42 = vmul.f32 %v1161_v30, %v6096_v18  ;;  %v1209_v35 = vmul.f32 %v1161_v30, %v6097_v33  ;;  %v1344_v6 = vmul.f32 %v1297_v62, %v6098_v1  ;;  %v1345_v3 = vmul.f32 %v1297_v62, %v4557_v43  ;;  %v730_v32 = vpop.permute.xlu1 %729 }
 0x179   : > { %v1480_v52 = vmul.f32 %v1433_v27, %v4587_v29  ;;  %v1481_v36 = vmul.f32 %v1433_v27, %v4599_v55  ;;  %v2594_v20 = vpack.c.bf16 %v2565_v39, %v2564_v60  ;;  %v1070_v12 = vmul.f32 %v1021_v31, %v6094_v61 }
 0x17a   : > { %v1240_v46 = vadd.f32 %v1208_v42, %v1072_v16  ;;  %v1241_v26 = vadd.f32 %v1209_v35, %v1073_v53  ;;  %v1071_v9 = vmul.f32 %v1021_v31, %v6095_v54  ;;  %v1206_v34 = vmul.f32 %v1157_v57, %v6096_v18  ;;  %v4917_v31 = vld [vmem:[#allocation2 + $0x78] sm:$0xff]  ;;  %v4919_v53 = vld [vmem:[#allocation2 + $0x80] sm:$0xff] }
 0x17b   : > { %v1207_v58 = vmul.f32 %v1157_v57, %v6097_v33  ;;  %v1293_v0 = vrot.slane %v974_v22, %v6092_v28  ;;  %3469 = vmatprep.mubr.bf16.mxu1 %v2594_v20  ;;  %v1429_v30 = vrot.slane %v974_v22, %v6093_v23  ;;  %v1995_v62 = vadd.f32 %v1963_v19, %v1895_v7  ;;  %v4927_v22 = vld [vmem:[#allocation2 + $0x79] sm:$0xff] }
 0x17c   : > { %v1376_v63 = vadd.f32 %v1344_v6, %v1240_v46  ;;  %v1377_v24 = vadd.f32 %v1345_v3, %v1241_v26  ;;  %v1238_v27 = vadd.f32 %v1206_v34, %v1070_v12  ;;  %v2063_v3 = vmul.f32 %v6105_v49, %v4754_v21  ;;  %v4931_v26 = vld [vmem:[#allocation2 + $0x81] sm:$0xff] }
 0x17d   : > { %v1239_v16 = vadd.f32 %v1207_v58, %v1071_v9  ;;  %v1342_v60 = vmul.f32 %v1293_v0, %v6098_v1  ;;  %v1343_v39 = vmul.f32 %v1293_v0, %v4557_v43  ;;  %v1478_v35 = vmul.f32 %v1429_v30, %v4587_v29  ;;  %v4933_v20 = vld [vmem:[#allocation2 + $0x7a] sm:$0xff] }
 0x17e   : > { %v4921_v57 = vadd.f32 %v1480_v52, %v1376_v63  ;;  %v4923_v42 = vadd.f32 %v1481_v36, %v1377_v24  ;;  %v1479_v6 = vmul.f32 %v1429_v30, %v4599_v55  ;;  %v2094_v46 = vadd.f32 %v2062_v14, %v1994_v44  ;;  %v4935_v52 = vld [vmem:[#allocation2 + $0x82] sm:$0xff]  ;;  %v826_v14 = vpop.permute.xlu1 %825 }
 0x17f   : > { %v1374_v19 = vadd.f32 %v1342_v60, %v1238_v27  ;;  %v1375_v7 = vadd.f32 %v1343_v39, %v1239_v16  ;;  %v2162_v36 = vmul.f32 %v4853_v59, %v4515_v2  ;;  %v2163_v12 = vmul.f32 %v4855_v8, %v4515_v2 }
 0x180   : > { %6106 = vst [vmem:[#allocation24_spill] sm:$0xff] %v4921_v57  ;;  %6107 = vst [vmem:[#allocation20_spill] sm:$0xff] %v4923_v42  ;;  %v2263_v9 = vmul.f32 %v4503_v4, %v4917_v31  ;;  %v2264_v44 = vmul.f32 %v4503_v4, %v4919_v53  ;;  %v2095_v0 = vadd.f32 %v2063_v3, %v1995_v62  ;;  %v6108_v3 = vld [vmem:[#allocation23_spill] sm:$0xff] }
 0x181   : > { %1599 = vst [vmem:[#allocation2 + $0xc1] sm:$0xff] %v4921_v57  ;;  %1600 = vst [vmem:[#allocation2 + $0xc9] sm:$0xff] %v4923_v42  ;;  %v4947_v34 = vadd.f32 %v1478_v35, %v1374_v19  ;;  %v4949_v58 = vadd.f32 %v1479_v6, %v1375_v7  ;;  %v2363_v63 = vmul.f32 %v6099_v51, %v4927_v22 }
 0x182   : > { %v2194_v24 = vadd.f32 %v2162_v36, %v2094_v46  ;;  %v2364_v30 = vmul.f32 %v6099_v51, %v4931_v26  ;;  %v2463_v27 = vmul.f32 %v4526_v13, %v4933_v20  ;;  %v2464_v16 = vmul.f32 %v4526_v13, %v4935_v52 }
 0x183   : > { %1597 = vst [vmem:[#allocation2 + $0xa9] sm:$0xff] %v4947_v34  ;;  %1598 = vst [vmem:[#allocation2 + $0xb1] sm:$0xff] %v4949_v58  ;;  %v2195_v60 = vadd.f32 %v2163_v12, %v2095_v0  ;;  %v672_v62 = vmul.f32 %v4897_v41, %v4430_v40  ;;  %v768_v39 = vmul.f32 %v730_v32, %v4425_v38  ;;  %v638_v12 = vpop.permute.xlu1 %637 }
 0x184   : > { %v864_v35 = vmul.f32 %v826_v14, %v6080_v45  ;;  %v2295_v6 = vadd.f32 %v2263_v9, %v2194_v24  ;;  %v1664_v19 = vmul.f32 %v4823_v5, %v4439_v47  ;;  %v1665_v7 = vmul.f32 %v4843_v11, %v4439_v47 }
 0x185   : > { %v1764_v46 = vmul.f32 %v6108_v3, %v4752_v15  ;;  %v2296_v36 = vadd.f32 %v2264_v44, %v2195_v60  ;;  %v784_v42 = vadd.f32 %v768_v39, %v672_v62  ;;  %v1765_v41 = vmul.f32 %v6108_v3, %v4754_v21  ;;  %v834_v44 = vpop.permute.xlu0 %833  ;;  %v6109_v60 = vld [vmem:[#allocation34_spill] sm:$0xff] }
 0x186   : > { %v1864_v38 = vmul.f32 %v4853_v59, %v6079_v10  ;;  %v2395_v45 = vadd.f32 %v2363_v63, %v2295_v6  ;;  %v673_v32 = vmul.f32 %v638_v12, %v4430_v40  ;;  %v1865_v5 = vmul.f32 %v4855_v8, %v6079_v10  ;;  %v4983_v63 = vld [vmem:[#allocation2 + $0x90] sm:$0xff]  ;;  %v4985_v40 = vld [vmem:[#allocation2 + $0x98] sm:$0xff] }
 0x187   : > { %v1796_v9 = vadd.f32 %v1764_v46, %v1664_v19  ;;  %v2396_v11 = vadd.f32 %v2364_v30, %v2296_v36  ;;  %v880_v14 = vadd.f32 %v864_v35, %v784_v42  ;;  %v1797_v0 = vadd.f32 %v1765_v41, %v1665_v7  ;;  %v4996_v7 = vld [vmem:[#allocation2 + $0x92] sm:$0xff]  ;;  %v4998_v46 = vld [vmem:[#allocation2 + $0x9a] sm:$0xff] }
 0x188   : > { %v1964_v15 = vmul.f32 %v4917_v31, %v4500_v56  ;;  %v2495_v24 = vadd.f32 %v2463_v27, %v2395_v45  ;;  %v785_v21 = vadd.f32 %v6109_v60, %v673_v32  ;;  %v1965_v59 = vmul.f32 %v4919_v53, %v4500_v56 }
 0x189   : > { %v1896_v62 = vadd.f32 %v1864_v38, %v1796_v9  ;;  %v2496_v39 = vadd.f32 %v2464_v16, %v2396_v11  ;;  %v1897_v8 = vadd.f32 %v1865_v5, %v1797_v0  ;;  %v2064_v42 = vmul.f32 %v4927_v22, %v6105_v49  ;;  %v922_v16 = vpop.permute.xlu1 %921  ;;  %v846_v60 = vpop.permute.xlu0 %845 }
 0x18a   : > { %v2065_v30 = vmul.f32 %v4931_v26, %v6105_v49  ;;  %v2534_v27 = vadd.f32 %v4806_v37, %v2495_v24  ;;  %v2164_v6 = vmul.f32 %v4933_v20, %v4515_v2  ;;  %v2165_v19 = vmul.f32 %v4935_v52, %v4515_v2 }
 0x18b   : > { %v1996_v35 = vadd.f32 %v1964_v15, %v1896_v62  ;;  %v2535_v36 = vadd.f32 %v4806_v37, %v2496_v39  ;;  %v1997_v12 = vadd.f32 %v1965_v59, %v1897_v8  ;;  %v2265_v41 = vmul.f32 %v4503_v4, %v4983_v63  ;;  %v5014_v59 = vld [vmem:[%s4422_s19 + $0xc] sm:$0xf]  ;;  %v5018_v8 = vld [vmem:[%s4422_s19 + $0x8] sm:$0xf] }
 0x18c   : > { %v2266_v38 = vmul.f32 %v4503_v4, %v4985_v40  ;;  %v2566_v45 = vmax.f32 %v2534_v27, 0.0  ;;  %v2365_v9 = vmul.f32 %v6099_v51, %v4860_v17  ;;  %v2366_v5 = vmul.f32 %v6099_v51, %v4862_v25  ;;  %6110 = vst [vmem:[#allocation33_spill] sm:$0xff] %v5014_v59 }
 0x18d   : > { %v2096_v32 = vadd.f32 %v2064_v42, %v1996_v35  ;;  %v2567_v11 = vmax.f32 %v2535_v36, 0.0  ;;  %v2097_v0 = vadd.f32 %v2065_v30, %v1997_v12  ;;  %v2465_v15 = vmul.f32 %v4526_v13, %v4996_v7  ;;  %v830_v36 = vpop.permute.xlu1 %829 }
 0x18e   : > { %v2466_v24 = vmul.f32 %v4526_v13, %v4998_v46  ;;  %v960_v39 = vmul.f32 %v5014_v59, %v922_v16  ;;  %v5021_v42 = vmul.f32 %v5018_v8, %v834_v44  ;;  %v5024_v27 = vmul.f32 %v5018_v8, %v846_v60 }
 0x18f   : > { %v2196_v62 = vadd.f32 %v2164_v6, %v2096_v32  ;;  %v2595_v30 = vpack.c.bf16 %v2567_v11, %v2566_v45  ;;  %v2197_v35 = vadd.f32 %v2165_v19, %v2097_v0  ;;  %v1666_v12 = vmul.f32 %v4917_v31, %v4439_v47 }
 0x190   : > { %6111 = vst [vmem:[#allocation47_spill] sm:$0xff] %v5024_v27  ;;  %v1667_v6 = vmul.f32 %v4919_v53, %v4439_v47  ;;  %v976_v57 = vadd.f32 %v960_v39, %v880_v14  ;;  %v865_v16 = vmul.f32 %v5018_v8, %v830_v36  ;;  %v1766_v44 = vmul.f32 %v4927_v22, %v6108_v3 }
 0x191   : > { %v2297_v32 = vadd.f32 %v2265_v41, %v2196_v62  ;;  %3470 = vmatmul.mubr.bf16.gmra.mrb[4].mxu1 %v2595_v30  ;;  %v2298_v59 = vadd.f32 %v2266_v38, %v2197_v35  ;;  %v1767_v45 = vmul.f32 %v4931_v26, %v6108_v3  ;;  %v1866_v19 = vmul.f32 %v4933_v20, %v6079_v10 }
 0x192   : > { %v1867_v31 = vmul.f32 %v4935_v52, %v6079_v10  ;;  %v1029_v53 = vrot.slane %v976_v57, %v6090_v50  ;;  %v1165_v14 = vrot.slane %v976_v57, %v6091_v48  ;;  %v1301_v41 = vrot.slane %v976_v57, %v6092_v28 }
 0x193   : > { %v2397_v11 = vadd.f32 %v2365_v9, %v2297_v32  ;;  %v2398_v0 = vadd.f32 %v2366_v5, %v2298_v59  ;;  %v1437_v22 = vrot.slane %v976_v57, %v6093_v23  ;;  %v5043_v38 = vadd.f32 %v865_v16, %v785_v21  ;;  %v738_v9 = vpop.permute.xlu1 %737  ;;  %v5056_v32 = vld [vmem:[%s4422_s19 + $0x4] sm:$0xf] }
 0x194   : > { %v1798_v60 = vadd.f32 %v1766_v44, %v1666_v12  ;;  %v1074_v20 = vmul.f32 %v1029_v53, %v6094_v61  ;;  %v1075_v62 = vmul.f32 %v1029_v53, %v6095_v54  ;;  %v1210_v52 = vmul.f32 %v1165_v14, %v6096_v18 }
 0x195   : > { %v2497_v26 = vadd.f32 %v2465_v15, %v2397_v11  ;;  %v2498_v39 = vadd.f32 %v2466_v24, %v2398_v0  ;;  %v1211_v30 = vmul.f32 %v1165_v14, %v6097_v33  ;;  %v1346_v35 = vmul.f32 %v1301_v41, %v6098_v1 }
 0x196   : > { %v1347_v5 = vmul.f32 %v1301_v41, %v4557_v43  ;;  %v1242_v21 = vadd.f32 %v1210_v52, %v1074_v20  ;;  %v1482_v59 = vmul.f32 %v1437_v22, %v4587_v29  ;;  %v1483_v15 = vmul.f32 %v1437_v22, %v4599_v55  ;;  %v5062_v22 = vld [vmem:[#allocation2 + $0xa8] sm:$0xff] }
 0x197   : > { %v2536_v57 = vadd.f32 %v4806_v37, %v2497_v26  ;;  %v2537_v36 = vadd.f32 %v4806_v37, %v2498_v39  ;;  %v1243_v12 = vadd.f32 %v1211_v30, %v1075_v62  ;;  %v770_v24 = vmul.f32 %v5056_v32, %v738_v9  ;;  %v6112_v26 = vld [vmem:[#allocation40_spill] sm:$0xff]  ;;  %v926_v39 = vpop.permute.xlu1 %925 }
 0x198   : > { %v1799_v16 = vadd.f32 %v1767_v45, %v1667_v6  ;;  %v1378_v11 = vadd.f32 %v1346_v35, %v1242_v21  ;;  %v1898_v53 = vadd.f32 %v1866_v19, %v1798_v60  ;;  %v1966_v14 = vmul.f32 %v4983_v63, %v4500_v56  ;;  %v5070_v19 = vld [vmem:[#allocation2 + $0xb0] sm:$0xff] }
 0x199   : > { %v2568_v44 = vmax.f32 %v2536_v57, 0.0  ;;  %v2569_v41 = vmax.f32 %v2537_v36, 0.0  ;;  %v1379_v0 = vadd.f32 %v1347_v5, %v1243_v12  ;;  %v786_v20 = vadd.f32 %v770_v24, %v6112_v26  ;;  %v5072_v60 = vld [vmem:[#allocation2 + $0xaa] sm:$0xff]  ;;  %v5080_v57 = vld [vmem:[#allocation2 + $0xb2] sm:$0xff] }
 0x19a   : > { %v1899_v52 = vadd.f32 %v1867_v31, %v1799_v16  ;;  %v5064_v62 = vadd.f32 %v1482_v59, %v1378_v11  ;;  %v1967_v9 = vmul.f32 %v4985_v40, %v4500_v56  ;;  %v1998_v6 = vadd.f32 %v1966_v14, %v1898_v53 }
 0x19b   : > { %v2066_v45 = vmul.f32 %v6105_v49, %v4860_v17  ;;  %v2596_v30 = vpack.c.bf16 %v2569_v41, %v2568_v44  ;;  %v5074_v35 = vadd.f32 %v1483_v15, %v1379_v0  ;;  %v2067_v31 = vmul.f32 %v6105_v49, %v4862_v25  ;;  %v930_v15 = vpop.permute.xlu0 %929  ;;  %v5099_v26 = vpop.permute.xlu1 %645 }
 0x19c   : > { %v2166_v5 = vmul.f32 %v4996_v7, %v4515_v2  ;;  %1601 = vst [vmem:[#allocation2 + $0xd9] sm:$0xff] %v5064_v62  ;;  %v1999_v21 = vadd.f32 %v1967_v9, %v1899_v52  ;;  %v2167_v36 = vmul.f32 %v4998_v46, %v4515_v2  ;;  %v2267_v12 = vmul.f32 %v4503_v4, %v5062_v22  ;;  %v6113_v52 = vld [vmem:[#allocation33_spill] sm:$0xff] }
 0x19d   : > { %v2098_v59 = vadd.f32 %v2066_v45, %v1998_v6  ;;  %3473 = vmatprep.mubr.bf16.mxu1 %v2596_v30  ;;  %1602 = vst [vmem:[#allocation2 + $0xe1] sm:$0xff] %v5074_v35  ;;  %v2268_v24 = vmul.f32 %v4503_v4, %v5070_v19  ;;  %v2367_v16 = vmul.f32 %v6099_v51, %v4947_v34 }
 0x19e   : > { %v2368_v44 = vmul.f32 %v6099_v51, %v4949_v58  ;;  %v2467_v11 = vmul.f32 %v4526_v13, %v5072_v60  ;;  %v2099_v53 = vadd.f32 %v2067_v31, %v1999_v21  ;;  %v2468_v41 = vmul.f32 %v4526_v13, %v5080_v57 }
 0x19f   : > { %v2198_v14 = vadd.f32 %v2166_v5, %v2098_v59  ;;  %v882_v0 = vadd.f32 %v5021_v42, %v786_v20  ;;  %v962_v9 = vmul.f32 %v6113_v52, %v930_v15  ;;  %v961_v6 = vmul.f32 %v6113_v52, %v926_v39 }
 0x1a0   : > { %v1668_v45 = vmul.f32 %v4983_v63, %v4439_v47  ;;  %v1669_v30 = vmul.f32 %v4985_v40, %v4439_v47  ;;  %v2199_v27 = vadd.f32 %v2167_v36, %v2099_v53  ;;  %v1768_v5 = vmul.f32 %v6108_v3, %v4860_v17 }
 0x1a1   : > { %v2299_v31 = vadd.f32 %v2267_v12, %v2198_v14  ;;  %v1769_v42 = vmul.f32 %v6108_v3, %v4862_v25  ;;  %v978_v20 = vadd.f32 %v962_v9, %v882_v0  ;;  %v977_v21 = vadd.f32 %v961_v6, %v5043_v38  ;;  %v5120_v14 = vpop.permute.xlu1 %741 }
 0x1a2   : > { %v1868_v39 = vmul.f32 %v4996_v7, %v6079_v10  ;;  %v1869_v63 = vmul.f32 %v4998_v46, %v6079_v10  ;;  %v2300_v59 = vadd.f32 %v2268_v24, %v2199_v27  ;;  %v1800_v40 = vadd.f32 %v1768_v5, %v1668_v45 }
 0x1a3   : > { %v2399_v15 = vadd.f32 %v2367_v16, %v2299_v31  ;;  %v1801_v36 = vadd.f32 %v1769_v42, %v1669_v30  ;;  %v1037_v12 = vrot.slane %v978_v20, %v6090_v50  ;;  %v1173_v17 = vrot.slane %v978_v20, %v6091_v48 }
 0x1a4   : > { %v1309_v53 = vrot.slane %v978_v20, %v6092_v28  ;;  %v1445_v25 = vrot.slane %v978_v20, %v6093_v23  ;;  %v2400_v38 = vadd.f32 %v2368_v44, %v2300_v59  ;;  %v1033_v7 = vrot.slane %v977_v21, %v6090_v50 }
 0x1a5   : > { %v2499_v0 = vadd.f32 %v2467_v11, %v2399_v15  ;;  %v1169_v46 = vrot.slane %v977_v21, %v6091_v48  ;;  %v1078_v27 = vmul.f32 %v1037_v12, %v6094_v61  ;;  %v1079_v24 = vmul.f32 %v1037_v12, %v6095_v54 }
 0x1a6   : > { %v1214_v16 = vmul.f32 %v1173_v17, %v6096_v18  ;;  %v1215_v9 = vmul.f32 %v1173_v17, %v6097_v33  ;;  %v2500_v6 = vadd.f32 %v2468_v41, %v2400_v38  ;;  %v1350_v30 = vmul.f32 %v1309_v53, %v6098_v1  ;;  %v838_v41 = vpop.permute.xlu1 %837 }
 0x1a7   : > { %v2538_v45 = vadd.f32 %v4806_v37, %v2499_v0  ;;  %v1351_v44 = vmul.f32 %v1309_v53, %v4557_v43  ;;  %v1486_v5 = vmul.f32 %v1445_v25, %v4587_v29  ;;  %v1487_v42 = vmul.f32 %v1445_v25, %v4599_v55 }
 0x1a8   : > { %v1246_v11 = vadd.f32 %v1214_v16, %v1078_v27  ;;  %v1247_v31 = vadd.f32 %v1215_v9, %v1079_v24  ;;  %v2539_v20 = vadd.f32 %v4806_v37, %v2500_v6  ;;  %v1076_v15 = vmul.f32 %v1033_v7, %v6094_v61 }
 0x1a9   : > { %v2570_v59 = vmax.f32 %v2538_v45, 0.0  ;;  %v1077_v12 = vmul.f32 %v1033_v7, %v6095_v54  ;;  %v1212_v0 = vmul.f32 %v1169_v46, %v6096_v18  ;;  %v1213_v53 = vmul.f32 %v1169_v46, %v6097_v33 }
 0x1aa   : > { %v1382_v17 = vadd.f32 %v1350_v30, %v1246_v11  ;;  %v1383_v38 = vadd.f32 %v1351_v44, %v1247_v31  ;;  %v2571_v27 = vmax.f32 %v2539_v20, 0.0  ;;  %v1305_v24 = vrot.slane %v977_v21, %v6092_v28  ;;  %v5154_v31 = vld [vmem:[#allocation2 + $0xc0] sm:$0xff] }
 0x1ab   : > { %v1441_v16 = vrot.slane %v977_v21, %v6093_v23  ;;  %v1900_v25 = vadd.f32 %v1868_v39, %v1800_v40  ;;  %v1244_v45 = vadd.f32 %v1212_v0, %v1076_v15  ;;  %v1245_v61 = vadd.f32 %v1213_v53, %v1077_v12  ;;  %v5166_v0 = vld [vmem:[#allocation2 + $0xc2] sm:$0xff]  ;;  %v5168_v53 = vld [vmem:[#allocation2 + $0xca] sm:$0xff] }
 0x1ac   : > { %v5140_v9 = vadd.f32 %v1486_v5, %v1382_v17  ;;  %v5142_v6 = vadd.f32 %v1487_v42, %v1383_v38  ;;  %v2597_v7 = vpack.c.bf16 %v2571_v27, %v2570_v59  ;;  %v1348_v30 = vmul.f32 %v1305_v24, %v6098_v1  ;;  %v5156_v5 = vld [vmem:[#allocation2 + $0xc8] sm:$0xff]  ;;  %v650_v42 = vpop.permute.xlu1 %649 }
 0x1ad   : > { %v1349_v44 = vmul.f32 %v1305_v24, %v4557_v43  ;;  %v1484_v11 = vmul.f32 %v1441_v16, %v4587_v29  ;;  %v1485_v21 = vmul.f32 %v1441_v16, %v4599_v55  ;;  %v1901_v39 = vadd.f32 %v1869_v63, %v1801_v36 }
 0x1ae   : > { %6114 = vst [vmem:[#allocation21_spill] sm:$0xff] %v5140_v9  ;;  %6115 = vst [vmem:[#allocation48_spill] sm:$0xff] %v5142_v6  ;;  %v1968_v40 = vmul.f32 %v5062_v22, %v4500_v56  ;;  %v1969_v46 = vmul.f32 %v5070_v19, %v4500_v56  ;;  %3474 = vmatmul.mubr.bf16.gmra.mrb[8].mxu1 %v2597_v7  ;;  %v1380_v20 = vadd.f32 %v1348_v30, %v1244_v45  ;;  %v6118_v7 = vld [vmem:[#allocation24_spill] sm:$0xff] }
 0x1af   : > { %1605 = vst [vmem:[#allocation2 + $0x109] sm:$0xff] %v5140_v9  ;;  %1606 = vst [vmem:[#allocation2 + $0x111] sm:$0xff] %v5142_v6  ;;  %v1381_v59 = vadd.f32 %v1349_v44, %v1245_v61  ;;  %v2068_v15 = vmul.f32 %v6105_v49, %v4947_v34  ;;  %v2069_v63 = vmul.f32 %v6105_v49, %v4949_v58  ;;  %v6119_v44 = vld [vmem:[#allocation20_spill] sm:$0xff] }
 0x1b0   : > { %v2000_v36 = vadd.f32 %v1968_v40, %v1900_v25  ;;  %v2001_v12 = vadd.f32 %v1969_v46, %v1901_v39  ;;  %v2168_v17 = vmul.f32 %v5072_v60, %v4515_v2  ;;  %v2169_v38 = vmul.f32 %v5080_v57, %v4515_v2  ;;  %v5189_v40 = vld [vmem:[%s4422_s19] sm:$0xf] }
 0x1b1   : > { %v5170_v61 = vadd.f32 %v1484_v11, %v1380_v20  ;;  %v5172_v27 = vadd.f32 %v1485_v21, %v1381_v59  ;;  %v2269_v24 = vmul.f32 %v4503_v4, %v5154_v31  ;;  %v2270_v16 = vmul.f32 %v4503_v4, %v5156_v5  ;;  %6120 = vst [vmem:[#allocation41_spill] sm:$0xff] %v5189_v40  ;;  %v934_v59 = vpop.permute.xlu1 %933 }
 0x1b2   : > { %v2100_v25 = vadd.f32 %v2068_v15, %v2000_v36  ;;  %v2101_v45 = vadd.f32 %v2069_v63, %v2001_v12  ;;  %v2369_v30 = vmul.f32 %v6099_v51, %v6118_v7  ;;  %v2370_v39 = vmul.f32 %v6099_v51, %v6119_v44 }
 0x1b3   : > { %6116 = vst [vmem:[#allocation49_spill] sm:$0xff] %v5170_v61  ;;  %6117 = vst [vmem:[#allocation39_spill] sm:$0xff] %v5172_v27  ;;  %v2469_v11 = vmul.f32 %v4526_v13, %v5166_v0  ;;  %v2470_v21 = vmul.f32 %v4526_v13, %v5168_v53  ;;  %v675_v46 = vmul.f32 %v5189_v40, %v5099_v26 }
 0x1b4   : > { %1603 = vst [vmem:[#allocation2 + $0xf1] sm:$0xff] %v5170_v61  ;;  %1604 = vst [vmem:[#allocation2 + $0xf9] sm:$0xff] %v5172_v27  ;;  %v771_v20 = vmul.f32 %v5056_v32, %v5120_v14  ;;  %v2200_v15 = vadd.f32 %v2168_v17, %v2100_v25  ;;  %v2201_v63 = vadd.f32 %v2169_v38, %v2101_v45  ;;  %v6121_v14 = vld [vmem:[#allocation37_spill] sm:$0xff] }
 0x1b5   : > { %v867_v36 = vmul.f32 %v5018_v8, %v838_v41  ;;  %v676_v12 = vmul.f32 %v5189_v40, %v650_v42  ;;  %v1670_v9 = vmul.f32 %v5062_v22, %v4439_v47  ;;  %v1671_v27 = vmul.f32 %v5070_v19, %v4439_v47  ;;  %v1737_v40 = vld [vmem:[#allocation2 + $0xc9] sm:$0xff] }
 0x1b6   : > { %v787_v6 = vadd.f32 %v771_v20, %v675_v46  ;;  %v1770_v26 = vmul.f32 %v6108_v3, %v4947_v34  ;;  %v2301_v61 = vadd.f32 %v2269_v24, %v2200_v15  ;;  %v2302_v55 = vadd.f32 %v2270_v16, %v2201_v63  ;;  %v5212_v24 = vld [vmem:[#allocation2 + $0xd8] sm:$0xff]  ;;  %v5214_v16 = vld [vmem:[#allocation2 + $0xe0] sm:$0xff] }
 0x1b7   : > { %v788_v29 = vadd.f32 %v6121_v14, %v676_v12  ;;  %v1771_v17 = vmul.f32 %v6108_v3, %v4949_v58  ;;  %v1870_v42 = vmul.f32 %v5072_v60, %v6079_v10  ;;  %v1871_v22 = vmul.f32 %v5080_v57, %v6079_v10  ;;  %v842_v58 = vpop.permute.xlu1 %841  ;;  %v5226_v46 = vld [vmem:[#allocation2 + $0xe2] sm:$0xff] }
 0x1b8   : > { %v883_v41 = vadd.f32 %v867_v36, %v787_v6  ;;  %v1802_v38 = vadd.f32 %v1770_v26, %v1670_v9  ;;  %v2401_v25 = vadd.f32 %v2369_v30, %v2301_v61  ;;  %v2402_v19 = vadd.f32 %v2370_v39, %v2302_v55  ;;  %v5224_v39 = vld [vmem:[#allocation2 + $0xda] sm:$0xff] }
 0x1b9   : > { %v1803_v45 = vadd.f32 %v1771_v17, %v1671_v27  ;;  %v1970_v34 = vmul.f32 %v5154_v31, %v4500_v56  ;;  %v1971_v60 = vmul.f32 %v5156_v5, %v4500_v56  ;;  %v2070_v57 = vmul.f32 %v6105_v49, %v6118_v7  ;;  %6122 = vst [vmem:[#allocation42_spill] sm:$0xff] %v5224_v39  ;;  %v2854_v14 = vld [vmem:[%s4192_s26 + $0x70] sm:$0xff]  ;;  %v2855_v17 = vld [vmem:[%s4192_s26 + $0x78] sm:$0xff] }
 0x1ba   : > { %v1902_v9 = vadd.f32 %v1870_v42, %v1802_v38  ;;  %v2071_v55 = vmul.f32 %v6105_v49, %v6119_v44  ;;  %v2501_v6 = vadd.f32 %v2469_v11, %v2401_v25  ;;  %v2502_v61 = vadd.f32 %v2470_v21, %v2402_v19  ;;  %v2852_v11 = vld [vmem:[%s4192_s26 + $0x60] sm:$0xff]  ;;  %v2853_v21 = vld [vmem:[%s4192_s26 + $0x68] sm:$0xff] }
 0x1bb   : > { %v1903_v27 = vadd.f32 %v1871_v22, %v1803_v45  ;;  %v2170_v30 = vmul.f32 %v5166_v0, %v4515_v2  ;;  %v2171_v15 = vmul.f32 %v5168_v53, %v4515_v2  ;;  %v2271_v7 = vmul.f32 %v4503_v4, %v5212_v24  ;;  %v750_v19 = vpop.permute.xlu1 %749 }
 0x1bc   : > { %v2002_v20 = vadd.f32 %v1970_v34, %v1902_v9  ;;  %v2272_v44 = vmul.f32 %v4503_v4, %v5214_v16  ;;  %v2540_v63 = vadd.f32 %v4806_v37, %v2501_v6  ;;  %v2541_v36 = vadd.f32 %v4806_v37, %v2502_v61 }
 0x1bd   : > { %v2003_v12 = vadd.f32 %v1971_v60, %v1903_v27  ;;  %v2371_v26 = vmul.f32 %v6099_v51, %v5064_v62  ;;  %v2372_v42 = vmul.f32 %v6099_v51, %v5074_v35  ;;  %v2471_v22 = vmul.f32 %v4526_v13, %v5224_v39 }
 0x1be   : > { %v2102_v38 = vadd.f32 %v2070_v57, %v2002_v20  ;;  %v2472_v25 = vmul.f32 %v4526_v13, %v5226_v46  ;;  %v2572_v45 = vmax.f32 %v2540_v63, 0.0  ;;  %v2573_v34 = vmax.f32 %v2541_v36, 0.0  ;;  %v1736_v20 = vld [vmem:[#allocation2 + $0xc1] sm:$0xff] }
 0x1bf   : > { %v2103_v9 = vadd.f32 %v2071_v55, %v2003_v12  ;;  %v2878_v60 = vpack.c.bf16 %v2853_v21, %v2852_v11  ;;  %v963_v61 = vmul.f32 %v6113_v52, %v934_v59  ;;  %v2879_v27 = vpack.c.bf16 %v2855_v17, %v2854_v14  ;;  %v6123_v11 = vld [vmem:[#allocation44_spill] sm:$0xff] }
 0x1c0   : > { %v2202_v6 = vadd.f32 %v2170_v30, %v2102_v38  ;;  %v868_v57 = vmul.f32 %v5018_v8, %v842_v58  ;;  %v2598_v51 = vpack.c.bf16 %v2573_v34, %v2572_v45  ;;  %v773_v39 = vmul.f32 %v5056_v32, %v750_v19 }
 0x1c1   : > { %v2203_v4 = vadd.f32 %v2171_v15, %v2103_v9  ;;  %3517 = vmatprep.mubr.msk.bf16.mxu0 %vm2927_vm0, %v2878_v60  ;;  %v1672_v63 = vmul.f32 %v5154_v31, %v4439_v47  ;;  %v979_v55 = vadd.f32 %v963_v61, %v883_v41  ;;  %v1673_v59 = vmul.f32 %v5156_v5, %v4439_v47  ;;  %v6125_v60 = vld [vmem:[#allocation35_spill] sm:$0xff]  ;;  %v6126_v61 = vld [vmem:[#allocation36_spill] sm:$0xff] }
 0x1c2   : > { %v2303_v36 = vadd.f32 %v2271_v7, %v2202_v6  ;;  %3518 = vmatmul.mubr.msk.bf16.gmra.mrb[12].mxu0 %vm2927_vm0, %v2879_v27  ;;  %v5255_v30 = vadd.f32 %v868_v57, %v788_v29  ;;  %3477 = vmatprep.mubr.bf16.mxu1 %v2598_v51  ;;  %v5260_v15 = vadd.f32 %v773_v39, %v6123_v11  ;;  %v5286_v11 = vpop.f32.mrb[0].mxu0 }
 0x1c3   : > { %v2304_v58 = vadd.f32 %v2272_v44, %v2203_v4  ;;  %v1772_v21 = vmul.f32 %v6108_v3, %v1736_v20  ;;  %v1773_v12 = vmul.f32 %v6108_v3, %v1737_v40  ;;  %v1041_v31 = vrot.slane %v979_v55, %v6090_v50  ;;  %v6124_v44 = vld [vmem:[#allocation32_spill] sm:$0xff]  ;;  %6127 = vst [vmem:[#allocation43_spill] sm:$0xff] %v5286_v11 }
 0x1c4   : > { %v2403_v14 = vadd.f32 %v2371_v26, %v2303_v36  ;;  %v1177_v41 = vrot.slane %v979_v55, %v6091_v48  ;;  %v1313_v29 = vrot.slane %v979_v55, %v6092_v28  ;;  %v1449_v17 = vrot.slane %v979_v55, %v6093_v23 }
 0x1c5   : > { %v2404_v7 = vadd.f32 %v2372_v42, %v2304_v58  ;;  %v1804_v5 = vadd.f32 %v1772_v21, %v1672_v63  ;;  %v1805_v51 = vadd.f32 %v1773_v12, %v1673_v59  ;;  %v1080_v39 = vmul.f32 %v1041_v31, %v6124_v44  ;;  %v938_v63 = vpop.permute.xlu1 %937 }
 0x1c6   : > { %v2503_v4 = vadd.f32 %v2471_v22, %v2403_v14  ;;  %v1081_v38 = vmul.f32 %v1041_v31, %v6095_v54  ;;  %v1216_v19 = vmul.f32 %v1177_v41, %v6096_v18  ;;  %v1217_v26 = vmul.f32 %v1177_v41, %v6097_v33  ;;  %v5288_v31 = vld [vmem:[#allocation2 + $0xf0] sm:$0xff] }
 0x1c7   : > { %v2504_v40 = vadd.f32 %v2472_v25, %v2404_v7  ;;  %v1352_v45 = vmul.f32 %v1313_v29, %v6098_v1  ;;  %v1353_v34 = vmul.f32 %v1313_v29, %v4557_v43  ;;  %v1488_v6 = vmul.f32 %v1449_v17, %v6125_v60  ;;  %v6128_v7 = vld [vmem:[#allocation42_spill] sm:$0xff] }
 0x1c8   : > { %v2542_v42 = vadd.f32 %v4806_v37, %v2503_v4  ;;  %v1248_v9 = vadd.f32 %v1216_v19, %v1080_v39  ;;  %v1489_v22 = vmul.f32 %v1449_v17, %v6126_v61  ;;  %v1249_v57 = vadd.f32 %v1217_v26, %v1081_v38  ;;  %v5300_v4 = vld [vmem:[#allocation2 + $0xf2] sm:$0xff]  ;;  %v5304_v19 = vld [vmem:[#allocation2 + $0xfa] sm:$0xff] }
 0x1c9   : > { %v2543_v27 = vadd.f32 %v4806_v37, %v2504_v40  ;;  %v1872_v20 = vmul.f32 %v5166_v0, %v6079_v10  ;;  %v1873_v25 = vmul.f32 %v5168_v53, %v6079_v10  ;;  %v1972_v59 = vmul.f32 %v5212_v24, %v4500_v56  ;;  %v5290_v0 = vld [vmem:[#allocation2 + $0xf8] sm:$0xff]  ;;  %v942_v40 = vpop.permute.xlu0 %941 }
 0x1ca   : > { %v2574_v36 = vmax.f32 %v2542_v42, 0.0  ;;  %v1384_v55 = vadd.f32 %v1352_v45, %v1248_v9  ;;  %v1973_v58 = vmul.f32 %v5214_v16, %v4500_v56  ;;  %v1385_v37 = vadd.f32 %v1353_v34, %v1249_v57  ;;  %v6130_v45 = vld [vmem:[#allocation27_spill] sm:$0xff]  ;;  %v6131_v9 = vld [vmem:[#allocation49_spill] sm:$0xff] }
 0x1cb   : > { %v2575_v21 = vmax.f32 %v2543_v27, 0.0  ;;  %v1904_v12 = vadd.f32 %v1872_v20, %v1804_v5  ;;  %v1905_v14 = vadd.f32 %v1873_v25, %v1805_v51  ;;  %v2072_v41 = vmul.f32 %v6105_v49, %v5064_v62  ;;  %v6133_v20 = vld [vmem:[#allocation39_spill] sm:$0xff] }
 0x1cc   : > { %v5292_v53 = vadd.f32 %v1488_v6, %v1384_v55  ;;  %v2073_v29 = vmul.f32 %v6105_v49, %v5074_v35  ;;  %v2172_v17 = vmul.f32 %v6128_v7, %v4515_v2  ;;  %v5302_v5 = vadd.f32 %v1489_v22, %v1385_v37  ;;  %v6132_v6 = vld [vmem:[#allocation28_spill] sm:$0xff]  ;;  %v5320_v55 = vpop.permute.xlu1 %657 }
 0x1cd   : > { %v2599_v39 = vpack.c.bf16 %v2575_v21, %v2574_v36  ;;  %v2004_v51 = vadd.f32 %v1972_v59, %v1904_v12  ;;  %v2005_v38 = vadd.f32 %v1973_v58, %v1905_v14  ;;  %v2173_v26 = vmul.f32 %v5226_v46, %v4515_v2  ;;  %v5322_v59 = vpop.f32.mrb[1].mxu0  ;;  %v6135_v21 = vld [vmem:[#allocation47_spill] sm:$0xff] }
 0x1ce   : > { %6129 = vst [vmem:[#allocation15_spill] sm:$0xff] %v5302_v5  ;;  %1607 = vst [vmem:[#allocation2 + $0x121] sm:$0xff] %v5292_v53  ;;  %v2273_v34 = vmul.f32 %v6130_v45, %v5288_v31  ;;  %v2274_v42 = vmul.f32 %v6130_v45, %v5290_v0  ;;  %v2373_v22 = vmul.f32 %v6132_v6, %v6131_v9 }
 0x1cf   : > { %3478 = vmatmul.mubr.bf16.gmra.mrb[12].mxu1 %v2599_v39  ;;  %1608 = vst [vmem:[#allocation2 + $0x129] sm:$0xff] %v5302_v5  ;;  %v2104_v27 = vadd.f32 %v2072_v41, %v2004_v51  ;;  %v2105_v57 = vadd.f32 %v2073_v29, %v2005_v38  ;;  %v2374_v25 = vmul.f32 %v6132_v6, %v6133_v20  ;;  %6134 = vst [vmem:[#allocation22_spill] sm:$0xff] %v5322_v59  ;;  %v5330_v41 = vpop.f32.mrb[2].mxu0 }
 0x1d0   : > { %v2473_v36 = vmul.f32 %v4526_v13, %v5300_v4  ;;  %v2474_v58 = vmul.f32 %v4526_v13, %v5304_v19  ;;  %v885_v37 = vadd.f32 %v6135_v21, %v5260_v15  ;;  %v965_v12 = vmul.f32 %v6113_v52, %v942_v40  ;;  %6136 = vst [vmem:[#allocation25_spill] sm:$0xff] %v5330_v41  ;;  %v5336_v59 = vpop.f32.mrb[3].mxu0 }
 0x1d1   : > { %v964_v14 = vmul.f32 %v6113_v52, %v938_v63  ;;  %v2204_v29 = vadd.f32 %v2172_v17, %v2104_v27  ;;  %v2205_v39 = vadd.f32 %v2173_v26, %v2105_v57  ;;  %v1674_v51 = vmul.f32 %v5212_v24, %v4439_v47  ;;  %6137 = vst [vmem:[#allocation16_spill] sm:$0xff] %v5336_v59 }
 0x1d2   : > { %v1675_v38 = vmul.f32 %v5214_v16, %v4439_v47  ;;  %v981_v11 = vadd.f32 %v965_v12, %v885_v37  ;;  %v1774_v15 = vmul.f32 %v6108_v3, %v5064_v62  ;;  %v1775_v63 = vmul.f32 %v6108_v3, %v5074_v35 }
 0x1d3   : > { %v980_v5 = vadd.f32 %v964_v14, %v5255_v30  ;;  %v2305_v40 = vadd.f32 %v2273_v34, %v2204_v29  ;;  %v2306_v17 = vadd.f32 %v2274_v42, %v2205_v39  ;;  %v1874_v26 = vmul.f32 %v6128_v7, %v6079_v10  ;;  %v5353_v42 = vpop.permute.xlu1 %753 }
 0x1d4   : > { %v1875_v24 = vmul.f32 %v5226_v46, %v6079_v10  ;;  %v1049_v16 = vrot.slane %v981_v11, %v6090_v50  ;;  %v1185_v27 = vrot.slane %v981_v11, %v6091_v48  ;;  %v1321_v30 = vrot.slane %v981_v11, %v6092_v28 }
 0x1d5   : > { %v1457_v57 = vrot.slane %v981_v11, %v6093_v23  ;;  %v2405_v62 = vadd.f32 %v2373_v22, %v2305_v40  ;;  %v2406_v21 = vadd.f32 %v2374_v25, %v2306_v17  ;;  %v1045_v35 = vrot.slane %v980_v5, %v6090_v50 }
 0x1d6   : > { %v1181_v34 = vrot.slane %v980_v5, %v6091_v48  ;;  %v1084_v7 = vmul.f32 %v1049_v16, %v6124_v44  ;;  %v1085_v46 = vmul.f32 %v1049_v16, %v6095_v54  ;;  %v1220_v37 = vmul.f32 %v1185_v27, %v6096_v18  ;;  %v5366_v16 = vld [vmem:[%s5935_s5] ss:$0 sm:$0xff] }
 0x1d7   : > { %v1221_v12 = vmul.f32 %v1185_v27, %v6097_v33  ;;  %v2505_v14 = vadd.f32 %v2473_v36, %v2405_v62  ;;  %v2506_v29 = vadd.f32 %v2474_v58, %v2406_v21  ;;  %v1356_v11 = vmul.f32 %v1321_v30, %v6098_v1  ;;  %v850_v41 = vpop.permute.xlu1 %849 }
 0x1d8   : > { %v1357_v22 = vmul.f32 %v1321_v30, %v4557_v43  ;;  %v1252_v25 = vadd.f32 %v1220_v37, %v1084_v7  ;;  %v1492_v40 = vmul.f32 %v1457_v57, %v6125_v60  ;;  %v1493_v17 = vmul.f32 %v1457_v57, %v6126_v61 }
 0x1d9   : > { %v1253_v39 = vadd.f32 %v1221_v12, %v1085_v46  ;;  %v2544_v59 = vadd.f32 %v5366_v16, %v2505_v14  ;;  %v2545_v36 = vadd.f32 %v5366_v16, %v2506_v29  ;;  %v1082_v58 = vmul.f32 %v1045_v35, %v6124_v44 }
 0x1da   : > { %v1083_v27 = vmul.f32 %v1045_v35, %v6095_v54  ;;  %v1388_v30 = vadd.f32 %v1356_v11, %v1252_v25  ;;  %v1218_v21 = vmul.f32 %v1181_v34, %v6096_v18  ;;  %v1219_v7 = vmul.f32 %v1181_v34, %v6097_v33 }
 0x1db   : > { %v1389_v62 = vadd.f32 %v1357_v22, %v1253_v39  ;;  %v2576_v57 = vmax.f32 %v2544_v59, 0.0  ;;  %v2577_v46 = vmax.f32 %v2545_v36, 0.0  ;;  %v1317_v37 = vrot.slane %v980_v5, %v6092_v28 }
 0x1dc   : > { %v1453_v12 = vrot.slane %v980_v5, %v6093_v23  ;;  %v5376_v14 = vadd.f32 %v1492_v40, %v1388_v30  ;;  %v1250_v44 = vadd.f32 %v1218_v21, %v1082_v58  ;;  %v1251_v48 = vadd.f32 %v1219_v7, %v1083_v27  ;;  %v5388_v40 = vld [vmem:[#allocation2 + $0x108] sm:$0xff] }
 0x1dd   : > { %v5378_v29 = vadd.f32 %v1493_v17, %v1389_v62  ;;  %v2600_v35 = vpack.c.bf16 %v2577_v46, %v2576_v57  ;;  %v1354_v11 = vmul.f32 %v1317_v37, %v6098_v1  ;;  %v1355_v22 = vmul.f32 %v1317_v37, %v4557_v43  ;;  %v5400_v30 = vld [vmem:[#allocation2 + $0x10a] sm:$0xff]  ;;  %v2858_v46 = vld [vmem:[%s4192_s26 + $0x90] sm:$0xff] }
 0x1de   : > { %6138 = vst [vmem:[#allocation18_spill] sm:$0xff] %v5376_v14  ;;  %v1490_v34 = vmul.f32 %v1453_v12, %v6125_v60  ;;  %1611 = vst [vmem:[#allocation2 + $0x151] sm:$0xff] %v5376_v14  ;;  %v1491_v5 = vmul.f32 %v1453_v12, %v6126_v61  ;;  %v1806_v59 = vadd.f32 %v1774_v15, %v1674_v51  ;;  %v5394_v51 = vld [vmem:[#allocation2 + $0x110] sm:$0xff]  ;;  %v2859_v37 = vld [vmem:[%s4192_s26 + $0x98] sm:$0xff]  ;;  %v662_v12 = vpop.permute.xlu1 %661 }
 0x1df   : > { %6139 = vst [vmem:[#allocation38_spill] sm:$0xff] %v5378_v29  ;;  %1612 = vst [vmem:[#allocation2 + $0x159] sm:$0xff] %v5378_v29  ;;  %v1807_v25 = vadd.f32 %v1775_v63, %v1675_v38  ;;  %v1974_v39 = vmul.f32 %v5288_v31, %v4500_v56  ;;  %3481 = vmatprep.mubr.bf16.mxu1 %v2600_v35  ;;  %v1386_v17 = vadd.f32 %v1354_v11, %v1250_v44  ;;  %v2856_v62 = vld [vmem:[%s4192_s26 + $0x80] sm:$0xff] }
 0x1e0   : > { %v1387_v36 = vadd.f32 %v1355_v22, %v1251_v48  ;;  %v1975_v58 = vmul.f32 %v5290_v0, %v4500_v56  ;;  %v2074_v27 = vmul.f32 %v6105_v49, %v6131_v9  ;;  %v1906_v38 = vadd.f32 %v1874_v26, %v1806_v59  ;;  %v5402_v48 = vld [vmem:[#allocation2 + $0x112] sm:$0xff] }
 0x1e1   : > { %v1907_v15 = vadd.f32 %v1875_v24, %v1807_v25  ;;  %v2075_v63 = vmul.f32 %v6105_v49, %v6133_v20  ;;  %v2174_v44 = vmul.f32 %v5300_v4, %v4515_v2  ;;  %v5405_v21 = vadd.f32 %v1490_v34, %v1386_v17  ;;  %v2857_v24 = vld [vmem:[%s4192_s26 + $0x88] sm:$0xff]  ;;  %v6142_v59 = vld [vmem:[#allocation21_spill] sm:$0xff]  ;;  %v6143_v25 = vld [vmem:[#allocation48_spill] sm:$0xff] }
 0x1e2   : > { %v5407_v7 = vadd.f32 %v1491_v5, %v1387_v36  ;;  %v2175_v57 = vmul.f32 %v5304_v19, %v4515_v2  ;;  %v2275_v26 = vmul.f32 %v6130_v45, %v5388_v40  ;;  %v2006_v35 = vadd.f32 %v1974_v39, %v1906_v38  ;;  %v758_v5 = vpop.permute.xlu0 %757 }
 0x1e3   : > { %6140 = vst [vmem:[#allocation50_spill] sm:$0xff] %v5405_v21  ;;  %v2007_v11 = vadd.f32 %v1975_v58, %v1907_v15  ;;  %v2276_v22 = vmul.f32 %v6130_v45, %v5394_v51  ;;  %v2375_v34 = vmul.f32 %v6132_v6, %v6142_v59  ;;  %1609 = vst [vmem:[#allocation2 + $0x139] sm:$0xff] %v5405_v21  ;;  %v6144_v58 = vld [vmem:[#allocation41_spill] sm:$0xff] }
 0x1e4   : > { %6141 = vst [vmem:[#allocation45_spill] sm:$0xff] %v5407_v7  ;;  %1610 = vst [vmem:[#allocation2 + $0x141] sm:$0xff] %v5407_v7  ;;  %v2376_v17 = vmul.f32 %v6132_v6, %v6143_v25  ;;  %v2475_v36 = vmul.f32 %v4526_v13, %v5400_v30  ;;  %v2476_v39 = vmul.f32 %v4526_v13, %v5402_v48 }
 0x1e5   : > { %v678_v38 = vmul.f32 %v6144_v58, %v5320_v55  ;;  %v2106_v15 = vadd.f32 %v2074_v27, %v2006_v35  ;;  %v2107_v29 = vadd.f32 %v2075_v63, %v2007_v11  ;;  %v2880_v14 = vpack.c.bf16 %v2857_v24, %v2856_v62 }
 0x1e6   : > { %v2881_v61 = vpack.c.bf16 %v2859_v37, %v2858_v46  ;;  %v774_v21 = vmul.f32 %v5056_v32, %v5353_v42  ;;  %v870_v7 = vmul.f32 %v5018_v8, %v850_v41  ;;  %v775_v60 = vmul.f32 %v5056_v32, %v758_v5  ;;  %v5465_v46 = vld [vmem:[#allocation2 + $0x122] sm:$0xff] }
 0x1e7   : > { %v679_v43 = vmul.f32 %v6144_v58, %v662_v12  ;;  %v2206_v1 = vadd.f32 %v2174_v44, %v2106_v15  ;;  %v2207_v33 = vadd.f32 %v2175_v57, %v2107_v29  ;;  %3521 = vmatprep.mubr.msk.bf16.mxu0 %vm2927_vm0, %v2880_v14  ;;  %v1676_v55 = vmul.f32 %v5288_v31, %v4439_v47  ;;  %v946_v44 = vpop.permute.xlu1 %945  ;;  %v950_v15 = vpop.permute.xlu0 %949 }
 0x1e8   : > { %v1677_v27 = vmul.f32 %v5290_v0, %v4439_v47  ;;  %3522 = vmatmul.mubr.msk.bf16.gmra.mrb[16].mxu0 %vm2927_vm0, %v2881_v61  ;;  %v790_v63 = vadd.f32 %v774_v21, %v678_v38  ;;  %v1776_v41 = vmul.f32 %v6108_v3, %v6131_v9  ;;  %v1777_v32 = vmul.f32 %v6108_v3, %v6133_v20  ;;  %v5459_v20 = vpop.f32.mrb[4].mxu0 }
 0x1e9   : > { %v791_v42 = vadd.f32 %v775_v60, %v679_v43  ;;  %v2307_v29 = vadd.f32 %v2275_v26, %v2206_v1  ;;  %v2308_v62 = vadd.f32 %v2276_v22, %v2207_v33  ;;  %v1876_v14 = vmul.f32 %v5300_v4, %v6079_v10  ;;  %v5451_v60 = vld [vmem:[#allocation2 + $0x120] sm:$0xff]  ;;  %v5457_v4 = vld [vmem:[#allocation2 + $0x128] sm:$0xff] }
 0x1ea   : > { %v1877_v31 = vmul.f32 %v5304_v19, %v6079_v10  ;;  %v886_v0 = vadd.f32 %v870_v7, %v790_v63  ;;  %v1808_v57 = vadd.f32 %v1776_v41, %v1676_v55  ;;  %v1809_v61 = vadd.f32 %v1777_v32, %v1677_v27  ;;  %v5471_v22 = vld [vmem:[#allocation2 + $0x12a] sm:$0xff]  ;;  %v6145_v55 = vld [vmem:[#allocation15_spill] sm:$0xff] }
 0x1eb   : > { %v1976_v43 = vmul.f32 %v5388_v40, %v4500_v56  ;;  %v2407_v9 = vadd.f32 %v2375_v34, %v2307_v29  ;;  %v2408_v21 = vadd.f32 %v2376_v17, %v2308_v62  ;;  %v1977_v1 = vmul.f32 %v5394_v51, %v4500_v56  ;;  %v854_v38 = vpop.permute.xlu1 %853 }
 0x1ec   : > { %v2076_v33 = vmul.f32 %v6105_v49, %v6142_v59  ;;  %v1908_v19 = vadd.f32 %v1876_v14, %v1808_v57  ;;  %v1909_v7 = vadd.f32 %v1877_v31, %v1809_v61  ;;  %v2077_v26 = vmul.f32 %v6105_v49, %v6143_v25  ;;  %v5486_v14 = vpop.f32.mrb[5].mxu0 }
 0x1ed   : > { %v2176_v24 = vmul.f32 %v5400_v30, %v4515_v2  ;;  %v2507_v37 = vadd.f32 %v2475_v36, %v2407_v9  ;;  %v2508_v12 = vadd.f32 %v2476_v39, %v2408_v21  ;;  %v2177_v35 = vmul.f32 %v5402_v48, %v4515_v2  ;;  %v5490_v9 = vpop.f32.mrb[6].mxu0 }
 0x1ee   : > { %v2277_v11 = vmul.f32 %v6130_v45, %v5451_v60  ;;  %v2008_v34 = vadd.f32 %v1976_v43, %v1908_v19  ;;  %v2009_v5 = vadd.f32 %v1977_v1, %v1909_v7  ;;  %v2278_v17 = vmul.f32 %v6130_v45, %v5457_v4  ;;  %v5494_v7 = vpop.f32.mrb[7].mxu0 }
 0x1ef   : > { %v2377_v58 = vmul.f32 %v6132_v6, %v5292_v53  ;;  %v2546_v36 = vadd.f32 %v5366_v16, %v2507_v37  ;;  %v2547_v39 = vadd.f32 %v5366_v16, %v2508_v12  ;;  %v2378_v27 = vmul.f32 %v6132_v6, %v6145_v55 }
 0x1f0   : > { %v2477_v63 = vmul.f32 %v4526_v13, %v5465_v46  ;;  %v2108_v41 = vadd.f32 %v2076_v33, %v2008_v34  ;;  %v2109_v32 = vadd.f32 %v2077_v26, %v2009_v5  ;;  %v2478_v29 = vmul.f32 %v4526_v13, %v5471_v22 }
 0x1f1   : > { %v966_v62 = vmul.f32 %v6113_v52, %v946_v44  ;;  %v2578_v31 = vmax.f32 %v2546_v36, 0.0  ;;  %v2579_v57 = vmax.f32 %v2547_v39, 0.0  ;;  %v871_v61 = vmul.f32 %v5018_v8, %v854_v38 }
 0x1f2   : > { %v967_v43 = vmul.f32 %v6113_v52, %v950_v15  ;;  %v2208_v21 = vadd.f32 %v2176_v24, %v2108_v41  ;;  %v2209_v1 = vadd.f32 %v2177_v35, %v2109_v32  ;;  %v1678_v33 = vmul.f32 %v5388_v40, %v4439_v47  ;;  %v6146_v24 = vld [vmem:[#allocation19_spill] sm:$0xff]  ;;  %v6147_v15 = vld [vmem:[#allocation32_spill] sm:$0xff]  ;;  %v6149_v41 = vld [vmem:[#allocation29_spill] sm:$0xff] }
 0x1f3   : > { %v982_v19 = vadd.f32 %v966_v62, %v886_v0  ;;  %v2601_v26 = vpack.c.bf16 %v2579_v57, %v2578_v31  ;;  %v887_v44 = vadd.f32 %v871_v61, %v791_v42  ;;  %v1679_v37 = vmul.f32 %v5394_v51, %v4439_v47  ;;  %v6150_v62 = vld [vmem:[#allocation31_spill] sm:$0xff] }
 0x1f4   : > { %v1778_v8 = vmul.f32 %v6108_v3, %v6142_v59  ;;  %v2309_v12 = vadd.f32 %v2277_v11, %v2208_v21  ;;  %v2310_v52 = vadd.f32 %v2278_v17, %v2209_v1  ;;  %v1779_v42 = vmul.f32 %v6108_v3, %v6143_v25  ;;  %v6148_v17 = vld [vmem:[#allocation17_spill] sm:$0xff]  ;;  %v6152_v1 = vld [vmem:[#allocation36_spill] sm:$0xff] }
 0x1f5   : > { %v1053_v34 = vrot.slane %v982_v19, %v6090_v50  ;;  %v1189_v35 = vrot.slane %v982_v19, %v6146_v24  ;;  %3482 = vmatmul.mubr.bf16.gmra.mrb[16].mxu1 %v2601_v26  ;;  %v1325_v0 = vrot.slane %v982_v19, %v6092_v28  ;;  %v1461_v40 = vrot.slane %v982_v19, %v6093_v23 }
 0x1f6   : > { %v983_v5 = vadd.f32 %v967_v43, %v887_v44  ;;  %v2409_v38 = vadd.f32 %v2377_v58, %v2309_v12  ;;  %v2410_v51 = vadd.f32 %v2378_v27, %v2310_v52  ;;  %v6151_v43 = vld [vmem:[#allocation35_spill] sm:$0xff] }
 0x1f7   : > { %v1086_v36 = vmul.f32 %v1053_v34, %v6147_v15  ;;  %v1087_v59 = vmul.f32 %v1053_v34, %v6095_v54  ;;  %v1222_v11 = vmul.f32 %v1189_v35, %v6096_v18  ;;  %v1223_v39 = vmul.f32 %v1189_v35, %v6148_v17 }
 0x1f8   : > { %v1358_v32 = vmul.f32 %v1325_v0, %v6149_v41  ;;  %v1359_v31 = vmul.f32 %v1325_v0, %v6150_v62  ;;  %v2509_v57 = vadd.f32 %v2477_v63, %v2409_v38  ;;  %v2510_v61 = vadd.f32 %v2478_v29, %v2410_v51 }
 0x1f9   : > { %v1494_v21 = vmul.f32 %v1461_v40, %v6151_v43  ;;  %v1495_v25 = vmul.f32 %v1461_v40, %v6152_v1  ;;  %v1254_v58 = vadd.f32 %v1222_v11, %v1086_v36  ;;  %v1255_v27 = vadd.f32 %v1223_v39, %v1087_v59 }
 0x1fa   : > { %v1057_v19 = vrot.slane %v983_v5, %v6090_v50  ;;  %v1193_v26 = vrot.slane %v983_v5, %v6146_v24  ;;  %v2548_v44 = vadd.f32 %v5366_v16, %v2509_v57  ;;  %v2549_v12 = vadd.f32 %v5366_v16, %v2510_v61  ;;  %v5540_v57 = vld [vmem:[#allocation2 + $0x138] sm:$0xff]  ;;  %v5542_v61 = vld [vmem:[#allocation2 + $0x140] sm:$0xff] }
 0x1fb   : > { %v1329_v52 = vrot.slane %v983_v5, %v6092_v28  ;;  %v1465_v34 = vrot.slane %v983_v5, %v6093_v23  ;;  %v1390_v63 = vadd.f32 %v1358_v32, %v1254_v58  ;;  %v1391_v29 = vadd.f32 %v1359_v31, %v1255_v27  ;;  %v5560_v27 = vld [vmem:[#allocation2 + $0x142] sm:$0xff] }
 0x1fc   : > { %v1088_v35 = vmul.f32 %v1057_v19, %v6147_v15  ;;  %v1089_v0 = vmul.f32 %v1057_v19, %v6095_v54  ;;  %v2580_v40 = vmax.f32 %v2548_v44, 0.0  ;;  %v2581_v38 = vmax.f32 %v2549_v12, 0.0  ;;  %v2862_v19 = vld [vmem:[%s4192_s26 + $0xb0] sm:$0xff] }
 0x1fd   : > { %v1224_v50 = vmul.f32 %v1193_v26, %v6096_v18  ;;  %v1225_v24 = vmul.f32 %v1193_v26, %v6148_v17  ;;  %v5524_v51 = vadd.f32 %v1494_v21, %v1390_v63  ;;  %v5526_v36 = vadd.f32 %v1495_v25, %v1391_v29  ;;  %v2863_v26 = vld [vmem:[%s4192_s26 + $0xb8] sm:$0xff]  ;;  %v6153_v29 = vld [vmem:[#allocation50_spill] sm:$0xff] }
 0x1fe   : > { %v1360_v28 = vmul.f32 %v1329_v52, %v6149_v41  ;;  %v1361_v23 = vmul.f32 %v1329_v52, %v6150_v62  ;;  %v2602_v5 = vpack.c.bf16 %v2581_v38, %v2580_v40  ;;  %v1496_v15 = vmul.f32 %v1465_v34, %v6151_v43  ;;  %v2861_v43 = vld [vmem:[%s4192_s26 + $0xa8] sm:$0xff] }
 0x1ff   : > { %v1256_v59 = vadd.f32 %v1224_v50, %v1088_v35  ;;  %v1257_v11 = vadd.f32 %v1225_v24, %v1089_v0  ;;  %1613 = vst [vmem:[#allocation2 + $0x169] sm:$0xff] %v5524_v51  ;;  %1614 = vst [vmem:[#allocation2 + $0x171] sm:$0xff] %v5526_v36  ;;  %v1497_v54 = vmul.f32 %v1465_v34, %v6152_v1  ;;  %v6154_v0 = vld [vmem:[#allocation45_spill] sm:$0xff] }
 0x200   : > { %v1810_v18 = vadd.f32 %v1778_v8, %v1678_v33  ;;  %v1811_v17 = vadd.f32 %v1779_v42, %v1679_v37  ;;  %v1878_v39 = vmul.f32 %v5400_v30, %v6079_v10  ;;  %3485 = vmatprep.mubr.bf16.mxu1 %v2602_v5  ;;  %v1879_v62 = vmul.f32 %v5402_v48, %v6079_v10  ;;  %v5550_v48 = vld [vmem:[#allocation2 + $0x13a] sm:$0xff]  ;;  %v2860_v42 = vld [vmem:[%s4192_s26 + $0xa0] sm:$0xff] }
 0x201   : > { %v1392_v41 = vadd.f32 %v1360_v28, %v1256_v59  ;;  %v1393_v32 = vadd.f32 %v1361_v23, %v1257_v11  ;;  %v1978_v31 = vmul.f32 %v5451_v60, %v4500_v56  ;;  %v1979_v37 = vmul.f32 %v5457_v4, %v4500_v56 }
 0x202   : > { %v1910_v33 = vadd.f32 %v1878_v39, %v1810_v18  ;;  %v2078_v30 = vmul.f32 %v6105_v49, %v5292_v53  ;;  %v2079_v8 = vmul.f32 %v6105_v49, %v6145_v55  ;;  %v1911_v25 = vadd.f32 %v1879_v62, %v1811_v17  ;;  %v5600_v62 = vld [vmem:[#allocation2 + $0x158] sm:$0xff] }
 0x203   : > { %v5554_v21 = vadd.f32 %v1496_v15, %v1392_v41  ;;  %v5556_v1 = vadd.f32 %v1497_v54, %v1393_v32  ;;  %v2178_v58 = vmul.f32 %v5465_v46, %v4515_v2  ;;  %v2179_v12 = vmul.f32 %v5471_v22, %v4515_v2  ;;  %v5598_v32 = vld [vmem:[#allocation2 + $0x150] sm:$0xff] }
 0x204   : > { %v2010_v44 = vadd.f32 %v1978_v31, %v1910_v33  ;;  %v2279_v52 = vmul.f32 %v6130_v45, %v5540_v57  ;;  %v2280_v34 = vmul.f32 %v6130_v45, %v5542_v61  ;;  %v2011_v63 = vadd.f32 %v1979_v37, %v1911_v25 }
 0x205   : > { %1615 = vst [vmem:[#allocation2 + $0x181] sm:$0xff] %v5554_v21  ;;  %1616 = vst [vmem:[#allocation2 + $0x189] sm:$0xff] %v5556_v1  ;;  %v2379_v35 = vmul.f32 %v6132_v6, %v6153_v29  ;;  %v2380_v40 = vmul.f32 %v6132_v6, %v6154_v0  ;;  %v2479_v38 = vmul.f32 %v4526_v13, %v5550_v48 }
 0x206   : > { %v2110_v50 = vadd.f32 %v2078_v30, %v2010_v44  ;;  %v2480_v24 = vmul.f32 %v4526_v13, %v5560_v27  ;;  %v2882_v28 = vpack.c.bf16 %v2861_v43, %v2860_v42  ;;  %v2883_v23 = vpack.c.bf16 %v2863_v26, %v2862_v19  ;;  %v5610_v42 = vld [vmem:[#allocation2 + $0x152] sm:$0xff]  ;;  %v5612_v43 = vld [vmem:[#allocation2 + $0x15a] sm:$0xff]  ;;  %v5618_v44 = vpop.f32.mrb[8].mxu0 }
 0x207   : > { %v2111_v5 = vadd.f32 %v2079_v8, %v2011_v63  ;;  %v1680_v59 = vmul.f32 %v5451_v60, %v4439_v47  ;;  %v1681_v11 = vmul.f32 %v5457_v4, %v4439_v47  ;;  %v1780_v15 = vmul.f32 %v6108_v3, %v5292_v53 }
 0x208   : > { %v2210_v54 = vadd.f32 %v2178_v58, %v2110_v50  ;;  %3525 = vmatprep.mubr.msk.bf16.mxu0 %vm2927_vm0, %v2882_v28  ;;  %v1781_v18 = vmul.f32 %v6108_v3, %v6145_v55  ;;  %v1880_v17 = vmul.f32 %v5465_v46, %v6079_v10  ;;  %v1881_v39 = vmul.f32 %v5471_v22, %v6079_v10  ;;  %v6156_v50 = vld [vmem:[#allocation38_spill] sm:$0xff] }
 0x209   : > { %v2211_v41 = vadd.f32 %v2179_v12, %v2111_v5  ;;  %3526 = vmatmul.mubr.msk.bf16.gmra.mrb[20].mxu0 %vm2927_vm0, %v2883_v23  ;;  %v1812_v60 = vadd.f32 %v1780_v15, %v1680_v59  ;;  %v1980_v4 = vmul.f32 %v5540_v57, %v4500_v56  ;;  %v1981_v53 = vmul.f32 %v5542_v61, %v4500_v56 }
 0x20a   : > { %v2311_v55 = vadd.f32 %v2279_v52, %v2210_v54  ;;  %v1813_v31 = vadd.f32 %v1781_v18, %v1681_v11  ;;  %v2080_v46 = vmul.f32 %v6105_v49, %v6153_v29  ;;  %v2081_v22 = vmul.f32 %v6105_v49, %v6154_v0  ;;  %v5628_v11 = vpop.f32.mrb[9].mxu0 }
 0x20b   : > { %v2312_v33 = vadd.f32 %v2280_v34, %v2211_v41  ;;  %v1912_v37 = vadd.f32 %v1880_v17, %v1812_v60  ;;  %v2180_v30 = vmul.f32 %v5550_v48, %v4515_v2  ;;  %v2181_v8 = vmul.f32 %v5560_v27, %v4515_v2  ;;  %v6155_v34 = vld [vmem:[#allocation18_spill] sm:$0xff]  ;;  %v5634_v17 = vpop.f32.mrb[10].mxu0 }
 0x20c   : > { %v2411_v25 = vadd.f32 %v2379_v35, %v2311_v55  ;;  %v1913_v58 = vadd.f32 %v1881_v39, %v1813_v31  ;;  %v2281_v19 = vmul.f32 %v6130_v45, %v5598_v32  ;;  %v2282_v26 = vmul.f32 %v6130_v45, %v5600_v62 }
 0x20d   : > { %v2412_v12 = vadd.f32 %v2380_v40, %v2312_v33  ;;  %v2012_v52 = vadd.f32 %v1980_v4, %v1912_v37  ;;  %v2381_v63 = vmul.f32 %v6132_v6, %v6155_v34  ;;  %v2382_v28 = vmul.f32 %v6132_v6, %v6156_v50  ;;  %v5641_v4 = vpop.f32.mrb[11].mxu0 }
 0x20e   : > { %v2511_v23 = vadd.f32 %v2479_v38, %v2411_v25  ;;  %v2013_v5 = vadd.f32 %v1981_v53, %v1913_v58  ;;  %v2481_v35 = vmul.f32 %v4526_v13, %v5610_v42  ;;  %v2482_v59 = vmul.f32 %v4526_v13, %v5612_v43  ;;  %v5654_v58 = vld [vmem:[#allocation2 + $0x168] sm:$0xff] }
 0x20f   : > { %v2512_v15 = vadd.f32 %v2480_v24, %v2412_v12  ;;  %v2112_v54 = vadd.f32 %v2080_v46, %v2012_v52  ;;  %v1682_v40 = vmul.f32 %v5540_v57, %v4439_v47  ;;  %v1683_v18 = vmul.f32 %v5542_v61, %v4439_v47 }
 0x210   : > { %v2550_v38 = vadd.f32 %v5366_v16, %v2511_v23  ;;  %v2113_v39 = vadd.f32 %v2081_v22, %v2013_v5  ;;  %v1782_v41 = vmul.f32 %v6108_v3, %v6153_v29  ;;  %v1783_v60 = vmul.f32 %v6108_v3, %v6154_v0  ;;  %v2864_v23 = vld [vmem:[%s4192_s26 + $0xc0] sm:$0xff] }
 0x211   : > { %v2551_v24 = vadd.f32 %v5366_v16, %v2512_v15  ;;  %v2212_v53 = vadd.f32 %v2180_v30, %v2112_v54  ;;  %v1882_v57 = vmul.f32 %v5550_v48, %v6079_v10  ;;  %v1883_v61 = vmul.f32 %v5560_v27, %v6079_v10 }
 0x212   : > { %v2582_v55 = vmax.f32 %v2550_v38, 0.0  ;;  %v2213_v31 = vadd.f32 %v2181_v8, %v2113_v39  ;;  %v1814_v46 = vadd.f32 %v1782_v41, %v1682_v40  ;;  %v1815_v22 = vadd.f32 %v1783_v60, %v1683_v18  ;;  %v5656_v8 = vld [vmem:[#allocation2 + $0x170] sm:$0xff] }
 0x213   : > { %v2583_v29 = vmax.f32 %v2551_v24, 0.0  ;;  %v2313_v33 = vadd.f32 %v2281_v19, %v2212_v53  ;;  %v1982_v0 = vmul.f32 %v5598_v32, %v4500_v56  ;;  %v1983_v37 = vmul.f32 %v5600_v62, %v4500_v56  ;;  %v5665_v18 = vld [vmem:[#allocation2 + $0x16a] sm:$0xff]  ;;  %v5667_v38 = vld [vmem:[#allocation2 + $0x172] sm:$0xff]  ;;  %v2866_v24 = vld [vmem:[%s4192_s26 + $0xd0] sm:$0xff] }
 0x214   : > { %v2314_v30 = vadd.f32 %v2282_v26, %v2213_v31  ;;  %v1914_v25 = vadd.f32 %v1882_v57, %v1814_v46  ;;  %v1915_v48 = vadd.f32 %v1883_v61, %v1815_v22  ;;  %v2082_v27 = vmul.f32 %v6105_v49, %v6155_v34  ;;  %v2867_v53 = vld [vmem:[%s4192_s26 + $0xd8] sm:$0xff] }
 0x215   : > { %v2603_v12 = vpack.c.bf16 %v2583_v29, %v2582_v55  ;;  %v2413_v52 = vadd.f32 %v2381_v63, %v2313_v33  ;;  %v2083_v19 = vmul.f32 %v6105_v49, %v6156_v50  ;;  %v2182_v26 = vmul.f32 %v5610_v42, %v4515_v2  ;;  %v2865_v63 = vld [vmem:[%s4192_s26 + $0xc8] sm:$0xff] }
 0x216   : > { %v2414_v5 = vadd.f32 %v2382_v28, %v2314_v30  ;;  %v2014_v15 = vadd.f32 %v1982_v0, %v1914_v25  ;;  %v2015_v54 = vadd.f32 %v1983_v37, %v1915_v48  ;;  %v2183_v40 = vmul.f32 %v5612_v43, %v4515_v2 }
 0x217   : > { %3486 = vmatmul.mubr.bf16.gmra.mrb[20].mxu1 %v2603_v12  ;;  %v2513_v39 = vadd.f32 %v2481_v35, %v2413_v52  ;;  %v2283_v41 = vmul.f32 %v6130_v45, %v5654_v58  ;;  %v2284_v60 = vmul.f32 %v6130_v45, %v5656_v8  ;;  %v2383_v28 = vmul.f32 %v6132_v6, %v5524_v51 }
 0x218   : > { %v2514_v57 = vadd.f32 %v2482_v59, %v2414_v5  ;;  %v2114_v61 = vadd.f32 %v2082_v27, %v2014_v15  ;;  %v2115_v55 = vadd.f32 %v2083_v19, %v2015_v54  ;;  %v2384_v31 = vmul.f32 %v6132_v6, %v5526_v36 }
 0x219   : > { %v2552_v46 = vadd.f32 %v5366_v16, %v2513_v39  ;;  %v2483_v35 = vmul.f32 %v4526_v13, %v5665_v18  ;;  %v2484_v22 = vmul.f32 %v4526_v13, %v5667_v38  ;;  %v2884_v29 = vpack.c.bf16 %v2865_v63, %v2864_v23 }
 0x21a   : > { %v2553_v33 = vadd.f32 %v5366_v16, %v2514_v57  ;;  %v2214_v0 = vadd.f32 %v2182_v26, %v2114_v61  ;;  %v2215_v37 = vadd.f32 %v2183_v40, %v2115_v55  ;;  %v2885_v30 = vpack.c.bf16 %v2867_v53, %v2866_v24  ;;  %v2249_v24 = vld [vmem:[#allocation2 + $0x180] sm:$0xff] }
 0x21b   : > { %v2584_v59 = vmax.f32 %v2552_v46, 0.0  ;;  %3529 = vmatprep.mubr.msk.bf16.mxu0 %vm2927_vm0, %v2884_v29  ;;  %v1684_v25 = vmul.f32 %v5598_v32, %v4439_v47  ;;  %v1685_v48 = vmul.f32 %v5600_v62, %v4439_v47  ;;  %v1784_v27 = vmul.f32 %v6108_v3, %v6155_v34 }
 0x21c   : > { %v2585_v12 = vmax.f32 %v2553_v33, 0.0  ;;  %v2315_v52 = vadd.f32 %v2283_v41, %v2214_v0  ;;  %v2316_v19 = vadd.f32 %v2284_v60, %v2215_v37  ;;  %3530 = vmatmul.mubr.msk.bf16.gmra.mrb[24].mxu0 %vm2927_vm0, %v2885_v30  ;;  %v1785_v26 = vmul.f32 %v6108_v3, %v6156_v50 }
 0x21d   : > { %v1816_v23 = vadd.f32 %v1784_v27, %v1684_v25  ;;  %v1884_v5 = vmul.f32 %v5610_v42, %v6079_v10  ;;  %v1885_v32 = vmul.f32 %v5612_v43, %v6079_v10  ;;  %v1984_v62 = vmul.f32 %v5654_v58, %v4500_v56  ;;  %v2250_v42 = vld [vmem:[#allocation2 + $0x188] sm:$0xff] }
 0x21e   : > { %v2604_v15 = vpack.c.bf16 %v2585_v12, %v2584_v59  ;;  %v2415_v34 = vadd.f32 %v2383_v28, %v2315_v52  ;;  %v2416_v54 = vadd.f32 %v2384_v31, %v2316_v19  ;;  %v1817_v40 = vadd.f32 %v1785_v26, %v1685_v48  ;;  %v2449_v26 = vld [vmem:[#allocation2 + $0x182] sm:$0xff] }
 0x21f   : > { %v1916_v63 = vadd.f32 %v1884_v5, %v1816_v23  ;;  %v1985_v39 = vmul.f32 %v5656_v8, %v4500_v56  ;;  %v2084_v43 = vmul.f32 %v6105_v49, %v5524_v51  ;;  %v2085_v57 = vmul.f32 %v6105_v49, %v5526_v36 }
 0x220   : > { %3489 = vmatprep.mubr.bf16.mxu1 %v2604_v15  ;;  %v2515_v50 = vadd.f32 %v2483_v35, %v2415_v34  ;;  %v2516_v41 = vadd.f32 %v2484_v22, %v2416_v54  ;;  %v1917_v60 = vadd.f32 %v1885_v32, %v1817_v40  ;;  %v2184_v28 = vmul.f32 %v5665_v18, %v4515_v2  ;;  %v2450_v32 = vld [vmem:[#allocation2 + $0x18a] sm:$0xff]  ;;  %v2869_v54 = vld [vmem:[%s4192_s26 + $0xe8] sm:$0xff] }
 0x221   : > { %v2016_v53 = vadd.f32 %v1984_v62, %v1916_v63  ;;  %v2185_v46 = vmul.f32 %v5667_v38, %v4515_v2  ;;  %v2285_v22 = vmul.f32 %v6130_v45, %v2249_v24  ;;  %v2286_v29 = vmul.f32 %v6130_v45, %v2250_v42 }
 0x222   : > { %v2554_v61 = vadd.f32 %v5366_v16, %v2515_v50  ;;  %v2555_v55 = vadd.f32 %v5366_v16, %v2516_v41  ;;  %v2017_v31 = vadd.f32 %v1985_v39, %v1917_v60  ;;  %v2385_v33 = vmul.f32 %v6132_v6, %v5554_v21  ;;  %v2870_v41 = vld [vmem:[%s4192_s26 + $0xf0] sm:$0xff]  ;;  %v2871_v60 = vld [vmem:[%s4192_s26 + $0xf8] sm:$0xff] }
 0x223   : > { %v2116_v35 = vadd.f32 %v2084_v43, %v2016_v53  ;;  %v1686_v59 = vmul.f32 %v5654_v58, %v4439_v47  ;;  %v1687_v48 = vmul.f32 %v5656_v8, %v4439_v47  ;;  %v1786_v27 = vmul.f32 %v6108_v3, %v5524_v51  ;;  %v2351_v43 = vld [vmem:[#allocation2 + $0x199] sm:$0xff] }
 0x224   : > { %v2586_v0 = vmax.f32 %v2554_v61, 0.0  ;;  %v2587_v37 = vmax.f32 %v2555_v55, 0.0  ;;  %v2117_v30 = vadd.f32 %v2085_v57, %v2017_v31  ;;  %v1787_v12 = vmul.f32 %v6108_v3, %v5526_v36  ;;  %v3784_v61 = vld [vmem:[#allocation2] sm:$0xff] }
 0x225   : > { %v2216_v25 = vadd.f32 %v2184_v28, %v2116_v35  ;;  %v1886_v23 = vmul.f32 %v5665_v18, %v6079_v10  ;;  %v1887_v58 = vmul.f32 %v5667_v38, %v6079_v10  ;;  %v1818_v47 = vadd.f32 %v1786_v27, %v1686_v59  ;;  %v2868_v38 = vld [vmem:[%s4192_s26 + $0xe0] sm:$0xff]  ;;  %v2352_v31 = vld [vmem:[#allocation2 + $0x1a1] sm:$0xff]  ;;  %s3875_s26 = sshll.u32 %s3956_s20, 4  ;;  %s3876_s26 = int_to_ptr.vmem [resolvable:$false] %s3875_s26 }
 0x226   : > { %v2605_v52 = vpack.c.bf16 %v2587_v37, %v2586_v0  ;;  %v2217_v19 = vadd.f32 %v2185_v46, %v2117_v30  ;;  %v1819_v8 = vadd.f32 %v1787_v12, %v1687_v48  ;;  %v1986_v51 = vmul.f32 %v2249_v24, %v4500_v56  ;;  %v2452_v0 = vld [vmem:[#allocation2 + $0x1a2] sm:$0xff]  ;;  %s3877_s24 = scalar_lea.vmem %s3876_s26, 8192  ;;  %p3878_p9 = scmp.lt.s32.totalorder %s5883_s18, %s3876_s26 }
 0x227   : > { %v2317_v5 = vadd.f32 %v2285_v22, %v2216_v25  ;;  %v2386_v36 = vmul.f32 %v6132_v6, %v5556_v1  ;;  %v1987_v62 = vmul.f32 %v2250_v42, %v4500_v56  ;;  %v2485_v15 = vmul.f32 %v4526_v13, %v2449_v26  ;;  %p3879_p12 = scmp.lt.s32.totalorder %s3877_s24, %s3871_s13 }
 0x228   : > { %3490 = vmatmul.mubr.bf16.gmra.mrb[24].mxu1 %v2605_v52  ;;  %v2318_v3 = vadd.f32 %v2286_v29, %v2217_v19  ;;  %v1918_v34 = vadd.f32 %v1886_v23, %v1818_v47  ;;  %v1919_v10 = vadd.f32 %v1887_v58, %v1819_v8  ;;  %v2486_v63 = vmul.f32 %v4526_v13, %v2450_v32 }
 0x229   : > { %v2417_v18 = vadd.f32 %v2385_v33, %v2317_v5  ;;  %v2086_v39 = vmul.f32 %v6105_v49, %v5554_v21  ;;  %v2087_v50 = vmul.f32 %v6105_v49, %v5556_v1  ;;  %v2186_v53 = vmul.f32 %v2449_v26, %v4515_v2  ;;  %v2451_v33 = vld [vmem:[#allocation2 + $0x19a] sm:$0xff]  ;;  %p3880_p2 = por %p3879_p12, %p3878_p9 }
 0x22a   : > { %v2418_v40 = vadd.f32 %v2386_v36, %v2318_v3  ;;  %v2018_v56 = vadd.f32 %v1986_v51, %v1918_v34  ;;  %v2019_v42 = vadd.f32 %v1987_v62, %v1919_v10  ;;  %v2187_v28 = vmul.f32 %v2450_v32, %v4515_v2  ;;  %v5760_v51 = vld [vmem:[%s5937_s7] ss:$0 sm:$0xff] }
 0x22b   : > { %v2517_v24 = vadd.f32 %v2485_v15, %v2417_v18  ;;  %v2287_v55 = vmul.f32 %v3784_v61, %v6130_v45  ;;  %v2886_v46 = vpack.c.bf16 %v2869_v54, %v2868_v38  ;;  %v2887_v1 = vpack.c.bf16 %v2871_v60, %v2870_v41  ;;  %v6157_v34 = vld [vmem:[#allocation43_spill] sm:$0xff]  ;;  %p3881_p13 = pnand %p3880_p2, %p3874_p7 }
 0x22c   : > { %v2518_v57 = vadd.f32 %v2486_v63, %v2418_v40  ;;  %v2118_v35 = vadd.f32 %v2086_v39, %v2018_v56  ;;  %v2119_v49 = vadd.f32 %v2087_v50, %v2019_v42  ;;  %v2387_v29 = vmul.f32 %v6132_v6, %v2351_v43  ;;  %v6158_v40 = vld [vmem:[#allocation22_spill] sm:$0xff]  ;;  %v6159_v56 = vld [vmem:[#allocation25_spill] sm:$0xff]  ;;  %v6160_v43 = vld [vmem:[#allocation16_spill] sm:$0xff] }
 0x22d   : > { %v2556_v21 = vadd.f32 %v5366_v16, %v2517_v24  ;;  %3533 = vmatprep.mubr.msk.bf16.mxu0 %vm2927_vm0, %v2886_v46  ;;  %v2388_v45 = vmul.f32 %v6132_v6, %v2352_v31  ;;  %v2487_v27 = vmul.f32 %v4526_v13, %v2451_v33  ;;  %v2488_v12 = vmul.f32 %v4526_v13, %v2452_v0 }
 0x22e   : > { %v2557_v22 = vadd.f32 %v5366_v16, %v2518_v57  ;;  %v2218_v2 = vadd.f32 %v2186_v53, %v2118_v35  ;;  %v2219_v30 = vadd.f32 %v2187_v28, %v2119_v49  ;;  %3534 = vmatmul.mubr.msk.bf16.gmra.mrb[28].mxu0 %vm2927_vm0, %v2887_v1 }
 0x22f   : > { %v2588_v37 = vmax.f32 %v2556_v21, 0.0 }
 0x230   : > { %v2589_v59 = vmax.f32 %v2557_v22, 0.0  ;;  %v2319_v25 = vadd.f32 %v2287_v55, %v2218_v2  ;;  %v2320_v48 = vadd.f32 %v2287_v55, %v2219_v30 }
 0x232   : > { %v2606_v52 = vpack.c.bf16 %v2589_v59, %v2588_v37  ;;  %v2419_v19 = vadd.f32 %v2387_v29, %v2319_v25  ;;  %v2420_v26 = vadd.f32 %v2388_v45, %v2320_v48 }
 0x234   : > { %3493 = vmatprep.mubr.bf16.mxu1 %v2606_v52  ;;  %v2519_v23 = vadd.f32 %v2487_v27, %v2419_v19  ;;  %v2520_v58 = vadd.f32 %v2488_v12, %v2420_v26 }
 0x236   : > { %v2558_v5 = vadd.f32 %v5366_v16, %v2519_v23  ;;  %v2559_v32 = vadd.f32 %v5366_v16, %v2520_v58  ;;  %v5767_v16 = vld [vmem:[%s5939_s9] ss:$0 sm:$0xff] }
 0x238   : > { %v2590_v6 = vmax.f32 %v2558_v5, 0.0  ;;  %v2591_v47 = vmax.f32 %v2559_v32, 0.0 }
 0x23a   : > { %v2607_v8 = vpack.c.bf16 %v2591_v47, %v2590_v6 }
 0x23c   : > { %3494 = vmatmul.mubr.bf16.gmra.mrb[28].mxu1 %v2607_v8 }
 0x243   : > { %v3467_v13 = vpop.f32.mrb[0].mxu1 }
 0x244   : > { %v2722_v3 = vadd.f32 %v3467_v13, %v5760_v51  ;;  %v2713_v36 = vpop.f32.mrb[1].mxu1 }
 0x245   : > { %v2714_v62 = vadd.f32 %v5760_v51, %v2713_v36  ;;  %v3468_v18 = vpop.f32.mrb[2].mxu1 }
 0x246   : > { %v2725_v15 = vadd.f32 %v3468_v18, %v5760_v51  ;;  %v3538_v10 = vadd.f32 %v6157_v34, %v2722_v3  ;;  %v2716_v38 = vpop.f32.mrb[3].mxu1 }
 0x247   : > { %v2717_v54 = vadd.f32 %v5760_v51, %v2716_v38  ;;  %v3541_v63 = vadd.f32 %v6158_v40, %v2714_v62 }
 0x248   : > { %v3539_v39 = vadd.f32 %v3538_v10, %v5767_v16  ;;  %v3544_v50 = vadd.f32 %v5767_v16, %v2725_v15 }
 0x249   : > { %v3542_v41 = vadd.f32 %v3541_v63, %v5767_v16  ;;  %v3547_v60 = vadd.f32 %v5767_v16, %v2717_v54 }
 0x24a   : > { %v3171_v24 = vmax.f32 %v3539_v39, 0.0  ;;  %v3545_v42 = vadd.f32 %v3544_v50, %v6159_v56 }
 0x24b   : > { %v3169_v53 = vmax.f32 %v3542_v41, 0.0  ;;  %v3548_v57 = vadd.f32 %v3547_v60, %v6160_v43 }
 0x24c   : > { %3203 = vst [vmem:[%s5781_s25 + $0x10] sm:$0xff] %v3171_v24  ;;  %v3172_v28 = vmax.f32 %v3545_v42, 0.0 }
 0x24d   : > { %3201 = vst [vmem:[%s5781_s25] sm:$0xff] %v3169_v53  ;;  %v3170_v61 = vmax.f32 %v3548_v57, 0.0 }
 0x24e   : > { %3204 = vst [vmem:[%s5781_s25 + $0x18] sm:$0xff] %v3172_v28 }
 0x24f   : > { %3202 = vst [vmem:[%s5781_s25 + $0x8] sm:$0xff] %v3170_v61 }
 0x264   : > { %v3471_v55 = vpop.f32.mrb[4].mxu1 }
 0x265   : > { %v2738_v31 = vadd.f32 %v3471_v55, %v5760_v51  ;;  %v2729_v46 = vpop.f32.mrb[5].mxu1 }
 0x266   : > { %v2730_v21 = vadd.f32 %v5760_v51, %v2729_v46  ;;  %v3472_v35 = vpop.f32.mrb[6].mxu1 }
 0x267   : > { %v2741_v49 = vadd.f32 %v3472_v35, %v5760_v51  ;;  %v2732_v1 = vpop.f32.mrb[7].mxu1  ;;  %v3550_v22 = vadd.f32 %v5767_v16, %v2738_v31 }
 0x268   : > { %v2733_v29 = vadd.f32 %v5760_v51, %v2732_v1  ;;  %v3553_v33 = vadd.f32 %v5767_v16, %v2730_v21 }
 0x269   : > { %v3551_v0 = vadd.f32 %v3550_v22, %v5459_v20  ;;  %v3556_v37 = vadd.f32 %v5767_v16, %v2741_v49 }
 0x26a   : > { %v3554_v2 = vadd.f32 %v3553_v33, %v5486_v14  ;;  %v3559_v30 = vadd.f32 %v5767_v16, %v2733_v29 }
 0x26b   : > { %v3175_v45 = vmax.f32 %v3551_v0, 0.0  ;;  %v3557_v59 = vadd.f32 %v3556_v37, %v5490_v9 }
 0x26c   : > { %v3173_v25 = vmax.f32 %v3554_v2, 0.0  ;;  %v3560_v48 = vadd.f32 %v3559_v30, %v5494_v7 }
 0x26d   : > { %3207 = vst [vmem:[%s5781_s25 + $0x30] sm:$0xff] %v3175_v45  ;;  %v3176_v27 = vmax.f32 %v3557_v59, 0.0 }
 0x26e   : > { %3205 = vst [vmem:[%s5781_s25 + $0x20] sm:$0xff] %v3173_v25  ;;  %v3174_v12 = vmax.f32 %v3560_v48, 0.0 }
 0x26f   : > { %3208 = vst [vmem:[%s5781_s25 + $0x38] sm:$0xff] %v3176_v27 }
 0x270   : > { %3206 = vst [vmem:[%s5781_s25 + $0x28] sm:$0xff] %v3174_v12 }
 0x281   : > { %v3475_v52 = vpop.f32.mrb[8].mxu1 }
 0x282   : > { %v2754_v20 = vadd.f32 %v3475_v52, %v5760_v51  ;;  %v2745_v19 = vpop.f32.mrb[9].mxu1 }
 0x283   : > { %v2746_v14 = vadd.f32 %v5760_v51, %v2745_v19  ;;  %v3476_v26 = vpop.f32.mrb[10].mxu1 }
 0x284   : > { %v2757_v9 = vadd.f32 %v3476_v26, %v5760_v51  ;;  %v2748_v23 = vpop.f32.mrb[11].mxu1  ;;  %v3562_v7 = vadd.f32 %v5767_v16, %v2754_v20 }
 0x285   : > { %v2749_v58 = vadd.f32 %v5760_v51, %v2748_v23  ;;  %v3565_v5 = vadd.f32 %v5767_v16, %v2746_v14 }
 0x286   : > { %v3563_v32 = vadd.f32 %v3562_v7, %v5618_v44  ;;  %v3568_v6 = vadd.f32 %v5767_v16, %v2757_v9 }
 0x287   : > { %v3566_v47 = vadd.f32 %v3565_v5, %v5628_v11  ;;  %v3571_v8 = vadd.f32 %v5767_v16, %v2749_v58 }
 0x288   : > { %v3179_v13 = vmax.f32 %v3563_v32, 0.0  ;;  %v3569_v3 = vadd.f32 %v3568_v6, %v5634_v17 }
 0x289   : > { %v3177_v36 = vmax.f32 %v3566_v47, 0.0  ;;  %v3572_v62 = vadd.f32 %v3571_v8, %v5641_v4 }
 0x28a   : > { %3211 = vst [vmem:[%s5781_s25 + $0x50] sm:$0xff] %v3179_v13  ;;  %v3180_v18 = vmax.f32 %v3569_v3, 0.0 }
 0x28b   : > { %3209 = vst [vmem:[%s5781_s25 + $0x40] sm:$0xff] %v3177_v36  ;;  %v3178_v15 = vmax.f32 %v3572_v62, 0.0 }
 0x28c   : > { %3212 = vst [vmem:[%s5781_s25 + $0x58] sm:$0xff] %v3180_v18 }
 0x28d   : > { %3210 = vst [vmem:[%s5781_s25 + $0x48] sm:$0xff] %v3178_v15 }
 0x295   : > { %v3519_v34 = vpop.f32.mrb[12].mxu0 }
 0x296   : > { %v3058_v44 = vpop.f32.mrb[13].mxu0 }
 0x297   : > { %v3520_v10 = vpop.f32.mrb[14].mxu0 }
 0x298   : > { %v3061_v38 = vpop.f32.mrb[15].mxu0 }
 0x2a2   : > { %v3479_v54 = vpop.f32.mrb[12].mxu1 }
 0x2a3   : > { %v2770_v11 = vadd.f32 %v3479_v54, %v5760_v51  ;;  %v2761_v40 = vpop.f32.mrb[13].mxu1 }
 0x2a4   : > { %v2762_v17 = vadd.f32 %v5760_v51, %v2761_v40  ;;  %v3480_v63 = vpop.f32.mrb[14].mxu1 }
 0x2a5   : > { %v2773_v4 = vadd.f32 %v3480_v63, %v5760_v51  ;;  %v2764_v39 = vpop.f32.mrb[15].mxu1  ;;  %v3574_v50 = vadd.f32 %v5767_v16, %v2770_v11 }
 0x2a6   : > { %v2765_v41 = vadd.f32 %v5760_v51, %v2764_v39  ;;  %v3577_v60 = vadd.f32 %v5767_v16, %v2762_v17 }
 0x2a7   : > { %v3575_v24 = vadd.f32 %v3574_v50, %v3519_v34  ;;  %v3580_v56 = vadd.f32 %v5767_v16, %v2773_v4 }
 0x2a8   : > { %v3578_v42 = vadd.f32 %v3577_v60, %v3058_v44  ;;  %v3583_v53 = vadd.f32 %v5767_v16, %v2765_v41 }
 0x2a9   : > { %v3183_v43 = vmax.f32 %v3575_v24, 0.0  ;;  %v3581_v57 = vadd.f32 %v3580_v56, %v3520_v10 }
 0x2aa   : > { %v3181_v28 = vmax.f32 %v3578_v42, 0.0  ;;  %v3584_v61 = vadd.f32 %v3583_v53, %v3061_v38 }
 0x2ab   : > { %3215 = vst [vmem:[%s5781_s25 + $0x70] sm:$0xff] %v3183_v43  ;;  %v3184_v55 = vmax.f32 %v3581_v57, 0.0 }
 0x2ac   : > { %3213 = vst [vmem:[%s5781_s25 + $0x60] sm:$0xff] %v3181_v28  ;;  %v3182_v31 = vmax.f32 %v3584_v61, 0.0 }
 0x2ad   : > { %3216 = vst [vmem:[%s5781_s25 + $0x78] sm:$0xff] %v3184_v55 }
 0x2ae   : > { %3214 = vst [vmem:[%s5781_s25 + $0x68] sm:$0xff] %v3182_v31 }
 0x2bb   : > { %v3523_v46 = vpop.f32.mrb[16].mxu0 }
 0x2bc   : > { %v3074_v21 = vpop.f32.mrb[17].mxu0 }
 0x2bd   : > { %v3524_v35 = vpop.f32.mrb[18].mxu0 }
 0x2be   : > { %v3077_v49 = vpop.f32.mrb[19].mxu0 }
 0x2c8   : > { %v3483_v1 = vpop.f32.mrb[16].mxu1 }
 0x2c9   : > { %v2786_v22 = vadd.f32 %v3483_v1, %v5760_v51  ;;  %v2777_v29 = vpop.f32.mrb[17].mxu1 }
 0x2ca   : > { %v2778_v33 = vadd.f32 %v5760_v51, %v2777_v29  ;;  %v3484_v0 = vpop.f32.mrb[18].mxu1 }
 0x2cb   : > { %v2789_v37 = vadd.f32 %v3484_v0, %v5760_v51  ;;  %v2780_v2 = vpop.f32.mrb[19].mxu1  ;;  %v3586_v30 = vadd.f32 %v5767_v16, %v2786_v22 }
 0x2cc   : > { %v2781_v45 = vadd.f32 %v5760_v51, %v2780_v2  ;;  %v3589_v59 = vadd.f32 %v5767_v16, %v2778_v33 }
 0x2cd   : > { %v3587_v25 = vadd.f32 %v3586_v30, %v3523_v46  ;;  %v3592_v48 = vadd.f32 %v5767_v16, %v2789_v37 }
 0x2ce   : > { %v3590_v27 = vadd.f32 %v3589_v59, %v3074_v21  ;;  %v3595_v12 = vadd.f32 %v5767_v16, %v2781_v45 }
 0x2cf   : > { %v3187_v52 = vmax.f32 %v3587_v25, 0.0  ;;  %v3593_v20 = vadd.f32 %v3592_v48, %v3524_v35 }
 0x2d0   : > { %v3185_v19 = vmax.f32 %v3590_v27, 0.0  ;;  %v3596_v14 = vadd.f32 %v3595_v12, %v3077_v49 }
 0x2d1   : > { %3219 = vst [vmem:[%s5781_s25 + $0x90] sm:$0xff] %v3187_v52  ;;  %v3188_v26 = vmax.f32 %v3593_v20, 0.0 }
 0x2d2   : > { %3217 = vst [vmem:[%s5781_s25 + $0x80] sm:$0xff] %v3185_v19  ;;  %v3186_v9 = vmax.f32 %v3596_v14, 0.0 }
 0x2d3   : > { %3220 = vst [vmem:[%s5781_s25 + $0x98] sm:$0xff] %v3188_v26 }
 0x2d4   : > { %3218 = vst [vmem:[%s5781_s25 + $0x88] sm:$0xff] %v3186_v9 }
 0x2dc   : > { %v3527_v23 = vpop.f32.mrb[20].mxu0 }
 0x2dd   : > { %v3090_v7 = vpop.f32.mrb[21].mxu0 }
 0x2de   : > { %v3528_v58 = vpop.f32.mrb[22].mxu0 }
 0x2df   : > { %v3093_v5 = vpop.f32.mrb[23].mxu0 }
 0x2ea   : > { %v3487_v32 = vpop.f32.mrb[20].mxu1 }
 0x2eb   : > { %v2802_v6 = vadd.f32 %v3487_v32, %v5760_v51  ;;  %v2793_v47 = vpop.f32.mrb[21].mxu1 }
 0x2ec   : > { %v2794_v8 = vadd.f32 %v5760_v51, %v2793_v47  ;;  %v3488_v13 = vpop.f32.mrb[22].mxu1 }
 0x2ed   : > { %v2805_v3 = vadd.f32 %v3488_v13, %v5760_v51  ;;  %v2796_v36 = vpop.f32.mrb[23].mxu1  ;;  %v3598_v62 = vadd.f32 %v5767_v16, %v2802_v6 }
 0x2ee   : > { %v2797_v18 = vadd.f32 %v5760_v51, %v2796_v36  ;;  %v3601_v15 = vadd.f32 %v5767_v16, %v2794_v8 }
 0x2ef   : > { %v3599_v34 = vadd.f32 %v3598_v62, %v3527_v23  ;;  %v3604_v44 = vadd.f32 %v5767_v16, %v2805_v3  ;;  %v3531_v10 = vpop.f32.mrb[24].mxu0 }
 0x2f0   : > { %v3602_v38 = vadd.f32 %v3601_v15, %v3090_v7  ;;  %v3607_v54 = vadd.f32 %v5767_v16, %v2797_v18  ;;  %v3106_v11 = vpop.f32.mrb[25].mxu0 }
 0x2f1   : > { %v3191_v40 = vmax.f32 %v3599_v34, 0.0  ;;  %v3605_v17 = vadd.f32 %v3604_v44, %v3528_v58  ;;  %v3532_v63 = vpop.f32.mrb[26].mxu0 }
 0x2f2   : > { %v3189_v4 = vmax.f32 %v3602_v38, 0.0  ;;  %v3608_v39 = vadd.f32 %v3607_v54, %v3093_v5  ;;  %v3109_v50 = vpop.f32.mrb[27].mxu0 }
 0x2f3   : > { %3223 = vst [vmem:[%s5781_s25 + $0xb0] sm:$0xff] %v3191_v40  ;;  %v3192_v41 = vmax.f32 %v3605_v17, 0.0 }
 0x2f4   : > { %3221 = vst [vmem:[%s5781_s25 + $0xa0] sm:$0xff] %v3189_v4  ;;  %v3190_v60 = vmax.f32 %v3608_v39, 0.0 }
 0x2f5   : > { %3224 = vst [vmem:[%s5781_s25 + $0xb8] sm:$0xff] %v3192_v41 }
 0x2f6   : > { %3222 = vst [vmem:[%s5781_s25 + $0xa8] sm:$0xff] %v3190_v60 }
 0x2fb   : > { %v3491_v24 = vpop.f32.mrb[24].mxu1 }
 0x2fc   : > { %v2818_v56 = vadd.f32 %v3491_v24, %v5760_v51  ;;  %v2809_v42 = vpop.f32.mrb[25].mxu1 }
 0x2fd   : > { %v2810_v53 = vadd.f32 %v5760_v51, %v2809_v42  ;;  %v3492_v43 = vpop.f32.mrb[26].mxu1 }
 0x2fe   : > { %v2821_v57 = vadd.f32 %v3492_v43, %v5760_v51  ;;  %v2812_v28 = vpop.f32.mrb[27].mxu1  ;;  %v3610_v61 = vadd.f32 %v5767_v16, %v2818_v56 }
 0x2ff   : > { %v2813_v55 = vadd.f32 %v5760_v51, %v2812_v28  ;;  %v3613_v31 = vadd.f32 %v5767_v16, %v2810_v53 }
 0x300   : > { %v3611_v46 = vadd.f32 %v3610_v61, %v3531_v10  ;;  %v3616_v21 = vadd.f32 %v5767_v16, %v2821_v57 }
 0x301   : > { %v3614_v35 = vadd.f32 %v3613_v31, %v3106_v11  ;;  %v3619_v49 = vadd.f32 %v5767_v16, %v2813_v55  ;;  %v3535_v29 = vpop.f32.mrb[28].mxu0 }
 0x302   : > { %v3195_v1 = vmax.f32 %v3611_v46, 0.0  ;;  %v3617_v22 = vadd.f32 %v3616_v21, %v3532_v63  ;;  %v3122_v37 = vpop.f32.mrb[29].mxu0 }
 0x303   : > { %v3193_v33 = vmax.f32 %v3614_v35, 0.0  ;;  %v3620_v0 = vadd.f32 %v3619_v49, %v3109_v50  ;;  %v3536_v30 = vpop.f32.mrb[30].mxu0 }
 0x304   : > { %3227 = vst [vmem:[%s5781_s25 + $0xd0] sm:$0xff] %v3195_v1  ;;  %v3196_v2 = vmax.f32 %v3617_v22, 0.0  ;;  %v3125_v59 = vpop.f32.mrb[31].mxu0 }
 0x305   : > { %3225 = vst [vmem:[%s5781_s25 + $0xc0] sm:$0xff] %v3193_v33  ;;  %v3194_v45 = vmax.f32 %v3620_v0, 0.0 }
 0x306   : > { %3228 = vst [vmem:[%s5781_s25 + $0xd8] sm:$0xff] %v3196_v2 }
 0x307   : > { %3226 = vst [vmem:[%s5781_s25 + $0xc8] sm:$0xff] %v3194_v45 }
 0x30f   : > { %v3495_v25 = vpop.f32.mrb[28].mxu1 }
 0x310   : > { %v2834_v48 = vadd.f32 %v3495_v25, %v5760_v51  ;;  %v2825_v27 = vpop.f32.mrb[29].mxu1 }
 0x311   : > { %v2826_v12 = vadd.f32 %v5760_v51, %v2825_v27  ;;  %v3496_v52 = vpop.f32.mrb[30].mxu1 }
 0x312   : > { %v3622_v20 = vadd.f32 %v5767_v16, %v2834_v48  ;;  %v2837_v19 = vadd.f32 %v3496_v52, %v5760_v51  ;;  %v2828_v14 = vpop.f32.mrb[31].mxu1 }
 0x313   : > { %v3625_v26 = vadd.f32 %v5767_v16, %v2826_v12  ;;  %v2829_v9 = vadd.f32 %v5760_v51, %v2828_v14 }
 0x314   : > { %v3623_v23 = vadd.f32 %v3622_v20, %v3535_v29  ;;  %v3628_v7 = vadd.f32 %v5767_v16, %v2837_v19 }
 0x315   : > { %v3626_v58 = vadd.f32 %v3625_v26, %v3122_v37  ;;  %v3631_v5 = vadd.f32 %v5767_v16, %v2829_v9 }
 0x316   : > { %v3199_v32 = vmax.f32 %v3623_v23, 0.0  ;;  %v3629_v6 = vadd.f32 %v3628_v7, %v3536_v30 }
 0x317   : > { %v3197_v47 = vmax.f32 %v3626_v58, 0.0  ;;  %v3632_v8 = vadd.f32 %v3631_v5, %v3125_v59 }
 0x318   : > { %3231 = vst [vmem:[%s5781_s25 + $0xf0] sm:$0xff] %v3199_v32  ;;  %v3200_v13 = vmax.f32 %v3629_v6, 0.0 }
 0x319   : > { %3229 = vst [vmem:[%s5781_s25 + $0xe0] sm:$0xff] %v3197_v47  ;;  %v3198_v51 = vmax.f32 %v3632_v8, 0.0 }
 0x31a   : > { %3232 = vst [vmem:[%s5781_s25 + $0xf8] sm:$0xff] %v3200_v13 }
 0x31b   : > { %3230 = vst [vmem:[%s5781_s25 + $0xe8] sm:$0xff] %v3198_v51 }
 0x31c   : > { %3884 = shalt.err (!%p3881_p13)
}
 0x31d   : > { %s3885_s27 = scalar_lea.hbm %s5881_s22, 4096  ;;  %s3889_s12 = scalar_lea.hbm %s5940_s10, 8192 }
 0x31e   : > { %p3886_p6 = scmp.ne.s32.totalorder %s5881_s22, %s3885_s27  ;;  %p3890_p5 = scmp.lt.u32.totalorder %s5881_s22, %s5940_s10 }
 0x31f   : > { %p3891_p8 = scmp.lt.u32.totalorder %s3889_s12, %s3885_s27  ;;  %p3893_p0 = scmp.lt.u32.totalorder %s3885_s27, %s5881_s22 }
 0x320   : > { %p3887_p10 = pnand %p3886_p6, %p6161_p1 }
 0x321   : > { %p3892_p11 = por %p3891_p8, %p3890_p5 }
 0x322   : > { %p3888_p4 = pneg %p3887_p10 }
 0x323   : > { %p3894_p3 = por %p3893_p0, %p3892_p11 }
 0x325   : > { %p3895_p7 = pnand %p3894_p3, %p3888_p4 }
 0x327   : > { %3898 = shalt.err (!%p3895_p7)
}
 0x328   : > { %s3957_s13 = smov 128   ;;  %s3958_s20 = smov 8  }
 0x329   : > { %3643 = dma.vmem_to_hbm [thread:$0]  (%p6161_p1), %s5883_s18, 4096, %s5881_s22, %s3234_s17, %s3957_s13, %s3957_s13, %s3958_s20  }
 0x32a PF: > { %s6162_s26 = sld [smem:[#allocation13_spill]]  ;;  %s6163_s24 = sld [smem:[#allocation14_spill]] }
 0x32b   : > { %p6165_p12 = scmp.ge.s32.totalorder %s3941_s16, 2 }
 0x330   : > { %s3262_s29 = sand.u32 1, %s6162_s26   ;;  %p6164_p9 = scmp.ne.s32.totalorder %s6163_s24, 0 }
 0x331   : > { %s3263_s27 = scalar_lea.sflag [#allocation5], %s3262_s29 }
 0x332   : > { %p3657_p2 = pnand %p6165_p12, %p6164_p9 }
 0x334   : > { %3924 = dma.done.wait (!%p3657_p2), %s3263_s27, 4096  }
 0x335   : > { %3926 = vsyncadd (!%p3657_p2), %s3263_s27, 4294963200  ;;  %p24_p13 = scmp.ge.s32.totalorder %s4124_s28, 4   ;;  %s6166_s13 = smov %s3933_s14 }
 0x336   : > { %s6167_s14 = smov %s3937_s15  ;;  %s6168_s15 = smov %s4140_s11 }
 0x337   : > { %s6169_s16 = smov %s4124_s28  ;;  %26 = sbr.rel (!%p24_p13) target bundleno = 6 (0x6), region = 118 }
 0x33e   :  { %3268 = vsyncpa [#allocation4], 1 }
 0x33f   :  { %3270 = vsyncpa [#allocation4 + $0x1], 1 }
 0x340   :  { %3271 = vsyncpa [#allocation7], 1 }
 0x341   :  { %3272 = vsyncpa [#allocation5], 1 }
 0x342   :  { %3274 = vsyncpa [#allocation5 + $0x1], 1 }

</bundles_post_ra>
